<compile_context>
chip_gen: v6e
topology: v6e:2x2x1
jax: 0.10.0
libtpu: 0.0.40
codegen_flags: <defaults>
</compile_context>

<pallas_src>
import math

import jax
import jax.numpy as jnp
from jax import lax
from jax.experimental import pallas as pl
from jax.experimental.pallas import tpu as pltpu

# ----------------------------------------------------------------------------
# Diffusion hyper-parameters (typical NS2 config values)
# ----------------------------------------------------------------------------
BETA_MIN = 0.05
BETA_MAX = 20.0
SIGMA = 1.0
NOISE_FACTOR = 1.0

# Model dims
MEL_DIM = 128        # C of x: (B, 128, T)
COND_DIM = 512       # cond: (B, T, 512)
SPK_Q = 32           # spk_query_emb: (B, 32, 512)
HIDDEN = 128         # WaveNet-lite residual channels
N_LAYERS = 4
DIL_CYCLE = 2        # dilation = 2 ** (layer % DIL_CYCLE)  ->  {1, 2}

RSQRT2 = 0.7071067811865476
INV_SQRT_NL = 1.0 / math.sqrt(float(N_LAYERS))
GATE_K = 3 * HIDDEN + COND_DIM            # 896: [tap-, tap0, tap+, cond]


# ----------------------------------------------------------------------------
# Fused estimator kernel: grid = (batch, layer)
# ----------------------------------------------------------------------------
def _estimator_kernel(scal_ref, x_ref, z_ref, mask_ref, cond_ref, step_ref,
                      w_in_ref, b_in_ref,
                      w_gate_ref, w_rs_ref, b_rs_ref,
                      w_o1_ref, b_o1_ref, w_o2_ref, b_o2_ref,
                      x0_ref, np_ref,
                      xt_sc, h_sc, skip_sc):
    b = pl.program_id(0)
    l = pl.program_id(1)
    n_layers = pl.num_programs(1)
    Tp, H = h_sc.shape

    # ---- layer 0: fused forward_diffusion + input projection -------------
    @pl.when(l == 0)
    def _prologue():
        decay = scal_ref[0, b]
        std = scal_ref[1, b]
        x_cl = jnp.transpose(x_ref[...], (1, 0))       # (Tp, C) via XLU
        z_cl = jnp.transpose(z_ref[...], (1, 0))
        xt = x_cl * decay + z_cl * std                 # forward diffusion
        xt_sc[...] = xt
        h0 = jnp.dot(xt.astype(jnp.bfloat16), w_in_ref[...],
                     preferred_element_type=jnp.float32) + b_in_ref[...]
        h_sc[...] = jnp.maximum(h0, 0.0)
        skip_sc[...] = jnp.zeros_like(skip_sc)

    # ---- gated dilated residual layer l (h / skip stay in VMEM) ----------
    h = h_sc[...]                                      # (Tp, H) f32
    row = lax.broadcasted_iota(jnp.int32, (Tp, H), 0)
    lidx = l % DIL_CYCLE

    # Build [t-d, t+d] taps with static rolls per dilation candidate and
    # blend with a 0/1 scalar weight (avoids dynamic shifts entirely).
    lft = jnp.zeros((Tp, H), jnp.float32)
    rgt = jnp.zeros((Tp, H), jnp.float32)
    for i in range(DIL_CYCLE):
        d = 2 ** i
        w = jnp.where(lidx == i, 1.0, 0.0)
        lt = jnp.where(row >= d, pltpu.roll(h, d, 0), 0.0)         # h[t-d]
        rt = jnp.where(row < Tp - d, pltpu.roll(h, Tp - d, 0), 0.0)  # h[t+d]
        lft = lft + w * lt
        rgt = rgt + w * rt

    # One fused gate matmul over [taps | cond]  (K = 3H + 512).
    gate_in = jnp.concatenate([lft, h, rgt, cond_ref[...]],
                              axis=-1).astype(jnp.bfloat16)
    gates = jnp.dot(gate_in, w_gate_ref[...],
                    preferred_element_type=jnp.float32)
    gates = gates + step_ref[...]          # step/spk bias (+ folded conv biases)

    # tanh * sigmoid gate; sigmoid via tanh identity (single EUP transcendental)
    zact = jnp.tanh(gates[:, :H]) * (0.5 * (jnp.tanh(0.5 * gates[:, H:]) + 1.0))

    rs = jnp.dot(zact.astype(jnp.bfloat16), w_rs_ref[...],
                 preferred_element_type=jnp.float32) + b_rs_ref[...]
    h_sc[...] = (h + rs[:, :H]) * RSQRT2
    skip_sc[...] = skip_sc[...] + rs[:, H:]

    # ---- last layer: output head + mask + noise_pred ---------------------
    @pl.when(l == n_layers - 1)
    def _epilogue():
        decay = scal_ref[0, b]
        inv_std = scal_ref[2, b]
        s = jnp.maximum(skip_sc[...] * INV_SQRT_NL, 0.0)
        h1 = jnp.dot(s.astype(jnp.bfloat16), w_o1_ref[...],
                     preferred_element_type=jnp.float32) + b_o1_ref[...]
        h1 = jnp.maximum(h1, 0.0)
        out = jnp.dot(h1.astype(jnp.bfloat16), w_o2_ref[...],
                      preferred_element_type=jnp.float32) + b_o2_ref[...]
        # The estimator masks its own output (matches reference ordering:
        # x0_pred is masked, then noise_pred is reconstructed from it).
        x0 = out * mask_ref[...]
        npred = (xt_sc[...] - x0 * decay) * inv_std
        x0_ref[...] = jnp.transpose(x0, (1, 0))        # back to (C, Tp)
        np_ref[...] = jnp.transpose(npred, (1, 0))


def _estimator_call(scal, x_p, z_p, mask_p, cond_p, step_gate, pk, B, T_pad):
    H = HIDDEN
    C = MEL_DIM
    smem = pl.BlockSpec(memory_space=pltpu.MemorySpace.SMEM)

    in_specs = [
        smem,                                                            # scal (3,B)
        pl.BlockSpec((None, C, T_pad), lambda b, l: (b, 0, 0)),          # x (B,C,Tp)
        pl.BlockSpec((None, C, T_pad), lambda b, l: (b, 0, 0)),          # z (B,C,Tp)
        pl.BlockSpec((None, T_pad, 1), lambda b, l: (b, 0, 0)),          # mask
        pl.BlockSpec((None, T_pad, COND_DIM), lambda b, l: (b, 0, 0)),   # cond (fetched once/b)
        pl.BlockSpec((None, None, 1, 2 * H), lambda b, l: (b, l, 0, 0)),  # step bias
        pl.BlockSpec((C, H), lambda b, l: (0, 0)),                       # w_in
        pl.BlockSpec((1, H), lambda b, l: (0, 0)),                       # b_in
        pl.BlockSpec((None, GATE_K, 2 * H), lambda b, l: (l, 0, 0)),     # w_gate (streamed)
        pl.BlockSpec((None, H, 2 * H), lambda b, l: (l, 0, 0)),          # w_rs (streamed)
        pl.BlockSpec((None, 1, 2 * H), lambda b, l: (l, 0, 0)),          # b_rs (streamed)
        pl.BlockSpec((H, H), lambda b, l: (0, 0)),                       # w_o1
        pl.BlockSpec((1, H), lambda b, l: (0, 0)),                       # b_o1
        pl.BlockSpec((H, C), lambda b, l: (0, 0)),                       # w_o2
        pl.BlockSpec((1, C), lambda b, l: (0, 0)),                       # b_o2
    ]
    out_specs = (
        pl.BlockSpec((None, C, T_pad), lambda b, l: (b, 0, 0)),          # x0_pred
        pl.BlockSpec((None, C, T_pad), lambda b, l: (b, 0, 0)),          # noise_pred
    )
    return pl.pallas_call(
        _estimator_kernel,
        out_shape=(jax.ShapeDtypeStruct((B, C, T_pad), jnp.float32),
                   jax.ShapeDtypeStruct((B, C, T_pad), jnp.float32)),
        grid=(B, N_LAYERS),
        in_specs=in_specs,
        out_specs=out_specs,
        scratch_shapes=[pltpu.VMEM((T_pad, C), jnp.float32),    # xt
                        pltpu.VMEM((T_pad, H), jnp.float32),    # h
                        pltpu.VMEM((T_pad, H), jnp.float32)],   # skip
        compiler_params=pltpu.CompilerParams(
            dimension_semantics=("parallel", "arbitrary"),
            vmem_limit_bytes=64 * 1024 * 1024),
    )(scal, x_p, z_p, mask_p, cond_p, step_gate,
      pk["w_in"], pk["b_in"], pk["w_gate"], pk["w_rs"], pk["b_rs"],
      pk["w_o1"], pk["b_o1"], pk["w_o2"], pk["b_o2"])


# ----------------------------------------------------------------------------
# Parameter packing: stack taps+cond into one gate weight, fuse res|skip,
# fold conv biases into the per-batch step bias, cast matmul operands to bf16.
# ----------------------------------------------------------------------------
def _pack_params(p):
    bf = jnp.bfloat16
    H = HIDDEN
    w_gate, w_rs, b_rs, w_step, b_step = [], [], [], [], []
    for lp in p["layers"]:
        w_gate.append(jnp.concatenate(
            [lp["w_dil"].reshape(3 * H, 2 * H), lp["w_cond"]], axis=0))
        w_rs.append(jnp.concatenate([lp["w_res"], lp["w_skip"]], axis=1))
        b_rs.append(jnp.concatenate([lp["b_res"], lp["b_skip"]]))
        w_step.append(lp["w_step"])
        b_step.append(lp["b_step"] + lp["b_dil"] + lp["b_cond"])
    return {
        "w_in": p["w_in"].astype(bf), "b_in": p["b_in"].reshape(1, H),
        "w_o1": p["w_o1"].astype(bf), "b_o1": p["b_o1"].reshape(1, H),
        "w_o2": p["w_o2"].astype(bf), "b_o2": p["b_o2"].reshape(1, MEL_DIM),
        "w_gate": jnp.stack(w_gate).astype(bf),            # (L, 896, 2H)
        "w_rs": jnp.stack(w_rs).astype(bf),                # (L, H, 2H)
        "b_rs": jnp.stack(b_rs).reshape(N_LAYERS, 1, 2 * H),
        "w_step_all": jnp.concatenate(w_step, axis=1),     # (H, L*2H)
        "b_step_all": jnp.concatenate(b_step),             # (L*2H,)
        "w_t1": p["w_t1"], "b_t1": p["b_t1"],
        "w_t2": p["w_t2"], "b_t2": p["b_t2"],
        "w_spk": p["w_spk"], "b_spk": p["b_spk"],
    }


def _sinusoidal_embedding(t, dim):
    half = dim // 2
    freqs = jnp.exp(-math.log(10000.0)
                    * jnp.arange(half, dtype=jnp.float32) / (half - 1))
    args = t[:, None] * freqs[None, :] * 1000.0
    return jnp.concatenate([jnp.sin(args), jnp.cos(args)], axis=-1)


# ----------------------------------------------------------------------------
# Diffusion.forward
# ----------------------------------------------------------------------------
@jax.jit
def diffusion_forward(params, x, x_mask, cond, spk_query_emb, rng):
    """
    x: (B, 128, T), x_mask: (B, T) (0 = masked), cond: (B, T, 512),
    spk_query_emb: (B, 32, 512)
    """
    offset = 1e-5
    B, C, T = x.shape
    H = HIDDEN
    T_pad = ((T + 127) // 128) * 128     # lane-dense, handles ragged T
    pk = _pack_params(params)

    k_t, k_z = jax.random.split(rng)
    t = jnp.clip(jax.random.uniform(k_t, (B,), x.dtype), offset, 1.0 - offset)
    z = jax.random.normal(k_z, x.shape, x.dtype)          # noise, (B, C, T)

    # Per-batch diffusion scalars (expm1 for stability at tiny t).
    sig2 = SIGMA * SIGMA
    cum_beta = BETA_MIN * t + 0.5 * (BETA_MAX - BETA_MIN) * t * t
    decay = jnp.exp(-0.5 * cum_beta / sig2)
    var = -sig2 * jnp.expm1(-cum_beta / sig2)
    std = jnp.sqrt(var) * NOISE_FACTOR
    scal = jnp.stack([decay, std, 1.0 / std]).astype(jnp.float32)   # (3, B)

    # ---- per-batch step / speaker conditioning (tiny -> plain XLA) ----
    temb = _sinusoidal_embedding(t, H)
    h1 = temb @ pk["w_t1"] + pk["b_t1"]
    h1 = h1 * jax.nn.sigmoid(h1)                          # silu
    base = h1 @ pk["w_t2"] + pk["b_t2"]
    # TODO(synk): real NS2 WaveNet attends over spk_query_emb; mean-pool stand-in.
    base = base + jnp.mean(spk_query_emb, axis=1) @ pk["w_spk"] + pk["b_spk"]
    step_gate = (base @ pk["w_step_all"] + pk["b_step_all"]).astype(jnp.float32)
    step_gate = step_gate.reshape(B, N_LAYERS, 1, 2 * H)

    # ---- pad T to a multiple of 128 (padded frames masked & sliced away) ----
    pad = T_pad - T
    if pad:
        x_p = jnp.pad(x, ((0, 0), (0, 0), (0, pad)))
        z_p = jnp.pad(z, ((0, 0), (0, 0), (0, pad)))
        cond_p = jnp.pad(cond, ((0, 0), (0, pad), (0, 0)))
        mask_p = jnp.pad(x_mask, ((0, 0), (0, pad)))
    else:
        x_p, z_p, cond_p, mask_p = x, z, cond, x_mask
    mask_p = mask_p[:, :, None].astype(jnp.float32)

    x0_full, np_full = _estimator_call(
        scal, x_p.astype(jnp.float32), z_p.astype(jnp.float32), mask_p,
        cond_p.astype(jnp.float32), step_gate, pk, B, T_pad)

    x0_pred = x0_full[:, :, :T]
    noise_pred = np_full[:, :, :T]
    return {"x0_pred": x0_pred, "noise_pred": noise_pred,
            "noise": z, "x0_gt": x}


# ----------------------------------------------------------------------------
# Deterministic parameter init (natural shapes; packed inside forward)
# ----------------------------------------------------------------------------
def init_params(key):
    def w(k, shape, scale=0.02):
        return scale * jax.random.normal(k, shape, jnp.float32)

    keys = jax.random.split(key, 64)
    ki = iter(range(64))
    p = {
        "w_in": w(keys[next(ki)], (MEL_DIM, HIDDEN)),
        "b_in": jnp.zeros((HIDDEN,), jnp.float32),
        "w_t1": w(keys[next(ki)], (HIDDEN, 4 * HIDDEN)),
        "b_t1": jnp.zeros((4 * HIDDEN,), jnp.float32),
        "w_t2": w(keys[next(ki)], (4 * HIDDEN, HIDDEN)),
        "b_t2": jnp.zeros((HIDDEN,), jnp.float32),
        "w_spk": w(keys[next(ki)], (COND_DIM, HIDDEN)),
        "b_spk": jnp.zeros((HIDDEN,), jnp.float32),
        "w_o1": w(keys[next(ki)], (HIDDEN, HIDDEN)),
        "b_o1": jnp.zeros((HIDDEN,), jnp.float32),
        "w_o2": w(keys[next(ki)], (HIDDEN, MEL_DIM)),
        "b_o2": jnp.zeros((MEL_DIM,), jnp.float32),
        "layers": [],
    }
    for _ in range(N_LAYERS):
        p["layers"].append({
            "w_dil": w(keys[next(ki)], (3, HIDDEN, 2 * HIDDEN)),
            "b_dil": jnp.zeros((2 * HIDDEN,), jnp.float32),
            "w_cond": w(keys[next(ki)], (COND_DIM, 2 * HIDDEN)),
            "b_cond": jnp.zeros((2 * HIDDEN,), jnp.float32),
            "w_step": w(keys[next(ki)], (HIDDEN, 2 * HIDDEN)),
            "b_step": jnp.zeros((2 * HIDDEN,), jnp.float32),
            "w_res": w(keys[next(ki)], (HIDDEN, HIDDEN)),
            "b_res": jnp.zeros((HIDDEN,), jnp.float32),
            "w_skip": w(keys[next(ki)], (HIDDEN, HIDDEN)),
            "b_skip": jnp.zeros((HIDDEN,), jnp.float32),
        })
    return p


# ----------------------------------------------------------------------------
# Main
# ----------------------------------------------------------------------------
if __name__ == "__main__":
    B, T = 2, 96          # T not a multiple of 128 -> exercises the pad path
    root = jax.random.PRNGKey(0)
    k_p, k_x, k_c, k_s, k_fwd = jax.random.split(root, 5)

    params = init_params(k_p)
    x = jax.random.normal(k_x, (B, MEL_DIM, T), jnp.float32)
    cond = jax.random.normal(k_c, (B, T, COND_DIM), jnp.float32)
    spk_query_emb = jax.random.normal(k_s, (B, SPK_Q, COND_DIM), jnp.float32)
    # mask is 0 for masked positions; mask out the last 3 frames of batch 1
    x_mask = jnp.ones((B, T), jnp.float32).at[1, -3:].set(0.0)

    out = diffusion_forward(params, x, x_mask, cond, spk_query_emb, k_fwd)
    jax.block_until_ready(out)

    assert out["x0_pred"].shape == (B, MEL_DIM, T)
    assert out["noise_pred"].shape == (B, MEL_DIM, T)
    assert out["noise"].shape == (B, MEL_DIM, T)
    assert out["x0_gt"].shape == (B, MEL_DIM, T)
    assert all(bool(jnp.all(jnp.isfinite(v))) for v in out.values())
    print("KERNEL_OK")
</pallas_src>

<mosaic_0001>
module attributes {stable_mosaic.version = 11 : i64} {
  func.func @_estimator_kernel(%arg0: i32, %arg1: i32, %arg2: memref<3x2xf32, #tpu.memory_space<smem>>, %arg3: memref<1x128x128xf32, #tpu.memory_space<vmem>>, %arg4: memref<1x128x128xf32, #tpu.memory_space<vmem>>, %arg5: memref<1x128x1xf32, #tpu.memory_space<vmem>>, %arg6: memref<1x128x512xf32, #tpu.memory_space<vmem>>, %arg7: memref<1x1x1x256xf32, #tpu.memory_space<vmem>>, %arg8: memref<128x128xbf16, #tpu.memory_space<vmem>>, %arg9: memref<1x128xf32, #tpu.memory_space<vmem>>, %arg10: memref<1x896x256xbf16, #tpu.memory_space<vmem>>, %arg11: memref<1x128x256xbf16, #tpu.memory_space<vmem>>, %arg12: memref<1x1x256xf32, #tpu.memory_space<vmem>>, %arg13: memref<128x128xbf16, #tpu.memory_space<vmem>>, %arg14: memref<1x128xf32, #tpu.memory_space<vmem>>, %arg15: memref<128x128xbf16, #tpu.memory_space<vmem>>, %arg16: memref<1x128xf32, #tpu.memory_space<vmem>>, %arg17: memref<1x128x128xf32, #tpu.memory_space<vmem>>, %arg18: memref<1x128x128xf32, #tpu.memory_space<vmem>>, %arg19: memref<128x128xf32, #tpu.memory_space<vmem>>, %arg20: memref<128x128xf32, #tpu.memory_space<vmem>>, %arg21: memref<128x128xf32, #tpu.memory_space<vmem>>) attributes {dimension_semantics = [#tpu.dimension_semantics<parallel>, #tpu.dimension_semantics<arbitrary>], iteration_bounds = array<i64: 2, 4>, scalar_prefetch = 0 : i64, scratch_operands = 3 : i64, tpu.core_type = #tpu.core_type<tc>, window_params = [{transform_indices = @transform_0, window_bounds = array<i64: 3, 2>}, {transform_indices = @transform_1, window_bounds = array<i64: 1, 128, 128>}, {transform_indices = @transform_2, window_bounds = array<i64: 1, 128, 128>}, {transform_indices = @transform_3, window_bounds = array<i64: 1, 128, 1>}, {transform_indices = @transform_4, window_bounds = array<i64: 1, 128, 512>}, {transform_indices = @transform_5, window_bounds = array<i64: 1, 1, 1, 256>}, {pipeline_mode = #tpu.pipeline_mode<synchronous>, transform_indices = @transform_6, window_bounds = array<i64: 128, 128>}, {pipeline_mode = #tpu.pipeline_mode<synchronous>, transform_indices = @transform_7, window_bounds = array<i64: 1, 128>}, {transform_indices = @transform_8, window_bounds = array<i64: 1, 896, 256>}, {transform_indices = @transform_9, window_bounds = array<i64: 1, 128, 256>}, {transform_indices = @transform_10, window_bounds = array<i64: 1, 1, 256>}, {pipeline_mode = #tpu.pipeline_mode<synchronous>, transform_indices = @transform_11, window_bounds = array<i64: 128, 128>}, {pipeline_mode = #tpu.pipeline_mode<synchronous>, transform_indices = @transform_12, window_bounds = array<i64: 1, 128>}, {pipeline_mode = #tpu.pipeline_mode<synchronous>, transform_indices = @transform_13, window_bounds = array<i64: 128, 128>}, {pipeline_mode = #tpu.pipeline_mode<synchronous>, transform_indices = @transform_14, window_bounds = array<i64: 1, 128>}, {transform_indices = @transform_15, window_bounds = array<i64: 1, 128, 128>}, {transform_indices = @transform_16, window_bounds = array<i64: 1, 128, 128>}]} {
    %c0_i32 = arith.constant 0 : i32
    %0 = arith.cmpi eq, %arg1, %c0_i32 : i32
    %1 = arith.extui %0 : i1 to i32
    %c0_i32_0 = arith.constant 0 : i32
    %2 = arith.cmpi ne, %1, %c0_i32_0 : i32
    scf.if %2 {
      %c0_52 = arith.constant 0 : index
      %95 = arith.index_cast %arg0 : i32 to index
      %96 = memref.load %arg2[%c0_52, %95] : memref<3x2xf32, #tpu.memory_space<smem>>
      %c1 = arith.constant 1 : index
      %97 = arith.index_cast %arg0 : i32 to index
      %98 = memref.load %arg2[%c1, %97] : memref<3x2xf32, #tpu.memory_space<smem>>
      %c0_53 = arith.constant 0 : index
      %c0_54 = arith.constant 0 : index
      %c0_55 = arith.constant 0 : index
      %99 = vector.load %arg3[%c0_53, %c0_54, %c0_55] : memref<1x128x128xf32, #tpu.memory_space<vmem>>, vector<1x128x128xf32>
      %100 = vector.shape_cast %99 : vector<1x128x128xf32> to vector<128x128xf32>
      %101 = tpu.transpose %100, [1, 0] : vector<128x128xf32> -> vector<128x128xf32>
      %c0_56 = arith.constant 0 : index
      %c0_57 = arith.constant 0 : index
      %c0_58 = arith.constant 0 : index
      %102 = vector.load %arg4[%c0_56, %c0_57, %c0_58] : memref<1x128x128xf32, #tpu.memory_space<vmem>>, vector<1x128x128xf32>
      %103 = vector.shape_cast %102 : vector<1x128x128xf32> to vector<128x128xf32>
      %104 = tpu.transpose %103, [1, 0] : vector<128x128xf32> -> vector<128x128xf32>
      %105 = vector.broadcast %96 : f32 to vector<128x128xf32>
      %106 = arith.mulf %101, %105 : vector<128x128xf32>
      %107 = vector.broadcast %98 : f32 to vector<128x128xf32>
      %108 = arith.mulf %104, %107 : vector<128x128xf32>
      %109 = arith.addf %106, %108 : vector<128x128xf32>
      %c0_59 = arith.constant 0 : index
      %c0_60 = arith.constant 0 : index
      %110 = vector.load %arg19[%c0_59, %c0_60] : memref<128x128xf32, #tpu.memory_space<vmem>>, vector<128x128xf32>
      tpu.vector_store %arg19[%c0_59, %c0_60], %109 {strides = array<i32>} : memref<128x128xf32, #tpu.memory_space<vmem>>, vector<128x128xf32>,
      %111 = arith.truncf %109 : vector<128x128xf32> to vector<128x128xbf16>
      %c0_61 = arith.constant 0 : index
      %c0_62 = arith.constant 0 : index
      %112 = vector.load %arg8[%c0_61, %c0_62] : memref<128x128xbf16, #tpu.memory_space<vmem>>, vector<128x128xbf16>
      %cst_63 = arith.constant dense<0.000000e+00> : vector<128x128xf32>
      %113 = tpu.matmul %111, %112, %cst_63 {dimension_numbers = #tpu.dot_dimension_numbers<[1], [0], [0], [1], [0, 0, 1, 1], [], []>} : vector<128x128xbf16>, vector<128x128xbf16>, vector<128x128xf32> -> vector<128x128xf32>
      %c0_64 = arith.constant 0 : index
      %c0_65 = arith.constant 0 : index
      %114 = vector.load %arg9[%c0_64, %c0_65] : memref<1x128xf32, #tpu.memory_space<vmem>>, vector<1x128xf32>
      %115 = vector.broadcast %114 : vector<1x128xf32> to vector<128x128xf32>
      %116 = arith.addf %113, %115 : vector<128x128xf32>
      %cst_66 = arith.constant 0.000000e+00 : f32
      %117 = vector.broadcast %cst_66 : f32 to vector<128x128xf32>
      %118 = arith.maximumf %116, %117 : vector<128x128xf32>
      %c0_67 = arith.constant 0 : index
      %c0_68 = arith.constant 0 : index
      %119 = vector.load %arg20[%c0_67, %c0_68] : memref<128x128xf32, #tpu.memory_space<vmem>>, vector<128x128xf32>
      tpu.vector_store %arg20[%c0_67, %c0_68], %118 {strides = array<i32>} : memref<128x128xf32, #tpu.memory_space<vmem>>, vector<128x128xf32>,
      %cst_69 = arith.constant 0.000000e+00 : f32
      %120 = vector.broadcast %cst_69 : f32 to vector<128x128xf32>
      %c0_70 = arith.constant 0 : index
      %c0_71 = arith.constant 0 : index
      %121 = vector.load %arg21[%c0_70, %c0_71] : memref<128x128xf32, #tpu.memory_space<vmem>>, vector<128x128xf32>
      tpu.vector_store %arg21[%c0_70, %c0_71], %120 {strides = array<i32>} : memref<128x128xf32, #tpu.memory_space<vmem>>, vector<128x128xf32>,
    } else {
    }
    %c0 = arith.constant 0 : index
    %c0_1 = arith.constant 0 : index
    %3 = vector.load %arg20[%c0, %c0_1] : memref<128x128xf32, #tpu.memory_space<vmem>>, vector<128x128xf32>
    %4 = tpu.iota {dimensions = array<i32: 0>} : vector<128x128xi32>
    %c2_i32 = arith.constant 2 : i32
    %c0_i32_2 = arith.constant 0 : i32
    %5 = arith.cmpi eq, %c2_i32, %c0_i32_2 : i32
    %c1_i32 = arith.constant 1 : i32
    %6 = arith.select %5, %c1_i32, %c2_i32 : i32
    %7 = arith.remsi %arg1, %6 : i32
    %c0_i32_3 = arith.constant 0 : i32
    %8 = arith.cmpi ne, %7, %c0_i32_3 : i32
    %c0_i32_4 = arith.constant 0 : i32
    %9 = arith.cmpi slt, %7, %c0_i32_4 : i32
    %c0_i32_5 = arith.constant 0 : i32
    %10 = arith.cmpi slt, %6, %c0_i32_5 : i32
    %11 = arith.xori %9, %10 : i1
    %12 = arith.andi %11, %8 : i1
    %13 = arith.addi %7, %6 : i32
    %14 = arith.select %12, %13, %7 : i32
    %cst = arith.constant 0.000000e+00 : f32
    %15 = vector.broadcast %cst : f32 to vector<128x128xf32>
    %cst_6 = arith.constant 0.000000e+00 : f32
    %16 = vector.broadcast %cst_6 : f32 to vector<128x128xf32>
    %c0_i32_7 = arith.constant 0 : i32
    %17 = arith.cmpi eq, %14, %c0_i32_7 : i32
    %cst_8 = arith.constant 1.000000e+00 : f32
    %cst_9 = arith.constant 0.000000e+00 : f32
    %18 = arith.select %17, %cst_8, %cst_9 : f32
    %c1_i32_10 = arith.constant 1 : i32
    %19 = vector.broadcast %c1_i32_10 : i32 to vector<128x128xi32>
    %20 = arith.cmpi sge, %4, %19 : vector<128x128xi32>
    %c1_i32_11 = arith.constant 1 : i32
    %21 = tpu.dynamic_rotate %3 by %c1_i32_11 dim 0 : vector<128x128xf32>, i32 -> vector<128x128xf32>
    %cst_12 = arith.constant 0.000000e+00 : f32
    %22 = vector.broadcast %cst_12 : f32 to vector<128x128xf32>
    %23 = arith.select %20, %21, %22 : vector<128x128xi1>, vector<128x128xf32>
    %c127_i32 = arith.constant 127 : i32
    %24 = vector.broadcast %c127_i32 : i32 to vector<128x128xi32>
    %25 = arith.cmpi slt, %4, %24 : vector<128x128xi32>
    %c127_i32_13 = arith.constant 127 : i32
    %26 = tpu.dynamic_rotate %3 by %c127_i32_13 dim 0 : vector<128x128xf32>, i32 -> vector<128x128xf32>
    %cst_14 = arith.constant 0.000000e+00 : f32
    %27 = vector.broadcast %cst_14 : f32 to vector<128x128xf32>
    %28 = arith.select %25, %26, %27 : vector<128x128xi1>, vector<128x128xf32>
    %29 = vector.broadcast %18 : f32 to vector<128x128xf32>
    %30 = arith.mulf %29, %23 : vector<128x128xf32>
    %31 = arith.addf %15, %30 : vector<128x128xf32>
    %32 = vector.broadcast %18 : f32 to vector<128x128xf32>
    %33 = arith.mulf %32, %28 : vector<128x128xf32>
    %34 = arith.addf %16, %33 : vector<128x128xf32>
    %c1_i32_15 = arith.constant 1 : i32
    %35 = arith.cmpi eq, %14, %c1_i32_15 : i32
    %cst_16 = arith.constant 1.000000e+00 : f32
    %cst_17 = arith.constant 0.000000e+00 : f32
    %36 = arith.select %35, %cst_16, %cst_17 : f32
    %c2_i32_18 = arith.constant 2 : i32
    %37 = vector.broadcast %c2_i32_18 : i32 to vector<128x128xi32>
    %38 = arith.cmpi sge, %4, %37 : vector<128x128xi32>
    %c2_i32_19 = arith.constant 2 : i32
    %39 = tpu.dynamic_rotate %3 by %c2_i32_19 dim 0 : vector<128x128xf32>, i32 -> vector<128x128xf32>
    %cst_20 = arith.constant 0.000000e+00 : f32
    %40 = vector.broadcast %cst_20 : f32 to vector<128x128xf32>
    %41 = arith.select %38, %39, %40 : vector<128x128xi1>, vector<128x128xf32>
    %c126_i32 = arith.constant 126 : i32
    %42 = vector.broadcast %c126_i32 : i32 to vector<128x128xi32>
    %43 = arith.cmpi slt, %4, %42 : vector<128x128xi32>
    %c126_i32_21 = arith.constant 126 : i32
    %44 = tpu.dynamic_rotate %3 by %c126_i32_21 dim 0 : vector<128x128xf32>, i32 -> vector<128x128xf32>
    %cst_22 = arith.constant 0.000000e+00 : f32
    %45 = vector.broadcast %cst_22 : f32 to vector<128x128xf32>
    %46 = arith.select %43, %44, %45 : vector<128x128xi1>, vector<128x128xf32>
    %47 = vector.broadcast %36 : f32 to vector<128x128xf32>
    %48 = arith.mulf %47, %41 : vector<128x128xf32>
    %49 = arith.addf %31, %48 : vector<128x128xf32>
    %50 = vector.broadcast %36 : f32 to vector<128x128xf32>
    %51 = arith.mulf %50, %46 : vector<128x128xf32>
    %52 = arith.addf %34, %51 : vector<128x128xf32>
    %c0_23 = arith.constant 0 : index
    %c0_24 = arith.constant 0 : index
    %c0_25 = arith.constant 0 : index
    %53 = vector.load %arg6[%c0_23, %c0_24, %c0_25] : memref<1x128x512xf32, #tpu.memory_space<vmem>>, vector<1x128x512xf32>
    %54 = vector.shape_cast %53 : vector<1x128x512xf32> to vector<128x512xf32>
    %55 = tpu.concatenate %49, %3, %52, %54 in 1 : vector<128x128xf32>, vector<128x128xf32>, vector<128x128xf32>, vector<128x512xf32> -> vector<128x896xf32>
    %56 = arith.truncf %55 : vector<128x896xf32> to vector<128x896xbf16>
    %c0_26 = arith.constant 0 : index
    %c0_27 = arith.constant 0 : index
    %c0_28 = arith.constant 0 : index
    %57 = vector.load %arg10[%c0_26, %c0_27, %c0_28] : memref<1x896x256xbf16, #tpu.memory_space<vmem>>, vector<1x896x256xbf16>
    %58 = vector.shape_cast %57 : vector<1x896x256xbf16> to vector<896x256xbf16>
    %cst_29 = arith.constant dense<0.000000e+00> : vector<128x256xf32>
    %59 = tpu.matmul %56, %58, %cst_29 {dimension_numbers = #tpu.dot_dimension_numbers<[1], [0], [0], [1], [0, 0, 1, 1], [], []>} : vector<128x896xbf16>, vector<896x256xbf16>, vector<128x256xf32> -> vector<128x256xf32>
    %c0_30 = arith.constant 0 : index
    %c0_31 = arith.constant 0 : index
    %c0_32 = arith.constant 0 : index
    %c0_33 = arith.constant 0 : index
    %60 = vector.load %arg7[%c0_30, %c0_31, %c0_32, %c0_33] : memref<1x1x1x256xf32, #tpu.memory_space<vmem>>, vector<1x1x1x256xf32>
    %61 = vector.shape_cast %60 : vector<1x1x1x256xf32> to vector<1x256xf32>
    %62 = vector.broadcast %61 : vector<1x256xf32> to vector<128x256xf32>
    %63 = arith.addf %59, %62 : vector<128x256xf32>
    %64 = vector.extract_strided_slice %63 {offsets = [0, 0], sizes = [128, 128], strides = [1, 1]} : vector<128x256xf32> to vector<128x128xf32>
    %65 = math.tanh %64 : vector<128x128xf32>
    %66 = vector.extract_strided_slice %63 {offsets = [0, 128], sizes = [128, 128], strides = [1, 1]} : vector<128x256xf32> to vector<128x128xf32>
    %cst_34 = arith.constant 5.000000e-01 : f32
    %67 = vector.broadcast %cst_34 : f32 to vector<128x128xf32>
    %68 = arith.mulf %67, %66 : vector<128x128xf32>
    %69 = math.tanh %68 : vector<128x128xf32>
    %cst_35 = arith.constant 1.000000e+00 : f32
    %70 = vector.broadcast %cst_35 : f32 to vector<128x128xf32>
    %71 = arith.addf %69, %70 : vector<128x128xf32>
    %cst_36 = arith.constant 5.000000e-01 : f32
    %72 = vector.broadcast %cst_36 : f32 to vector<128x128xf32>
    %73 = arith.mulf %72, %71 : vector<128x128xf32>
    %74 = arith.mulf %65, %73 : vector<128x128xf32>
    %75 = arith.truncf %74 : vector<128x128xf32> to vector<128x128xbf16>
    %c0_37 = arith.constant 0 : index
    %c0_38 = arith.constant 0 : index
    %c0_39 = arith.constant 0 : index
    %76 = vector.load %arg11[%c0_37, %c0_38, %c0_39] : memref<1x128x256xbf16, #tpu.memory_space<vmem>>, vector<1x128x256xbf16>
    %77 = vector.shape_cast %76 : vector<1x128x256xbf16> to vector<128x256xbf16>
    %cst_40 = arith.constant dense<0.000000e+00> : vector<128x256xf32>
    %78 = tpu.matmul %75, %77, %cst_40 {dimension_numbers = #tpu.dot_dimension_numbers<[1], [0], [0], [1], [0, 0, 1, 1], [], []>} : vector<128x128xbf16>, vector<128x256xbf16>, vector<128x256xf32> -> vector<128x256xf32>
    %c0_41 = arith.constant 0 : index
    %c0_42 = arith.constant 0 : index
    %c0_43 = arith.constant 0 : index
    %79 = vector.load %arg12[%c0_41, %c0_42, %c0_43] : memref<1x1x256xf32, #tpu.memory_space<vmem>>, vector<1x1x256xf32>
    %80 = vector.shape_cast %79 : vector<1x1x256xf32> to vector<1x256xf32>
    %81 = vector.broadcast %80 : vector<1x256xf32> to vector<128x256xf32>
    %82 = arith.addf %78, %81 : vector<128x256xf32>
    %83 = vector.extract_strided_slice %82 {offsets = [0, 0], sizes = [128, 128], strides = [1, 1]} : vector<128x256xf32> to vector<128x128xf32>
    %84 = arith.addf %3, %83 : vector<128x128xf32>
    %cst_44 = arith.constant 0.707106769 : f32
    %85 = vector.broadcast %cst_44 : f32 to vector<128x128xf32>
    %86 = arith.mulf %84, %85 : vector<128x128xf32>
    %c0_45 = arith.constant 0 : index
    %c0_46 = arith.constant 0 : index
    %87 = vector.load %arg20[%c0_45, %c0_46] : memref<128x128xf32, #tpu.memory_space<vmem>>, vector<128x128xf32>
    tpu.vector_store %arg20[%c0_45, %c0_46], %86 {strides = array<i32>} : memref<128x128xf32, #tpu.memory_space<vmem>>, vector<128x128xf32>,
    %c0_47 = arith.constant 0 : index
    %c0_48 = arith.constant 0 : index
    %88 = vector.load %arg21[%c0_47, %c0_48] : memref<128x128xf32, #tpu.memory_space<vmem>>, vector<128x128xf32>
    %89 = vector.extract_strided_slice %82 {offsets = [0, 128], sizes = [128, 128], strides = [1, 1]} : vector<128x256xf32> to vector<128x128xf32>
    %90 = arith.addf %88, %89 : vector<128x128xf32>
    %c0_49 = arith.constant 0 : index
    %c0_50 = arith.constant 0 : index
    %91 = vector.load %arg21[%c0_49, %c0_50] : memref<128x128xf32, #tpu.memory_space<vmem>>, vector<128x128xf32>
    tpu.vector_store %arg21[%c0_49, %c0_50], %90 {strides = array<i32>} : memref<128x128xf32, #tpu.memory_space<vmem>>, vector<128x128xf32>,
    %c3_i32 = arith.constant 3 : i32
    %92 = arith.cmpi eq, %arg1, %c3_i32 : i32
    %93 = arith.extui %92 : i1 to i32
    %c0_i32_51 = arith.constant 0 : i32
    %94 = arith.cmpi ne, %93, %c0_i32_51 : i32
    scf.if %94 {
      %c0_52 = arith.constant 0 : index
      %95 = arith.index_cast %arg0 : i32 to index
      %96 = memref.load %arg2[%c0_52, %95] : memref<3x2xf32, #tpu.memory_space<smem>>
      %c2 = arith.constant 2 : index
      %97 = arith.index_cast %arg0 : i32 to index
      %98 = memref.load %arg2[%c2, %97] : memref<3x2xf32, #tpu.memory_space<smem>>
      %c0_53 = arith.constant 0 : index
      %c0_54 = arith.constant 0 : index
      %99 = vector.load %arg21[%c0_53, %c0_54] : memref<128x128xf32, #tpu.memory_space<vmem>>, vector<128x128xf32>
      %cst_55 = arith.constant 5.000000e-01 : f32
      %100 = vector.broadcast %cst_55 : f32 to vector<128x128xf32>
      %101 = arith.mulf %99, %100 : vector<128x128xf32>
      %cst_56 = arith.constant 0.000000e+00 : f32
      %102 = vector.broadcast %cst_56 : f32 to vector<128x128xf32>
      %103 = arith.maximumf %101, %102 : vector<128x128xf32>
      %104 = arith.truncf %103 : vector<128x128xf32> to vector<128x128xbf16>
      %c0_57 = arith.constant 0 : index
      %c0_58 = arith.constant 0 : index
      %105 = vector.load %arg13[%c0_57, %c0_58] : memref<128x128xbf16, #tpu.memory_space<vmem>>, vector<128x128xbf16>
      %cst_59 = arith.constant dense<0.000000e+00> : vector<128x128xf32>
      %106 = tpu.matmul %104, %105, %cst_59 {dimension_numbers = #tpu.dot_dimension_numbers<[1], [0], [0], [1], [0, 0, 1, 1], [], []>} : vector<128x128xbf16>, vector<128x128xbf16>, vector<128x128xf32> -> vector<128x128xf32>
      %c0_60 = arith.constant 0 : index
      %c0_61 = arith.constant 0 : index
      %107 = vector.load %arg14[%c0_60, %c0_61] : memref<1x128xf32, #tpu.memory_space<vmem>>, vector<1x128xf32>
      %108 = vector.broadcast %107 : vector<1x128xf32> to vector<128x128xf32>
      %109 = arith.addf %106, %108 : vector<128x128xf32>
      %cst_62 = arith.constant 0.000000e+00 : f32
      %110 = vector.broadcast %cst_62 : f32 to vector<128x128xf32>
      %111 = arith.maximumf %109, %110 : vector<128x128xf32>
      %112 = arith.truncf %111 : vector<128x128xf32> to vector<128x128xbf16>
      %c0_63 = arith.constant 0 : index
      %c0_64 = arith.constant 0 : index
      %113 = vector.load %arg15[%c0_63, %c0_64] : memref<128x128xbf16, #tpu.memory_space<vmem>>, vector<128x128xbf16>
      %cst_65 = arith.constant dense<0.000000e+00> : vector<128x128xf32>
      %114 = tpu.matmul %112, %113, %cst_65 {dimension_numbers = #tpu.dot_dimension_numbers<[1], [0], [0], [1], [0, 0, 1, 1], [], []>} : vector<128x128xbf16>, vector<128x128xbf16>, vector<128x128xf32> -> vector<128x128xf32>
      %c0_66 = arith.constant 0 : index
      %c0_67 = arith.constant 0 : index
      %115 = vector.load %arg16[%c0_66, %c0_67] : memref<1x128xf32, #tpu.memory_space<vmem>>, vector<1x128xf32>
      %116 = vector.broadcast %115 : vector<1x128xf32> to vector<128x128xf32>
      %117 = arith.addf %114, %116 : vector<128x128xf32>
      %c0_68 = arith.constant 0 : index
      %c0_69 = arith.constant 0 : index
      %c0_70 = arith.constant 0 : index
      %118 = vector.load %arg5[%c0_68, %c0_69, %c0_70] : memref<1x128x1xf32, #tpu.memory_space<vmem>>, vector<1x128x1xf32>
      %119 = vector.shape_cast %118 : vector<1x128x1xf32> to vector<128x1xf32>
      %120 = vector.broadcast %119 : vector<128x1xf32> to vector<128x128xf32>
      %121 = arith.mulf %117, %120 : vector<128x128xf32>
      %c0_71 = arith.constant 0 : index
      %c0_72 = arith.constant 0 : index
      %122 = vector.load %arg19[%c0_71, %c0_72] : memref<128x128xf32, #tpu.memory_space<vmem>>, vector<128x128xf32>
      %123 = vector.broadcast %96 : f32 to vector<128x128xf32>
      %124 = arith.mulf %121, %123 : vector<128x128xf32>
      %125 = arith.subf %122, %124 : vector<128x128xf32>
      %126 = vector.broadcast %98 : f32 to vector<128x128xf32>
      %127 = arith.mulf %125, %126 : vector<128x128xf32>
      %128 = tpu.transpose %121, [1, 0] : vector<128x128xf32> -> vector<128x128xf32>
      %c0_73 = arith.constant 0 : index
      %c0_74 = arith.constant 0 : index
      %c0_75 = arith.constant 0 : index
      %129 = vector.load %arg17[%c0_73, %c0_74, %c0_75] : memref<1x128x128xf32, #tpu.memory_space<vmem>>, vector<1x128x128xf32>
      %130 = vector.shape_cast %129 : vector<1x128x128xf32> to vector<128x128xf32>
      %131 = vector.shape_cast %128 : vector<128x128xf32> to vector<1x128x128xf32>
      tpu.vector_store %arg17[%c0_73, %c0_74, %c0_75], %131 {strides = array<i32>} : memref<1x128x128xf32, #tpu.memory_space<vmem>>, vector<1x128x128xf32>,
      %132 = tpu.transpose %127, [1, 0] : vector<128x128xf32> -> vector<128x128xf32>
      %c0_76 = arith.constant 0 : index
      %c0_77 = arith.constant 0 : index
      %c0_78 = arith.constant 0 : index
      %133 = vector.load %arg18[%c0_76, %c0_77, %c0_78] : memref<1x128x128xf32, #tpu.memory_space<vmem>>, vector<1x128x128xf32>
      %134 = vector.shape_cast %133 : vector<1x128x128xf32> to vector<128x128xf32>
      %135 = vector.shape_cast %132 : vector<128x128xf32> to vector<1x128x128xf32>
      tpu.vector_store %arg18[%c0_76, %c0_77, %c0_78], %135 {strides = array<i32>} : memref<1x128x128xf32, #tpu.memory_space<vmem>>, vector<1x128x128xf32>,
    } else {
    }
    return
  }
  func.func @transform_0(%arg0: i32, %arg1: i32) -> (i32, i32) {
    %c0_i32 = arith.constant 0 : i32
    %c0_i32_0 = arith.constant 0 : i32
    %c0_i32_1 = arith.constant 0 : i32
    return %c0_i32, %c0_i32_0 : i32, i32
  }
  func.func @transform_1(%arg0: i32, %arg1: i32) -> (i32, i32, i32) {
    %c0_i32 = arith.constant 0 : i32
    %c0_i32_0 = arith.constant 0 : i32
    %c0_i32_1 = arith.constant 0 : i32
    return %arg0, %c0_i32, %c0_i32_0 : i32, i32, i32
  }
  func.func @transform_2(%arg0: i32, %arg1: i32) -> (i32, i32, i32) {
    %c0_i32 = arith.constant 0 : i32
    %c0_i32_0 = arith.constant 0 : i32
    %c0_i32_1 = arith.constant 0 : i32
    return %arg0, %c0_i32, %c0_i32_0 : i32, i32, i32
  }
  func.func @transform_3(%arg0: i32, %arg1: i32) -> (i32, i32, i32) {
    %c0_i32 = arith.constant 0 : i32
    %c0_i32_0 = arith.constant 0 : i32
    %c0_i32_1 = arith.constant 0 : i32
    return %arg0, %c0_i32, %c0_i32_0 : i32, i32, i32
  }
  func.func @transform_4(%arg0: i32, %arg1: i32) -> (i32, i32, i32) {
    %c0_i32 = arith.constant 0 : i32
    %c0_i32_0 = arith.constant 0 : i32
    %c0_i32_1 = arith.constant 0 : i32
    return %arg0, %c0_i32, %c0_i32_0 : i32, i32, i32
  }
  func.func @transform_5(%arg0: i32, %arg1: i32) -> (i32, i32, i32, i32) {
    %c0_i32 = arith.constant 0 : i32
    %c0_i32_0 = arith.constant 0 : i32
    %c0_i32_1 = arith.constant 0 : i32
    return %arg0, %arg1, %c0_i32, %c0_i32_0 : i32, i32, i32, i32
  }
  func.func @transform_6(%arg0: i32, %arg1: i32) -> (i32, i32) {
    %c0_i32 = arith.constant 0 : i32
    %c0_i32_0 = arith.constant 0 : i32
    %c0_i32_1 = arith.constant 0 : i32
    return %c0_i32, %c0_i32_0 : i32, i32
  }
  func.func @transform_7(%arg0: i32, %arg1: i32) -> (i32, i32) {
    %c0_i32 = arith.constant 0 : i32
    %c0_i32_0 = arith.constant 0 : i32
    %c0_i32_1 = arith.constant 0 : i32
    return %c0_i32, %c0_i32_0 : i32, i32
  }
  func.func @transform_8(%arg0: i32, %arg1: i32) -> (i32, i32, i32) {
    %c0_i32 = arith.constant 0 : i32
    %c0_i32_0 = arith.constant 0 : i32
    %c0_i32_1 = arith.constant 0 : i32
    return %arg1, %c0_i32, %c0_i32_0 : i32, i32, i32
  }
  func.func @transform_9(%arg0: i32, %arg1: i32) -> (i32, i32, i32) {
    %c0_i32 = arith.constant 0 : i32
    %c0_i32_0 = arith.constant 0 : i32
    %c0_i32_1 = arith.constant 0 : i32
    return %arg1, %c0_i32, %c0_i32_0 : i32, i32, i32
  }
  func.func @transform_10(%arg0: i32, %arg1: i32) -> (i32, i32, i32) {
    %c0_i32 = arith.constant 0 : i32
    %c0_i32_0 = arith.constant 0 : i32
    %c0_i32_1 = arith.constant 0 : i32
    return %arg1, %c0_i32, %c0_i32_0 : i32, i32, i32
  }
  func.func @transform_11(%arg0: i32, %arg1: i32) -> (i32, i32) {
    %c0_i32 = arith.constant 0 : i32
    %c0_i32_0 = arith.constant 0 : i32
    %c0_i32_1 = arith.constant 0 : i32
    return %c0_i32, %c0_i32_0 : i32, i32
  }
  func.func @transform_12(%arg0: i32, %arg1: i32) -> (i32, i32) {
    %c0_i32 = arith.constant 0 : i32
    %c0_i32_0 = arith.constant 0 : i32
    %c0_i32_1 = arith.constant 0 : i32
    return %c0_i32, %c0_i32_0 : i32, i32
  }
  func.func @transform_13(%arg0: i32, %arg1: i32) -> (i32, i32) {
    %c0_i32 = arith.constant 0 : i32
    %c0_i32_0 = arith.constant 0 : i32
    %c0_i32_1 = arith.constant 0 : i32
    return %c0_i32, %c0_i32_0 : i32, i32
  }
  func.func @transform_14(%arg0: i32, %arg1: i32) -> (i32, i32) {
    %c0_i32 = arith.constant 0 : i32
    %c0_i32_0 = arith.constant 0 : i32
    %c0_i32_1 = arith.constant 0 : i32
    return %c0_i32, %c0_i32_0 : i32, i32
  }
  func.func @transform_15(%arg0: i32, %arg1: i32) -> (i32, i32, i32) {
    %c0_i32 = arith.constant 0 : i32
    %c0_i32_0 = arith.constant 0 : i32
    %c0_i32_1 = arith.constant 0 : i32
    return %arg0, %c0_i32, %c0_i32_0 : i32, i32, i32
  }
  func.func @transform_16(%arg0: i32, %arg1: i32) -> (i32, i32, i32) {
    %c0_i32 = arith.constant 0 : i32
    %c0_i32_0 = arith.constant 0 : i32
    %c0_i32_1 = arith.constant 0 : i32
    return %arg0, %c0_i32, %c0_i32_0 : i32, i32, i32
  }
}

</mosaic_0001>

<bundles_post_ra>
// kernel: diffusion_forward.11
= control target key start
LH: loop header
LB: loop body
LE: loop exit
PB: predicated region body
PF: predicated region fallthrough
CT: control target
= control target key end

     0   :  { %s6282_s0 = inlined_call_operand.vmem [shape: f32[3,2], index: 0, kind: input, shape index: {}]   ;;  %s6283_s1 = inlined_call_operand.vmem [shape: f32[2,128,128], index: 1, kind: input, shape index: {}]   ;;  %s6284_s2 = inlined_call_operand.vmem [shape: f32[2,128,128], index: 2, kind: input, shape index: {}]   ;;  %s6285_s3 = inlined_call_operand.vmem [shape: f32[2,128,1], index: 3, kind: input, shape index: {}]   ;;  %s6286_s4 = inlined_call_operand.vmem [shape: f32[2,128,512], index: 4, kind: input, shape index: {}]   ;;  %s6287_s5 = inlined_call_operand.vmem [shape: f32[2,4,1,256], index: 5, kind: input, shape index: {}]   ;;  %s6288_s6 = inlined_call_operand.vmem [shape: bf16[128,128], index: 6, kind: input, shape index: {}]   ;;  %s6289_s7 = inlined_call_operand.vmem [shape: f32[1,128], index: 7, kind: input, shape index: {}]   ;;  %s6290_s8 = inlined_call_operand.vmem [shape: bf16[4,896,256], index: 8, kind: input, shape index: {}]   ;;  %s6291_s9 = inlined_call_operand.vmem [shape: bf16[4,128,256], index: 9, kind: input, shape index: {}]   ;;  %s6292_s10 = inlined_call_operand.vmem [shape: f32[4,1,256], index: 10, kind: input, shape index: {}]   ;;  %s6293_s11 = inlined_call_operand.vmem [shape: bf16[128,128], index: 11, kind: input, shape index: {}]   ;;  %s6294_s12 = inlined_call_operand.vmem [shape: f32[1,128], index: 12, kind: input, shape index: {}]   ;;  %s6295_s13 = inlined_call_operand.vmem [shape: bf16[128,128], index: 13, kind: input, shape index: {}]   ;;  %s6296_s14 = inlined_call_operand.vmem [shape: f32[1,128], index: 14, kind: input, shape index: {}]   ;;  %s6297_s15 = inlined_call_operand.vmem [shape: f32[2,128,128], index: 15, kind: output, shape index: {0}]   ;;  %s6298_s16 = inlined_call_operand.vmem [shape: f32[2,128,128], index: 16, kind: output, shape index: {1}]  }
   0x1   :  { %6309 = sst [smem:[#allocation15_spill]] %s6282_s0 }
   0x2   :  { %6310 = sst [smem:[#allocation16_spill]] %s6283_s1 }
   0x3   :  { %6311 = sst [smem:[#allocation17_spill]] %s6284_s2 }
   0x4   :  { %6312 = sst [smem:[#allocation18_spill]] %s6285_s3 }
   0x5   :  { %6313 = sst [smem:[#allocation19_spill]] %s6286_s4 }
   0x6   :  { %6314 = sst [smem:[#allocation20_spill]] %s6289_s7 }
   0x7   :  { %6315 = sst [smem:[#allocation21_spill]] %s6293_s11 }
   0x8   :  { %6316 = sst [smem:[#allocation22_spill]] %s6294_s12 }
   0x9   :  { %6317 = sst [smem:[#allocation23_spill]] %s6295_s13 }
   0xa   :  { %6318 = sst [smem:[#allocation24_spill]] %s6296_s14 }
   0xb   :  { %22 = vsyncpa [#allocation6], 0  ;;  %s5023_s21 = smov 0   ;;  %s5025_s22 = smov 0  }
   0xc   :  { %s5027_s23 = smov 0   ;;  %s5029_s24 = smov 0  }
   0xd   :  { %s5031_s25 = smov 0  }
   0xe LB: > { %6319 = sst [smem:[#allocation8_spill]] %s4920_s22  ;;  %s4130_s26 = sadd.s32 4294967295, %s4932_s25   ;;  %s4932_s25 = sphi %s5031_s25, %s28_s25   ;;  %s4928_s24 = sphi %s5029_s24, %s6346_s24   ;;  %s4924_s23 = sphi %s5027_s23, %s6345_s23   ;;  %s4920_s22 = sphi %s5025_s22, %s6344_s22   ;;  %s4916_s21 = sphi %s5023_s21, %s6343_s21  }
   0xf   : > { %6320 = sst [smem:[#allocation9_spill]] %s4924_s23  ;;  %s37_s27 = sadd.s32 1, %s4924_s23 }
  0x10   : > { %6321 = sst [smem:[#allocation10_spill]] %s4928_s24  ;;  %p38_p0 = scmp.ge.s32.totalorder %s37_s27, 4 }
  0x11   : > { %6322 = sst [smem:[#allocation11_spill]] %s4932_s25  ;;  %s40_s28 = sadd.s32 1, %s4928_s24 }
  0x12   : > { %p4132_p1 = scmp.ge.s32.totalorder %s4932_s25, 1  ;;  %p454_p2 = scmp.lt.s32.totalorder %s4932_s25, 9 }
  0x13   : > { %s6348_s27 = smov (%p38_p0, %s37_s27), 0  ;;  %s6350_s28 = smov (!%p38_p0, %s40_s28), %s4928_s24 }
  0x14   : > { %6323 = sst [smem:[#allocation12_spill]] %s6348_s27  ;;  %p5056_p3 = pnand %p4132_p1, %p454_p2 }
  0x15   : > { %p42_p4 = scmp.ge.s32.totalorder %s6350_s28, 2  ;;  %p5060_p5 = scmp.eq.s32.totalorder %s4130_s26, 0 }
  0x16   : > { %p4527_p6 = pneg %p5056_p3  ;;  %s6326_s18 = sld [smem:[#allocation15_spill]] }
  0x17   : > { %s6352_s28 = smov (%p42_p4, %s6350_s28), 0 }
  0x18   : > { %6327 = sst [smem:[#allocation13_spill]] %s6352_s28  ;;  %p4528_p7 = pnand %p5060_p5, %p4527_p6 }
  0x1a   : > { %p4877_p9 = pneg %p4528_p7 }
  0x1c   : > { %s467_s19 = sshll.u32 %s6326_s18, 4  ;;  %s468_s19 = int_to_ptr.vmem [resolvable:$true] %s467_s19 }
  0x1d   : > { %s4875_s20 = scalar_lea.vmem %s468_s19, 64  ;;  %p4883_p12 = scmp.lt.s32.totalorder %s468_s19, %s468_s19 }
  0x1e   : > { %p4876_p8 = scmp.ne.s32.totalorder %s468_s19, %s4875_s20  ;;  %p4884_p13 = scmp.lt.s32.totalorder %s4875_s20, %s4875_s20 }
  0x20   : > { %p4878_p10 = pnand %p4877_p9, %p4876_p8  ;;  %p4885_p0 = por %p4884_p13, %p4883_p12 }
  0x22   : > { %p4879_p11 = pneg %p4878_p10 }
  0x24   : > { %p4886_p1 = pnand %p4885_p0, %p4879_p11 }
  0x26   : > { %4889 = shalt.err (!%p4886_p1)
}
  0x27   : > { %s4934_s26 = smov [#allocation5]   ;;  %564 = sbr.rel (%p5056_p3) target bundleno = 1740 (0x6cc), region = 80 }
  0x28   : > { %4530 = dma.vmem_to_smem (!%p4528_p7), %s468_s19, 64, %s4934_s26, [#allocation6]  }
  0x2c   : > { %4911 = dma.done.wait (%p5060_p5), [#allocation6], 64  }
  0x2d   : > { %4913 = vsyncadd (%p5060_p5), [#allocation6], 4294967232 }
  0x2e   : > { %570 = sfence }
  0x2f   : > { %p657_p2 = scmp.lt.s32.totalorder %s4920_s22, 1  ;;  %p679_p4 = scmp.lt.s32.totalorder %s4916_s21, 3 }
  0x30   : > { %s6328_s1 = sld [smem:[#allocation16_spill]]  ;;  %p4155_p3 = scmp.ne.s32.totalorder %s4916_s21, 0 }
  0x31   : > { %s658_s0 = scalar_select %p657_p2, %s4920_s22, 1 }
  0x32   : > { %s680_s17 = scalar_select %p679_p4, %s4916_s21, 3 }
  0x33   : > { %s4319_s18 = sshll.u32 %s658_s0, 7  ;;  %s4322_s19 = sshll.u32 %s658_s0, 9 }
  0x34   : > { %s6329_s2 = sld [smem:[#allocation17_spill]]  ;;  %s4145_s11 = sshll.u32 %s680_s17, 1 }
  0x35   : > { %s6330_s3 = sld [smem:[#allocation18_spill]]  ;;  %s4146_s7 = sshll.u32 %s658_s0, 3 }
  0x36   : > { %s5086_s26 = scalar_lea.vmem %s6328_s1, %s4319_s18  ;;  %s6332_s4 = sld [smem:[#allocation19_spill]] }
  0x37   : > { %s5103_s20 = sadd.s32 %s4146_s7, %s4145_s11  ;;  %s4522_s29 = smul.u32 896, %s680_s17 }
  0x38   : > { %s684_s28 = scalar_lea.vmem %s6287_s5, %s5103_s20  ;;  %s5127_s1 = scalar_lea.vmem %s6297_s15, %s4319_s18 }
  0x39   : > { %s5112_s24 = scalar_lea.vmem %s6290_s8, %s4522_s29  ;;  %s5132_s22 = scalar_lea.vmem %s6298_s16, %s4319_s18 }
  0x3a   : > { %s5091_s30 = scalar_lea.vmem %s6329_s2, %s4319_s18  ;;  %s4323_s2 = sshll.u32 %s680_s17, 7 }
  0x3b   : > { %s5096_s25 = scalar_lea.vmem %s6330_s3, %s4319_s18  ;;  %s5117_s14 = scalar_lea.vmem %s6291_s9, %s4323_s2 }
  0x3c   : > { %6331 = sst [smem:[#allocation14_spill]] %s5096_s25  ;;  %s5101_s13 = scalar_lea.vmem %s6332_s4, %s4322_s19 }
  0x3d   : > { %s5122_s19 = scalar_lea.vmem %s6292_s10, %s4145_s11  ;;  %713 = sbr.rel (%p4155_p3) target bundleno = 463 (0x1cf), region = 88 }
  0x3e   : > { %s6333_s11 = sld [smem:[#allocation8_spill]] (!%p4155_p3) }
  0x3f   : > { %s6334_s17 = sld [smem:[#allocation20_spill]] (!%p4155_p3) }
  0x42   : > { %v771_v0 = vld [vmem:[%s5091_s30] sm:$0xff]  ;;  %v772_v2 = vld [vmem:[%s5091_s30 + $0x8] sm:$0xff]  ;;  %v773_v4 = vld [vmem:[%s5091_s30 + $0x10] sm:$0xff] }
  0x43   : > { %v723_v1 = vld [vmem:[%s5086_s26] sm:$0xff]  ;;  %787 = vxpose.xlu1.b32.start [1/16] %v771_v0, 128  ;;  %v724_v3 = vld [vmem:[%s5086_s26 + $0x8] sm:$0xff]  ;;  %v725_v5 = vld [vmem:[%s5086_s26 + $0x10] sm:$0xff] }
  0x44   : > { %739 = vxpose.xlu0.b32.start [1/16] %v723_v1, 128  ;;  %v774_v6 = vld [vmem:[%s5091_s30 + $0x18] sm:$0xff]  ;;  %v4578_v9 = vld [vmem:[%s6288_s6 + $0x30] sm:$0xff]   ;;  %v775_v10 = vld [vmem:[%s5091_s30 + $0x20] sm:$0xff]  ;;  %s715_s25 = sshra.s32 %s6333_s11, 7  ;;  %s720_s23 = sand.u32 127, %s6333_s11 }
  0x45   : > { %v726_v7 = vld [vmem:[%s5086_s26 + $0x18] sm:$0xff]  ;;  %v727_v11 = vld [vmem:[%s5086_s26 + $0x20] sm:$0xff]  ;;  %v4579_v12 = vld [vmem:[%s6288_s6 + $0x28] sm:$0xff]   ;;  %s4326_s18 = sshll.u32 %s715_s25, 7  ;;  %s714_s0 = sld [smem:[#allocation5 + %s6333_s11]] }
  0x46   : > { %v4577_v8 = vld [vmem:[%s6288_s6 + $0x38] sm:$0xff]   ;;  %v776_v13 = vld [vmem:[%s5091_s30 + $0x28] sm:$0xff]  ;;  %v4580_v15 = vld [vmem:[%s6288_s6 + $0x20] sm:$0xff]   ;;  %s4327_s29 = sadd.s32 128, %s4326_s18 }
  0x47   : > { %788 = vxpose.xlu1.b32.cont [2/16] %v772_v2, 128  ;;  %4378 = vmatprep.subr.bf16.mxu0 %v4577_v8  ;;  %v728_v14 = vld [vmem:[%s5086_s26 + $0x28] sm:$0xff]  ;;  %v777_v16 = vld [vmem:[%s5091_s30 + $0x30] sm:$0xff]  ;;  %v4581_v18 = vld [vmem:[%s6288_s6 + $0x18] sm:$0xff]   ;;  %s721_s12 = sadd.s32 %s4327_s29, %s720_s23 }
  0x48   : > { %740 = vxpose.xlu0.b32.cont [2/16] %v724_v3, 128  ;;  %4474 = vmatprep.subr.bf16.mxu1 %v4577_v8  ;;  %v729_v17 = vld [vmem:[%s5086_s26 + $0x30] sm:$0xff]  ;;  %v778_v19 = vld [vmem:[%s5091_s30 + $0x38] sm:$0xff]  ;;  %v779_v22 = vld [vmem:[%s5091_s30 + $0x40] sm:$0xff]  ;;  %s722_s7 = sld [smem:[#allocation5 + %s721_s12]] }
  0x49   : > { %4379 = vmatpush3.bf16.msra.mxu0 %v4577_v8  ;;  %4482 = vmatpush3.bf16.msra.mxu1 %v4577_v8  ;;  %v730_v20 = vld [vmem:[%s5086_s26 + $0x38] sm:$0xff]  ;;  %v4582_v21 = vld [vmem:[%s6288_s6 + $0x10] sm:$0xff]   ;;  %v731_v23 = vld [vmem:[%s5086_s26 + $0x40] sm:$0xff] }
  0x4a   : > { %4380 = vmatprep.subr.bf16.mxu0 %v4578_v9  ;;  %4475 = vmatprep.subr.bf16.mxu1 %v4578_v9  ;;  %v4583_v24 = vld [vmem:[%s6288_s6 + $0x8] sm:$0xff]   ;;  %v4584_v27 = vld [vmem:[%s6288_s6] sm:$0xff]   ;;  %v781_v28 = vld [vmem:[%s5091_s30 + $0x50] sm:$0xff] }
  0x4b   : > { %789 = vxpose.xlu1.b32.cont [3/16] %v773_v4, 128  ;;  %v780_v25 = vld [vmem:[%s5091_s30 + $0x48] sm:$0xff]  ;;  %v733_v29 = vld [vmem:[%s5086_s26 + $0x50] sm:$0xff]  ;;  %v782_v30 = vld [vmem:[%s5091_s30 + $0x58] sm:$0xff]  ;;  %v5196_v41 = vstv %s714_s0 }
  0x4c   : > { %741 = vxpose.xlu0.b32.cont [3/16] %v725_v5, 128  ;;  %v732_v26 = vld [vmem:[%s5086_s26 + $0x48] sm:$0xff]  ;;  %v734_v31 = vld [vmem:[%s5086_s26 + $0x58] sm:$0xff]  ;;  %v783_v32 = vld [vmem:[%s5091_s30 + $0x60] sm:$0xff] }
  0x4d   : > { %4381 = vmatpush3.bf16.msra.mxu0 %v4578_v9  ;;  %4483 = vmatpush3.bf16.msra.mxu1 %v4578_v9  ;;  %v735_v33 = vld [vmem:[%s5086_s26 + $0x60] sm:$0xff]  ;;  %v784_v34 = vld [vmem:[%s5091_s30 + $0x68] sm:$0xff]  ;;  %v785_v36 = vld [vmem:[%s5091_s30 + $0x70] sm:$0xff] }
  0x4e   : > { %4382 = vmatprep.subr.bf16.mxu0 %v4579_v12  ;;  %4476 = vmatprep.subr.bf16.mxu1 %v4579_v12  ;;  %v736_v35 = vld [vmem:[%s5086_s26 + $0x68] sm:$0xff]  ;;  %v737_v37 = vld [vmem:[%s5086_s26 + $0x70] sm:$0xff]  ;;  %v786_v38 = vld [vmem:[%s5091_s30 + $0x78] sm:$0xff]  ;;  %v5194_v40 = vstv %s722_s7 }
  0x4f   : > { %790 = vxpose.xlu1.b32.cont [4/16] %v774_v6, 128  ;;  %v738_v39 = vld [vmem:[%s5086_s26 + $0x78] sm:$0xff] }
  0x50   : > { %742 = vxpose.xlu0.b32.cont [4/16] %v726_v7, 128 }
  0x51   : > { %4383 = vmatpush3.bf16.msra.mxu0 %v4579_v12  ;;  %4484 = vmatpush3.bf16.msra.mxu1 %v4579_v12 }
  0x52   : > { %4384 = vmatprep.subr.bf16.mxu0 %v4580_v15  ;;  %4477 = vmatprep.subr.bf16.mxu1 %v4580_v15 }
  0x53   : > { %791 = vxpose.xlu1.b32.cont [5/16] %v775_v10, 128 }
  0x54   : > { %743 = vxpose.xlu0.b32.cont [5/16] %v727_v11, 128 }
  0x55   : > { %4385 = vmatpush3.bf16.msra.mxu0 %v4580_v15  ;;  %4485 = vmatpush3.bf16.msra.mxu1 %v4580_v15 }
  0x56   : > { %4386 = vmatprep.subr.bf16.mxu0 %v4581_v18  ;;  %4478 = vmatprep.subr.bf16.mxu1 %v4581_v18 }
  0x57   : > { %792 = vxpose.xlu1.b32.cont [6/16] %v776_v13, 128 }
  0x58   : > { %744 = vxpose.xlu0.b32.cont [6/16] %v728_v14, 128 }
  0x59   : > { %4387 = vmatpush3.bf16.msra.mxu0 %v4581_v18  ;;  %4486 = vmatpush3.bf16.msra.mxu1 %v4581_v18 }
  0x5a   : > { %4388 = vmatprep.subr.bf16.mxu0 %v4582_v21  ;;  %4479 = vmatprep.subr.bf16.mxu1 %v4582_v21 }
  0x5b   : > { %793 = vxpose.xlu1.b32.cont [7/16] %v777_v16, 128 }
  0x5c   : > { %745 = vxpose.xlu0.b32.cont [7/16] %v729_v17, 128 }
  0x5d   : > { %4389 = vmatpush3.bf16.msra.mxu0 %v4582_v21  ;;  %4487 = vmatpush3.bf16.msra.mxu1 %v4582_v21 }
  0x5e   : > { %4390 = vmatprep.subr.bf16.mxu0 %v4583_v24  ;;  %4480 = vmatprep.subr.bf16.mxu1 %v4583_v24 }
  0x5f   : > { %794 = vxpose.xlu1.b32.cont [8/16] %v778_v19, 128 }
  0x60   : > { %746 = vxpose.xlu0.b32.cont [8/16] %v730_v20, 128 }
  0x61   : > { %4391 = vmatpush3.bf16.msra.mxu0 %v4583_v24  ;;  %4488 = vmatpush3.bf16.msra.mxu1 %v4583_v24 }
  0x62   : > { %4392 = vmatprep.subr.bf16.mxu0 %v4584_v27  ;;  %4481 = vmatprep.subr.bf16.mxu1 %v4584_v27 }
  0x63   : > { %795 = vxpose.xlu1.b32.cont [9/16] %v779_v22, 128 }
  0x64   : > { %747 = vxpose.xlu0.b32.cont [9/16] %v731_v23, 128 }
  0x65   : > { %4393 = vmatpush3.bf16.msra.mxu0 %v4584_v27  ;;  %4489 = vmatpush3.bf16.msra.mxu1 %v4584_v27 }
  0x67   : > { %796 = vxpose.xlu1.b32.cont [10/16] %v780_v25, 128 }
  0x68   : > { %748 = vxpose.xlu0.b32.cont [10/16] %v732_v26, 128 }
  0x6b   : > { %797 = vxpose.xlu1.b32.cont [11/16] %v781_v28, 128 }
  0x6c   : > { %749 = vxpose.xlu0.b32.cont [11/16] %v733_v29, 128 }
  0x6f   : > { %798 = vxpose.xlu1.b32.cont [12/16] %v782_v30, 128 }
  0x70   : > { %750 = vxpose.xlu0.b32.cont [12/16] %v734_v31, 128 }
  0x73   : > { %799 = vxpose.xlu1.b32.cont [13/16] %v783_v32, 128 }
  0x74   : > { %751 = vxpose.xlu0.b32.cont [13/16] %v735_v33, 128 }
  0x77   : > { %800 = vxpose.xlu1.b32.cont [14/16] %v784_v34, 128 }
  0x78   : > { %752 = vxpose.xlu0.b32.cont [14/16] %v736_v35, 128 }
  0x7b   : > { %801 = vxpose.xlu1.b32.cont [15/16] %v785_v36, 128 }
  0x7c   : > { %753 = vxpose.xlu0.b32.cont [15/16] %v737_v37, 128 }
  0x7f   : > { %802 = vxpose.xlu1.b32.end [16/16] %v786_v38, 128 }
  0x80   : > { %754 = vxpose.xlu0.b32.end [16/16] %v738_v39, 128 }
  0xbf   : > { %v803_v42 = vpop.trf.xlu1 }
  0xc0   : > { %v755_v43 = vpop.trf.xlu0  ;;  %v837_v44 = vmul.f32 %v5194_v40, %v803_v42 }
  0xc1   : > { %v820_v45 = vmul.f32 %v5196_v41, %v755_v43 }
  0xc3   : > { %v853_v46 = vadd.f32 %v837_v44, %v820_v45  ;;  %v804_v47 = vpop.trf.xlu1 }
  0xc4   : > { %v756_v48 = vpop.trf.xlu0  ;;  %v838_v49 = vmul.f32 %v5194_v40, %v804_v47 }
  0xc5   : > { %v821_v50 = vmul.f32 %v5196_v41, %v756_v48  ;;  %869 = vst [vmem:[#allocation2 + $0x30] sm:$0xff] %v853_v46 }
  0xc7   : > { %v854_v51 = vadd.f32 %v838_v49, %v821_v50  ;;  %v805_v52 = vpop.trf.xlu1 }
  0xc8   : > { %v757_v53 = vpop.trf.xlu0  ;;  %v839_v54 = vmul.f32 %v5194_v40, %v805_v52 }
  0xc9   : > { %v822_v55 = vmul.f32 %v5196_v41, %v757_v53  ;;  %870 = vst [vmem:[#allocation2] sm:$0xff] %v854_v51  ;;  %v885_v56 = vpack.c.bf16 %v854_v51, %v853_v46 }
  0xcb   : > { %v855_v57 = vadd.f32 %v839_v54, %v822_v55  ;;  %4394 = vmatprep.mubr.bf16.mxu0 %v885_v56  ;;  %v806_v58 = vpop.trf.xlu1 }
  0xcc   : > { %v758_v59 = vpop.trf.xlu0  ;;  %v840_v60 = vmul.f32 %v5194_v40, %v806_v58 }
  0xcd   : > { %871 = vst [vmem:[#allocation2 + $0x58] sm:$0xff] %v855_v57  ;;  %v823_v61 = vmul.f32 %v5196_v41, %v758_v59 }
  0xcf   : > { %v856_v62 = vadd.f32 %v840_v60, %v823_v61  ;;  %v807_v63 = vpop.trf.xlu1 }
  0xd0   : > { %v759_v0 = vpop.trf.xlu0  ;;  %v841_v1 = vmul.f32 %v5194_v40, %v807_v63 }
  0xd1   : > { %872 = vst [vmem:[#allocation2 + $0x18] sm:$0xff] %v856_v62  ;;  %v824_v2 = vmul.f32 %v5196_v41, %v759_v0  ;;  %v886_v3 = vpack.c.bf16 %v856_v62, %v855_v57 }
  0xd3   : > { %v857_v4 = vadd.f32 %v841_v1, %v824_v2  ;;  %4395 = vmatmul.mubr.bf16.vlgmr.msra.gmra.mxu0 %v886_v3  ;;  %v808_v5 = vpop.trf.xlu1 }
  0xd4   : > { %v760_v6 = vpop.trf.xlu0  ;;  %v842_v7 = vmul.f32 %v5194_v40, %v808_v5 }
  0xd5   : > { %873 = vst [vmem:[#allocation2 + $0x50] sm:$0xff] %v857_v4  ;;  %v825_v8 = vmul.f32 %v5196_v41, %v760_v6 }
  0xd7   : > { %v858_v9 = vadd.f32 %v842_v7, %v825_v8  ;;  %v809_v10 = vpop.trf.xlu1 }
  0xd8   : > { %v761_v11 = vpop.trf.xlu0  ;;  %v843_v12 = vmul.f32 %v5194_v40, %v809_v10 }
  0xd9   : > { %874 = vst [vmem:[#allocation2 + $0x68] sm:$0xff] %v858_v9  ;;  %v826_v13 = vmul.f32 %v5196_v41, %v761_v11  ;;  %v887_v14 = vpack.c.bf16 %v858_v9, %v857_v4  ;;  %v4935_v4 = vmov 0.0  }
  0xda   : > { %1093 = vst [vmem:[#allocation4 + $0x8] sm:$0xff] %v4935_v4  ;;  %1094 = vst [vmem:[#allocation4] sm:$0xff] %v4935_v4 }
  0xdb   : > { %v859_v15 = vadd.f32 %v843_v12, %v826_v13  ;;  %4398 = vmatprep.mubr.bf16.mxu0 %v887_v14  ;;  %v810_v16 = vpop.trf.xlu1  ;;  %1095 = vst [vmem:[#allocation4 + $0x48] sm:$0xff] %v4935_v4  ;;  %1096 = vst [vmem:[#allocation4 + $0x60] sm:$0xff] %v4935_v4 }
  0xdc   : > { %v762_v17 = vpop.trf.xlu0  ;;  %v844_v18 = vmul.f32 %v5194_v40, %v810_v16  ;;  %1097 = vst [vmem:[#allocation4 + $0x68] sm:$0xff] %v4935_v4  ;;  %1098 = vst [vmem:[#allocation4 + $0x18] sm:$0xff] %v4935_v4 }
  0xdd   : > { %875 = vst [vmem:[#allocation2 + $0x8] sm:$0xff] %v859_v15  ;;  %v827_v19 = vmul.f32 %v5196_v41, %v762_v17  ;;  %1099 = vst [vmem:[#allocation4 + $0x10] sm:$0xff] %v4935_v4 }
  0xde   : > { %1100 = vst [vmem:[#allocation4 + $0x38] sm:$0xff] %v4935_v4  ;;  %1101 = vst [vmem:[#allocation4 + $0x40] sm:$0xff] %v4935_v4 }
  0xdf   : > { %v860_v20 = vadd.f32 %v844_v18, %v827_v19  ;;  %v811_v21 = vpop.trf.xlu1  ;;  %1102 = vst [vmem:[#allocation4 + $0x28] sm:$0xff] %v4935_v4  ;;  %1103 = vst [vmem:[#allocation4 + $0x70] sm:$0xff] %v4935_v4 }
  0xe0   : > { %v763_v22 = vpop.trf.xlu0  ;;  %v845_v23 = vmul.f32 %v5194_v40, %v811_v21  ;;  %1104 = vst [vmem:[#allocation4 + $0x20] sm:$0xff] %v4935_v4  ;;  %1105 = vst [vmem:[#allocation4 + $0x58] sm:$0xff] %v4935_v4 }
  0xe1   : > { %876 = vst [vmem:[#allocation2 + $0x48] sm:$0xff] %v860_v20  ;;  %v828_v24 = vmul.f32 %v5196_v41, %v763_v22  ;;  %v888_v25 = vpack.c.bf16 %v860_v20, %v859_v15  ;;  %1106 = vst [vmem:[#allocation4 + $0x30] sm:$0xff] %v4935_v4 }
  0xe2   : > { %1107 = vst [vmem:[#allocation4 + $0x50] sm:$0xff] %v4935_v4  ;;  %1108 = vst [vmem:[#allocation4 + $0x78] sm:$0xff] %v4935_v4 }
  0xe3   : > { %4399 = vmatmul.mubr.bf16.gmra.mxu0 %v888_v25  ;;  %v861_v26 = vadd.f32 %v845_v23, %v828_v24  ;;  %v812_v27 = vpop.trf.xlu1 }
  0xe4   : > { %v764_v28 = vpop.trf.xlu0  ;;  %v846_v29 = vmul.f32 %v5194_v40, %v812_v27 }
  0xe5   : > { %v829_v30 = vmul.f32 %v5196_v41, %v764_v28  ;;  %877 = vst [vmem:[#allocation2 + $0x40] sm:$0xff] %v861_v26 }
  0xe7   : > { %v862_v31 = vadd.f32 %v846_v29, %v829_v30  ;;  %v813_v32 = vpop.trf.xlu1 }
  0xe8   : > { %v765_v33 = vpop.trf.xlu0  ;;  %v847_v34 = vmul.f32 %v5194_v40, %v813_v32 }
  0xe9   : > { %v830_v35 = vmul.f32 %v5196_v41, %v765_v33  ;;  %878 = vst [vmem:[#allocation2 + $0x20] sm:$0xff] %v862_v31  ;;  %v889_v36 = vpack.c.bf16 %v862_v31, %v861_v26 }
  0xeb   : > { %v863_v37 = vadd.f32 %v847_v34, %v830_v35  ;;  %4402 = vmatprep.mubr.bf16.mxu1 %v889_v36  ;;  %v814_v38 = vpop.trf.xlu1 }
  0xec   : > { %v766_v39 = vpop.trf.xlu0  ;;  %v848_v42 = vmul.f32 %v5194_v40, %v814_v38 }
  0xed   : > { %879 = vst [vmem:[#allocation2 + $0x10] sm:$0xff] %v863_v37  ;;  %v831_v43 = vmul.f32 %v5196_v41, %v766_v39 }
  0xef   : > { %v864_v44 = vadd.f32 %v848_v42, %v831_v43  ;;  %v815_v45 = vpop.trf.xlu1 }
  0xf0   : > { %v767_v46 = vpop.trf.xlu0  ;;  %v849_v47 = vmul.f32 %v5194_v40, %v815_v45 }
  0xf1   : > { %880 = vst [vmem:[#allocation2 + $0x38] sm:$0xff] %v864_v44  ;;  %v832_v48 = vmul.f32 %v5196_v41, %v767_v46  ;;  %v890_v49 = vpack.c.bf16 %v864_v44, %v863_v37 }
  0xf3   : > { %v865_v50 = vadd.f32 %v849_v47, %v832_v48  ;;  %4403 = vmatmul.mubr.bf16.vlgmr.msra.gmra.mxu1 %v890_v49  ;;  %v816_v51 = vpop.trf.xlu1 }
  0xf4   : > { %v768_v52 = vpop.trf.xlu0  ;;  %v850_v53 = vmul.f32 %v5194_v40, %v816_v51 }
  0xf5   : > { %881 = vst [vmem:[#allocation2 + $0x60] sm:$0xff] %v865_v50  ;;  %v833_v54 = vmul.f32 %v5196_v41, %v768_v52 }
  0xf7   : > { %v866_v55 = vadd.f32 %v850_v53, %v833_v54  ;;  %v817_v56 = vpop.trf.xlu1 }
  0xf8   : > { %v769_v57 = vpop.trf.xlu0  ;;  %v851_v58 = vmul.f32 %v5194_v40, %v817_v56 }
  0xf9   : > { %882 = vst [vmem:[#allocation2 + $0x70] sm:$0xff] %v866_v55  ;;  %v834_v59 = vmul.f32 %v5196_v41, %v769_v57  ;;  %v891_v60 = vpack.c.bf16 %v866_v55, %v865_v50 }
  0xfb   : > { %v867_v61 = vadd.f32 %v851_v58, %v834_v59  ;;  %4406 = vmatprep.mubr.bf16.mxu1 %v891_v60  ;;  %v818_v62 = vpop.trf.xlu1 }
  0xfc   : > { %v770_v63 = vpop.trf.xlu0  ;;  %v852_v0 = vmul.f32 %v5194_v40, %v818_v62  ;;  %v4157_v40 = vld [vmem:[%s6334_s17] ss:$0 sm:$0xff] }
  0xfd   : > { %883 = vst [vmem:[#allocation2 + $0x78] sm:$0xff] %v867_v61  ;;  %v835_v1 = vmul.f32 %v5196_v41, %v770_v63 }
  0xff   : > { %v868_v2 = vadd.f32 %v852_v0, %v835_v1 }
 0x101   : > { %884 = vst [vmem:[#allocation2 + $0x28] sm:$0xff] %v868_v2  ;;  %v892_v3 = vpack.c.bf16 %v868_v2, %v867_v61 }
 0x103   : > { %4407 = vmatmul.mubr.bf16.gmra.mxu1 %v892_v3 }
 0x193   : > { %v4396_v41 = vpop.f32.mrf.mxu0 }
 0x194   : > { %v1007_v5 = vadd.f32 %v4396_v41, %v4157_v40 }
 0x195   : > { %v998_v6 = vpop.f32.mrf.mxu0 }
 0x196   : > { %v1063_v7 = vmax.f32 %v1007_v5, 0.0  ;;  %v999_v8 = vadd.f32 %v4157_v40, %v998_v6 }
 0x197   : > { %v4397_v9 = vpop.f32.mrf.mxu0 }
 0x198   : > { %1079 = vst [vmem:[#allocation3 + $0x10] sm:$0xff] %v1063_v7  ;;  %v1061_v10 = vmax.f32 %v999_v8, 0.0  ;;  %v1010_v11 = vadd.f32 %v4397_v9, %v4157_v40 }
 0x199   : > { %v1001_v12 = vpop.f32.mrf.mxu0 }
 0x19a   : > { %1077 = vst [vmem:[#allocation3 + $0x28] sm:$0xff] %v1061_v10  ;;  %v1064_v13 = vmax.f32 %v1010_v11, 0.0  ;;  %v1002_v14 = vadd.f32 %v4157_v40, %v1001_v12 }
 0x19c   : > { %1080 = vst [vmem:[#allocation3 + $0x40] sm:$0xff] %v1064_v13  ;;  %v1062_v15 = vmax.f32 %v1002_v14, 0.0 }
 0x19e   : > { %1078 = vst [vmem:[#allocation3 + $0x68] sm:$0xff] %v1062_v15 }
 0x1a3   : > { %v4400_v16 = vpop.f32.mrf.mxu0 }
 0x1a4   : > { %v1023_v17 = vadd.f32 %v4400_v16, %v4157_v40 }
 0x1a5   : > { %v1014_v18 = vpop.f32.mrf.mxu0 }
 0x1a6   : > { %v1067_v19 = vmax.f32 %v1023_v17, 0.0  ;;  %v1015_v20 = vadd.f32 %v4157_v40, %v1014_v18 }
 0x1a7   : > { %v4401_v21 = vpop.f32.mrf.mxu0 }
 0x1a8   : > { %1083 = vst [vmem:[#allocation3 + $0x70] sm:$0xff] %v1067_v19  ;;  %v1065_v22 = vmax.f32 %v1015_v20, 0.0  ;;  %v1026_v23 = vadd.f32 %v4401_v21, %v4157_v40 }
 0x1a9   : > { %v1017_v24 = vpop.f32.mrf.mxu0 }
 0x1aa   : > { %1081 = vst [vmem:[#allocation3 + $0x48] sm:$0xff] %v1065_v22  ;;  %v1068_v25 = vmax.f32 %v1026_v23, 0.0  ;;  %v1018_v26 = vadd.f32 %v4157_v40, %v1017_v24 }
 0x1ac   : > { %1084 = vst [vmem:[#allocation3 + $0x38] sm:$0xff] %v1068_v25  ;;  %v1066_v27 = vmax.f32 %v1018_v26, 0.0 }
 0x1ae   : > { %1082 = vst [vmem:[#allocation3 + $0x30] sm:$0xff] %v1066_v27 }
 0x1b3   : > { %v4404_v28 = vpop.f32.mrf.mxu1 }
 0x1b4   : > { %v1039_v29 = vadd.f32 %v4404_v28, %v4157_v40 }
 0x1b5   : > { %v1030_v30 = vpop.f32.mrf.mxu1 }
 0x1b6   : > { %v1071_v31 = vmax.f32 %v1039_v29, 0.0  ;;  %v1031_v32 = vadd.f32 %v4157_v40, %v1030_v30 }
 0x1b7   : > { %v4405_v33 = vpop.f32.mrf.mxu1 }
 0x1b8   : > { %1087 = vst [vmem:[#allocation3 + $0x18] sm:$0xff] %v1071_v31  ;;  %v1069_v34 = vmax.f32 %v1031_v32, 0.0  ;;  %v1042_v35 = vadd.f32 %v4405_v33, %v4157_v40 }
 0x1b9   : > { %v1033_v36 = vpop.f32.mrf.mxu1 }
 0x1ba   : > { %1085 = vst [vmem:[#allocation3 + $0x20] sm:$0xff] %v1069_v34  ;;  %v1072_v37 = vmax.f32 %v1042_v35, 0.0  ;;  %v1034_v38 = vadd.f32 %v4157_v40, %v1033_v36 }
 0x1bc   : > { %1088 = vst [vmem:[#allocation3 + $0x58] sm:$0xff] %v1072_v37  ;;  %v1070_v39 = vmax.f32 %v1034_v38, 0.0 }
 0x1be   : > { %1086 = vst [vmem:[#allocation3 + $0x78] sm:$0xff] %v1070_v39 }
 0x1c3   : > { %v4408_v42 = vpop.f32.mrf.mxu1 }
 0x1c4   : > { %v1055_v43 = vadd.f32 %v4408_v42, %v4157_v40 }
 0x1c5   : > { %v1046_v44 = vpop.f32.mrf.mxu1 }
 0x1c6   : > { %v1075_v45 = vmax.f32 %v1055_v43, 0.0  ;;  %v1047_v46 = vadd.f32 %v4157_v40, %v1046_v44 }
 0x1c7   : > { %v4409_v47 = vpop.f32.mrf.mxu1 }
 0x1c8   : > { %1091 = vst [vmem:[#allocation3 + $0x60] sm:$0xff] %v1075_v45  ;;  %v1073_v48 = vmax.f32 %v1047_v46, 0.0  ;;  %v1058_v49 = vadd.f32 %v4409_v47, %v4157_v40 }
 0x1c9   : > { %v1049_v50 = vpop.f32.mrf.mxu1 }
 0x1ca   : > { %1089 = vst [vmem:[#allocation3] sm:$0xff] %v1073_v48  ;;  %v1076_v51 = vmax.f32 %v1058_v49, 0.0  ;;  %v1050_v52 = vadd.f32 %v4157_v40, %v1049_v50 }
 0x1cc   : > { %1092 = vst [vmem:[#allocation3 + $0x50] sm:$0xff] %v1076_v51  ;;  %v1074_v53 = vmax.f32 %v1050_v52, 0.0 }
 0x1ce   : > { %1090 = vst [vmem:[#allocation3 + $0x8] sm:$0xff] %v1074_v53 }
 0x1cf PF: > { %v4585_v54 = vld [vmem:[%s5112_s24 + $0x74] ss:$8 sps:$4 sm:$0xff]   ;;  %v4589_v56 = vld [vmem:[%s5112_s24 + $0x70] ss:$8 sps:$4 sm:$0xff]   ;;  %v4591_v58 = vld [vmem:[%s5112_s24 + $0x64] ss:$8 sps:$4 sm:$0xff]   ;;  %v1125_v24 = vlaneseq }
 0x1d0   : > { %v4587_v55 = vld [vmem:[%s5112_s24 + $0x174] ss:$8 sps:$4 sm:$0xff]   ;;  %2352 = vmatprep.subr.bf16.mxu0 %v4585_v54  ;;  %v4590_v57 = vld [vmem:[%s5112_s24 + $0x170] ss:$8 sps:$4 sm:$0xff]   ;;  %v4593_v59 = vld [vmem:[%s5112_s24 + $0x164] ss:$8 sps:$4 sm:$0xff]  }
 0x1d1   : > { %2465 = vmatprep.subr.bf16.mxu1 %v4587_v55  ;;  %2353 = vmatpush1.bf16.msra.mxu0 %v4589_v56  ;;  %v4595_v60 = vld [vmem:[%s5112_s24 + $0x60] ss:$8 sps:$4 sm:$0xff]   ;;  %v4597_v62 = vld [vmem:[%s5112_s24 + $0x54] ss:$8 sps:$4 sm:$0xff]   ;;  %v4601_v0 = vld [vmem:[%s5112_s24 + $0x50] ss:$8 sps:$4 sm:$0xff]  }
 0x1d2   : > { %2466 = vmatpush1.bf16.msra.mxu1 %v4590_v57  ;;  %2354 = vmatprep.subr.bf16.mxu0 %v4591_v58  ;;  %v4596_v61 = vld [vmem:[%s5112_s24 + $0x160] ss:$8 sps:$4 sm:$0xff]   ;;  %v4599_v63 = vld [vmem:[%s5112_s24 + $0x154] ss:$8 sps:$4 sm:$0xff]   ;;  %v4602_v1 = vld [vmem:[%s5112_s24 + $0x150] ss:$8 sps:$4 sm:$0xff]  }
 0x1d3   : > { %2467 = vmatprep.subr.bf16.mxu1 %v4593_v59  ;;  %v4603_v2 = vld [vmem:[%s5112_s24 + $0x44] ss:$8 sps:$4 sm:$0xff]   ;;  %v4607_v4 = vld [vmem:[%s5112_s24 + $0x40] ss:$8 sps:$4 sm:$0xff]   ;;  %v4609_v41 = vld [vmem:[%s5112_s24 + $0x34] ss:$8 sps:$4 sm:$0xff]  }
 0x1d4   : > { %v4605_v3 = vld [vmem:[%s5112_s24 + $0x144] ss:$8 sps:$4 sm:$0xff]   ;;  %v4608_v40 = vld [vmem:[%s5112_s24 + $0x140] ss:$8 sps:$4 sm:$0xff]   ;;  %s1143_s27 = ssub.s32 0, %s4916_s21  ;;  %p1142_p5 = scmp.lt.s32.totalorder %s4916_s21, 0 }
 0x1d5   : > { %2355 = vmatpush1.bf16.msra.mxu0 %v4595_v60  ;;  %v4611_v5 = vld [vmem:[%s5112_s24 + $0x134] ss:$8 sps:$4 sm:$0xff]   ;;  %v4613_v6 = vld [vmem:[%s5112_s24 + $0x30] ss:$8 sps:$4 sm:$0xff]   ;;  %s4166_s2 = smin.u32 %s4916_s21, %s1143_s27  ;;  %v4615_v8 = vld [vmem:[%s5112_s24 + $0x24] ss:$8 sps:$4 sm:$0xff]  }
 0x1d6   : > { %2468 = vmatpush1.bf16.msra.mxu1 %v4596_v61  ;;  %2356 = vmatprep.subr.bf16.mxu0 %v4597_v62  ;;  %v4614_v7 = vld [vmem:[%s5112_s24 + $0x130] ss:$8 sps:$4 sm:$0xff]   ;;  %v4617_v9 = vld [vmem:[%s5112_s24 + $0x124] ss:$8 sps:$4 sm:$0xff]   ;;  %s1145_s3 = sand.u32 1, %s4166_s2   ;;  %v5275_v28 = vshrl.u32 %v1125_v24, 7 }
 0x1d7   : > { %2469 = vmatprep.subr.bf16.mxu1 %v4599_v63  ;;  %v4619_v10 = vld [vmem:[%s5112_s24 + $0x20] ss:$8 sps:$4 sm:$0xff]   ;;  %v4621_v12 = vld [vmem:[%s5112_s24 + $0x14] ss:$8 sps:$4 sm:$0xff]   ;;  %s1146_s4 = ssub.s32 0, %s1145_s3  ;;  %p4297_p9 = scmp.ne.s32.totalorder %s4916_s21, 3 }
 0x1d8   : > { %v4620_v11 = vld [vmem:[%s5112_s24 + $0x120] ss:$8 sps:$4 sm:$0xff]   ;;  %v4623_v13 = vld [vmem:[%s5112_s24 + $0x114] ss:$8 sps:$4 sm:$0xff]   ;;  %v4625_v14 = vld [vmem:[%s5112_s24 + $0x10] ss:$8 sps:$4 sm:$0xff]   ;;  %s6354_s4 = smov (!%p1142_p5, %s1146_s4), %s1145_s3 }
 0x1d9   : > { %2357 = vmatpush1.bf16.msra.mxu0 %v4601_v0  ;;  %v4626_v15 = vld [vmem:[%s5112_s24 + $0x110] ss:$8 sps:$4 sm:$0xff]   ;;  %v4627_v16 = vld [vmem:[%s5112_s24 + $0x4] ss:$8 sps:$4 sm:$0xff]   ;;  %v4631_v18 = vld [vmem:[%s5112_s24] ss:$8 sps:$4 sm:$0xff]  }
 0x1da   : > { %2470 = vmatpush1.bf16.msra.mxu1 %v4602_v1  ;;  %2358 = vmatprep.subr.bf16.mxu0 %v4603_v2  ;;  %v4629_v17 = vld [vmem:[%s5112_s24 + $0x104] ss:$8 sps:$4 sm:$0xff]   ;;  %v4632_v19 = vld [vmem:[%s5112_s24 + $0x100] ss:$8 sps:$4 sm:$0xff]   ;;  %v4633_v20 = vld [vmem:[%s5112_s24 + $0xf4] ss:$8 sps:$4 sm:$0xff]  }
 0x1db   : > { %2471 = vmatprep.subr.bf16.mxu1 %v4605_v3  ;;  %p4168_p6 = scmp.lt.s32.totalorder %s6354_s4, 0  ;;  %v4635_v21 = vld [vmem:[%s5112_s24 + $0x1f4] ss:$8 sps:$4 sm:$0xff]   ;;  %s1152_s11 = sadd.s32 2, %s6354_s4  ;;  %v4637_v22 = vld [vmem:[%s5112_s24 + $0xf0] ss:$8 sps:$4 sm:$0xff]  }
 0x1dc   : > { %v4638_v23 = vld [vmem:[%s5112_s24 + $0x1f0] ss:$8 sps:$4 sm:$0xff]   ;;  %v4639_v25 = vld [vmem:[%s5112_s24 + $0xe4] ss:$8 sps:$4 sm:$0xff]   ;;  %v4643_v27 = vld [vmem:[%s5112_s24 + $0xe0] ss:$8 sps:$4 sm:$0xff]  }
 0x1dd   : > { %2359 = vmatpush1.bf16.msra.mxu0 %v4607_v4  ;;  %s6356_s11 = smov (!%p4168_p6, %s1152_s11), %s6354_s4  ;;  %v4641_v26 = vld [vmem:[%s5112_s24 + $0x1e4] ss:$8 sps:$4 sm:$0xff]   ;;  %v4644_v29 = vld [vmem:[%s5112_s24 + $0x1e0] ss:$8 sps:$4 sm:$0xff]   ;;  %v4645_v30 = vld [vmem:[%s5112_s24 + $0xd4] ss:$8 sps:$4 sm:$0xff]  }
 0x1de   : > { %2472 = vmatpush1.bf16.msra.mxu1 %v4608_v40  ;;  %2360 = vmatprep.subr.bf16.mxu0 %v4609_v41  ;;  %p1154_p7 = scmp.eq.s32.totalorder %s6356_s11, 0  ;;  %v4647_v31 = vld [vmem:[%s5112_s24 + $0x1d4] ss:$8 sps:$4 sm:$0xff]   ;;  %p1351_p8 = scmp.eq.s32.totalorder %s6356_s11, 1  ;;  %v4649_v32 = vld [vmem:[%s5112_s24 + $0xd0] ss:$8 sps:$4 sm:$0xff]  }
 0x1df   : > { %2473 = vmatprep.subr.bf16.mxu1 %v4611_v5  ;;  %v4650_v33 = vld [vmem:[%s5112_s24 + $0x1d0] ss:$8 sps:$4 sm:$0xff]   ;;  %vm1156_vm0 = vcmp.ge.s32.totalorder %v5275_v28, 1  ;;  %v4651_v34 = vld [vmem:[%s5112_s24 + $0xc4] ss:$8 sps:$4 sm:$0xff]   ;;  %vm1188_vm1 = vcmp.lt.s32.totalorder %v5275_v28, 1 }
 0x1e0   : > { %s5284_s25 = scalar_select %p1154_p7, 1.0, 0.0  ;;  %v4653_v35 = vld [vmem:[%s5112_s24 + $0x1c4] ss:$8 sps:$4 sm:$0xff]   ;;  %v4655_v36 = vld [vmem:[%s5112_s24 + $0xc0] ss:$8 sps:$4 sm:$0xff]  }
 0x1e1   : > { %2361 = vmatpush1.bf16.msra.mxu0 %v4613_v6  ;;  %s5287_s18 = scalar_select %p1351_p8, 1.0, 0.0  ;;  %v4656_v37 = vld [vmem:[%s5112_s24 + $0x1c0] ss:$8 sps:$4 sm:$0xff]   ;;  %v4657_v39 = vld [vmem:[%s5112_s24 + $0xb4] ss:$8 sps:$4 sm:$0xff]  }
 0x1e2   : > { %2474 = vmatpush1.bf16.msra.mxu1 %v4614_v7  ;;  %2362 = vmatprep.subr.bf16.mxu0 %v4615_v8  ;;  %v5291_v38 = vld [vmem:[#allocation3 + $0x28] sm:$0xff]  ;;  %v1548_v43 = vld [vmem:[%s5101_s13] sm:$0xff]  ;;  %vm1385_vm2 = vcmp.lt.s32.totalorder %v5275_v28, 2  ;;  %v4659_v47 = vld [vmem:[%s5112_s24 + $0x1b4] ss:$8 sps:$4 sm:$0xff]   ;;  %vm1353_vm3 = vcmp.ge.s32.totalorder %v5275_v28, 2  ;;  %v5324_v60 = vstv %s5284_s25 }
 0x1e3   : > { %2475 = vmatprep.subr.bf16.mxu1 %v4617_v9  ;;  %v5295_v42 = vld [vmem:[#allocation3 + $0x68] sm:$0xff]  ;;  %v1552_v44 = vld [vmem:[%s5101_s13 + $0x20] sm:$0xff]  ;;  %v1172_v45 = vrot.slane %v5291_v38, 7  ;;  %v1369_v46 = vrot.slane %v5291_v38, 6  ;;  %v5305_v50 = vld [vmem:[#allocation3 + $0x50] sm:$0xff]  ;;  %v1237_v56 = vrot.slane %v5291_v38, 1  ;;  %v5331_v62 = vstv %s5287_s18 }
 0x1e4   : > { %v1613_v48 = vpack.c.bf16 %v5295_v42, %v5291_v38  ;;  %v1615_v49 = vpack.c.bf16 %v1552_v44, %v1548_v43  ;;  %v1173_v51 = vrot.slane %v5295_v42, 7  ;;  %v1370_v52 = vrot.slane %v5295_v42, 6  ;;  %v5312_v55 = vld [vmem:[#allocation3 + $0x10] sm:$0xff]  ;;  %v4663_v0 = vld [vmem:[%s5112_s24 + $0xa4] ss:$8 sps:$4 sm:$0xff]   ;;  %s6337_s27 = sld [smem:[#allocation23_spill]] (!%p4297_p9) }
 0x1e5   : > { %2363 = vmatpush1.bf16.msra.mxu0 %v4619_v10  ;;  %v1187_v53 = vrot.slane %v5305_v50, 7  ;;  %v1384_v54 = vrot.slane %v5305_v50, 6  ;;  %v1238_v57 = vrot.slane %v5295_v42, 1  ;;  %vm1253_vm4 = vcmp.lt.s32.totalorder %v5275_v28, 7  ;;  %v4661_v58 = vld [vmem:[%s5112_s24 + $0xb0] ss:$8 sps:$4 sm:$0xff]  }
 0x1e6   : > { %2476 = vmatpush1.bf16.msra.mxu1 %v4620_v11  ;;  %2364 = vmatprep.subr.bf16.mxu0 %v4621_v12  ;;  %vm1450_vm5 = vcmp.lt.s32.totalorder %v5275_v28, 6  ;;  %v4662_v63 = vld [vmem:[%s5112_s24 + $0x1b0] ss:$8 sps:$4 sm:$0xff]   ;;  %v1203_v1 = vsel %vm1188_vm1, %v1172_v45, %v1173_v51  ;;  %v1400_v3 = vsel %vm1385_vm2, %v1369_v46, %v1370_v52  ;;  %v1239_v4 = vrot.slane %v5312_v55, 1  ;;  %v4665_v40 = vld [vmem:[%s5112_s24 + $0x1a4] ss:$8 sps:$4 sm:$0xff]  }
 0x1e7   : > { %2477 = vmatprep.subr.bf16.mxu1 %v4623_v13  ;;  %2384 = vmatprep.mubr.bf16.mxu0 %v1613_v48  ;;  %v1204_v59 = vsel %vm1188_vm1, %v1187_v53, %v1172_v45  ;;  %v1401_v61 = vsel %vm1385_vm2, %v1384_v54, %v1369_v46  ;;  %v1434_v5 = vrot.slane %v5291_v38, 2  ;;  %v1268_v7 = vsel %vm1253_vm4, %v1237_v56, %v1238_v57  ;;  %v5358_v10 = vld [vmem:[#allocation3 + $0x40] sm:$0xff]  ;;  %s6338_s0 = sld [smem:[#allocation14_spill]] (!%p4297_p9) }
 0x1e8   : > { %2497 = vmatprep.mubr.bf16.mxu1 %v1615_v49  ;;  %v1205_v2 = vsel %vm1156_vm0, %v1204_v59, 0.0  ;;  %v1402_v41 = vsel %vm1353_vm3, %v1401_v61, 0.0  ;;  %v1267_v6 = vsel %vm1253_vm4, %v1238_v57, %v1239_v4  ;;  %v1435_v8 = vrot.slane %v5295_v42, 2  ;;  %v4667_v11 = vld [vmem:[%s5112_s24 + $0xa0] ss:$8 sps:$4 sm:$0xff]   ;;  %v5417_v59 = vld [vmem:[#allocation3 + $0x30] sm:$0xff] }
 0x1e9   : > { %2365 = vmatpush1.bf16.msra.mxu0 %v4625_v14  ;;  %v1436_v9 = vrot.slane %v5312_v55, 2  ;;  %v1287_v12 = vmul.f32 %v5324_v60, %v1205_v2  ;;  %v1288_v13 = vmul.f32 %v5324_v60, %v1203_v1  ;;  %v1485_v14 = vmul.f32 %v5331_v62, %v1400_v3  ;;  %v4675_v44 = vld [vmem:[%s5112_s24 + $0x84] ss:$8 sps:$4 sm:$0xff]   ;;  %v4679_v3 = vld [vmem:[%s5112_s24 + $0x80] ss:$8 sps:$4 sm:$0xff]   ;;  %s6339_s11 = sld [smem:[#allocation22_spill]] (!%p4297_p9) }
 0x1ea   : > { %2478 = vmatpush1.bf16.msra.mxu1 %v4626_v15  ;;  %2366 = vmatprep.subr.bf16.mxu0 %v4627_v16  ;;  %v4668_v15 = vld [vmem:[%s5112_s24 + $0x1a0] ss:$8 sps:$4 sm:$0xff]   ;;  %v4669_v16 = vld [vmem:[%s5112_s24 + $0x94] ss:$8 sps:$4 sm:$0xff]   ;;  %v4677_v45 = vld [vmem:[%s5112_s24 + $0x184] ss:$8 sps:$4 sm:$0xff]   ;;  %v1620_v48 = vpack.c.bf16 %v5358_v10, %v5312_v55 }
 0x1eb   : > { %2479 = vmatprep.subr.bf16.mxu1 %v4629_v17  ;;  %v1484_v17 = vmul.f32 %v5331_v62, %v1402_v41  ;;  %v5407_v49 = vld [vmem:[%s5101_s13 + $0x40] sm:$0xff]  ;;  %v1437_v42 = vrot.slane %v5358_v10, 2  ;;  %s6340_s25 = sld [smem:[#allocation8_spill]] (!%p4297_p9) }
 0x1ec   : > { %v5420_v61 = vld [vmem:[%s5101_s13 + $0x60] sm:$0xff]  ;;  %s6341_s23 = sld [smem:[#allocation24_spill]] (!%p4297_p9) }
 0x1ed   : > { %2367 = vmatpush1.bf16.msra.mxu0 %v4631_v18  ;;  %v1464_v18 = vsel %vm1450_vm5, %v1435_v8, %v1436_v9  ;;  %v1500_v46 = vadd.f32 %v1484_v17, %v1287_v12  ;;  %v1374_v17 = vrot.slane %v5417_v59, 6 }
 0x1ee   : > { %2480 = vmatpush1.bf16.msra.mxu1 %v4632_v19  ;;  %2368 = vmatprep.subr.bf16.mxu0 %v4633_v20  ;;  %v1465_v19 = vsel %vm1450_vm5, %v1434_v5, %v1435_v8  ;;  %v1174_v20 = vrot.slane %v5312_v55, 7  ;;  %v4683_v8 = vld [vmem:[%s5112_s24 + $0x274] ss:$8 sps:$4 sm:$0xff]  }
 0x1ef   : > { %2481 = vmatprep.subr.bf16.mxu1 %v4635_v21  ;;  %v4671_v21 = vld [vmem:[%s5112_s24 + $0x194] ss:$8 sps:$4 sm:$0xff]   ;;  %v1516_v24 = vmul.f32 %v5331_v62, %v1465_v19 }
 0x1f1   : > { %2369 = vmatpush2.bf16.msra.mxu0 %v4637_v22  ;;  %v1319_v22 = vmul.f32 %v5324_v60, %v1268_v7  ;;  %s3230_s18 = sshra.s32 (!%p4297_p9), %s6340_s25, 7  ;;  %s3235_s20 = sand.u32 (!%p4297_p9), 127, %s6340_s25 }
 0x1f2   : > { %2482 = vmatpush2.bf16.msra.mxu1 %v4638_v23  ;;  %2370 = vmatprep.subr.bf16.mxu0 %v4639_v25  ;;  %v1320_v23 = vmul.f32 %v5324_v60, %v1267_v6  ;;  %v1175_v25 = vrot.slane %v5358_v10, 7  ;;  %v1463_v6 = vsel %vm1450_vm5, %v1436_v9, %v1437_v42 }
 0x1f3   : > { %2483 = vmatprep.subr.bf16.mxu1 %v4641_v26  ;;  %v5379_v26 = vld [vmem:[#allocation3 + $0x48] sm:$0xff]  ;;  %v1518_v12 = vmul.f32 %v5331_v62, %v1463_v6 }
 0x1f4   : > { %v1241_v43 = vrot.slane %v5379_v26, 1  ;;  %v1176_v7 = vrot.slane %v5379_v26, 7  ;;  %v1373_v9 = vrot.slane %v5379_v26, 6 }
 0x1f5   : > { %2371 = vmatpush2.bf16.msra.mxu0 %v4643_v27  ;;  %v1517_v27 = vmul.f32 %v5331_v62, %v1464_v18  ;;  %v1242_v18 = vrot.slane %v5417_v59, 1 }
 0x1f6   : > { %2484 = vmatpush2.bf16.msra.mxu1 %v4644_v29  ;;  %2372 = vmatprep.subr.bf16.mxu0 %v4645_v30  ;;  %v1371_v29 = vrot.slane %v5312_v55, 6  ;;  %v1372_v30 = vrot.slane %v5358_v10, 6 }
 0x1f7   : > { %2485 = vmatprep.subr.bf16.mxu1 %v4647_v31  ;;  %v1240_v31 = vrot.slane %v5358_v10, 1 }
 0x1f9   : > { %2373 = vmatpush2.bf16.msra.mxu0 %v4649_v32  ;;  %v5385_v32 = vadd.f32 %v1485_v14, %v1288_v13  ;;  %v1266_v57 = vsel %vm1253_vm4, %v1239_v4, %v1240_v31  ;;  %v1177_v14 = vrot.slane %v5417_v59, 7 }
 0x1fa   : > { %2486 = vmatpush2.bf16.msra.mxu1 %v4650_v33  ;;  %2374 = vmatprep.subr.bf16.mxu0 %v4651_v34  ;;  %v1202_v33 = vsel %vm1188_vm1, %v1173_v51, %v1174_v20  ;;  %v4673_v34 = vld [vmem:[%s5112_s24 + $0x90] ss:$8 sps:$4 sm:$0xff]   ;;  %v1533_v51 = vadd.f32 %v1517_v27, %v1320_v23  ;;  %v1321_v4 = vmul.f32 %v5324_v60, %v1266_v57 }
 0x1fb   : > { %2487 = vmatprep.subr.bf16.mxu1 %v4653_v35  ;;  %v4674_v35 = vld [vmem:[%s5112_s24 + $0x190] ss:$8 sps:$4 sm:$0xff]   ;;  %v1612_v19 = vpack.c.bf16 %v5385_v32, %v1500_v46  ;;  %v1396_v27 = vsel %vm1385_vm2, %v1373_v9, %v1374_v17  ;;  %v5481_v46 = vld [vmem:[%s5101_s13 + $0xa0] sm:$0xff] }
 0x1fc   : > { %v4681_v23 = vld [vmem:[%s5112_s24 + $0x270] ss:$8 sps:$4 sm:$0xff]  }
 0x1fd   : > { %2375 = vmatpush2.bf16.msra.mxu0 %v4655_v36  ;;  %v1201_v36 = vsel %vm1188_vm1, %v1174_v20, %v1175_v25 }
 0x1fe   : > { %2488 = vmatpush2.bf16.msra.mxu1 %v4656_v37  ;;  %2376 = vmatprep.subr.bf16.mxu0 %v4657_v39  ;;  %v1398_v37 = vsel %vm1385_vm2, %v1371_v29, %v1372_v30  ;;  %v1399_v39 = vsel %vm1385_vm2, %v1370_v52, %v1371_v29  ;;  %v1265_v52 = vsel %vm1253_vm4, %v1240_v31, %v1241_v43 }
 0x1ff   : > { %2489 = vmatprep.subr.bf16.mxu1 %v4659_v47  ;;  %v1532_v47 = vadd.f32 %v1516_v24, %v1319_v22  ;;  %v1486_v1 = vmul.f32 %v5331_v62, %v1399_v39  ;;  %v1487_v2 = vmul.f32 %v5331_v62, %v1398_v37  ;;  %v1200_v22 = vsel %vm1188_vm1, %v1175_v25, %v1176_v7  ;;  %v4686_v25 = vld [vmem:[%s5112_s24 + $0x264] ss:$8 sps:$4 sm:$0xff]  }
 0x200   : > { %v1199_v24 = vsel %vm1188_vm1, %v1176_v7, %v1177_v14  ;;  %v1397_v29 = vsel %vm1385_vm2, %v1372_v30, %v1373_v9  ;;  %v5468_v37 = vld [vmem:[%s5101_s13 + $0x80] sm:$0xff]  ;;  %v1291_v39 = vmul.f32 %v5324_v60, %v1200_v22 }
 0x201   : > { %2377 = vmatpush2.bf16.msra.mxu0 %v4661_v58  ;;  %v1438_v58 = vrot.slane %v5379_v26, 2  ;;  %v1614_v20 = vpack.c.bf16 %v1533_v51, %v1532_v47  ;;  %v1292_v47 = vmul.f32 %v5324_v60, %v1199_v24  ;;  %v1629_v6 = vpack.c.bf16 %v5481_v46, %v5468_v37 }
 0x202   : > { %2490 = vmatpush2.bf16.msra.mxu1 %v4662_v63  ;;  %2378 = vmatprep.subr.bf16.mxu0 %v4663_v0  ;;  %v1289_v63 = vmul.f32 %v5324_v60, %v1202_v33  ;;  %v1290_v0 = vmul.f32 %v5324_v60, %v1201_v36  ;;  %v1534_v33 = vadd.f32 %v1518_v12, %v1321_v4  ;;  %v5465_v36 = vld [vmem:[#allocation3 + $0x38] sm:$0xff]  ;;  %v5503_v4 = vld [vmem:[#allocation3 + $0x20] sm:$0xff] }
 0x203   : > { %2491 = vmatprep.subr.bf16.mxu1 %v4665_v40  ;;  %v4680_v40 = vld [vmem:[%s5112_s24 + $0x180] ss:$8 sps:$4 sm:$0xff]   ;;  %v1462_v41 = vsel %vm1450_vm5, %v1437_v42, %v1438_v58  ;;  %v1489_v42 = vmul.f32 %v5331_v62, %v1396_v27  ;;  %v1376_v7 = vrot.slane %v5465_v36, 6  ;;  %v1442_v24 = vrot.slane %v5503_v4, 2 }
 0x204   : > { %v1519_v13 = vmul.f32 %v5331_v62, %v1462_v41  ;;  %v1503_v32 = vadd.f32 %v1487_v2, %v1290_v0  ;;  %v4689_v0 = vld [vmem:[%s5112_s24 + $0x254] ss:$8 sps:$4 sm:$0xff]   ;;  %v1627_v41 = vpack.c.bf16 %v5417_v59, %v5379_v26  ;;  %v4687_v26 = vld [vmem:[%s5112_s24 + $0x250] ss:$8 sps:$4 sm:$0xff]   ;;  %v5549_v27 = vld [vmem:[%s5101_s13 + $0xe0] sm:$0xff] }
 0x205   : > { %2379 = vmatpush2.bf16.msra.mxu0 %v4667_v11  ;;  %v1322_v11 = vmul.f32 %v5324_v60, %v1265_v52  ;;  %v4684_v52 = vld [vmem:[%s5112_s24 + $0x260] ss:$8 sps:$4 sm:$0xff]   ;;  %v1505_v9 = vadd.f32 %v1489_v42, %v1292_v47  ;;  %v5571_v42 = vld [vmem:[#allocation3 + $0x18] sm:$0xff] }
 0x206   : > { %2492 = vmatpush2.bf16.msra.mxu1 %v4668_v15  ;;  %2380 = vmatprep.subr.bf16.mxu0 %v4669_v16  ;;  %v5441_v15 = vld [vmem:[#allocation3 + $0x70] sm:$0xff]  ;;  %v1622_v16 = vpack.c.bf16 %v5420_v61, %v5407_v49  ;;  %v1488_v49 = vmul.f32 %v5331_v62, %v1397_v29 }
 0x207   : > { %2493 = vmatprep.subr.bf16.mxu1 %v4671_v21  ;;  %v5449_v21 = vadd.f32 %v1486_v1, %v1289_v63  ;;  %v1243_v31 = vrot.slane %v5441_v15, 1  ;;  %v1178_v51 = vrot.slane %v5441_v15, 7  ;;  %v1179_v63 = vrot.slane %v5465_v36, 7 }
 0x209   : > { %2381 = vmatpush2.bf16.msra.mxu0 %v4673_v34  ;;  %v1535_v34 = vadd.f32 %v1519_v13, %v1322_v11  ;;  %v1263_v30 = vsel %vm1253_vm4, %v1242_v18, %v1243_v31  ;;  %v5514_v11 = vadd.f32 %v1488_v49, %v1291_v39  ;;  %v1197_v55 = vsel %vm1188_vm1, %v1178_v51, %v1179_v63 }
 0x20a   : > { %2494 = vmatpush2.bf16.msra.mxu1 %v4674_v35  ;;  %2382 = vmatprep.subr.bf16.mxu0 %v4675_v44  ;;  %v1439_v35 = vrot.slane %v5417_v59, 2  ;;  %v1264_v44 = vsel %vm1253_vm4, %v1241_v43, %v1242_v18  ;;  %v1324_v1 = vmul.f32 %v5324_v60, %v1263_v30  ;;  %v1198_v10 = vsel %vm1188_vm1, %v1177_v14, %v1178_v51  ;;  %v4692_v14 = vld [vmem:[%s5112_s24 + $0x244] ss:$8 sps:$4 sm:$0xff]   ;;  %v4695_v30 = vld [vmem:[%s5112_s24 + $0x234] ss:$8 sps:$4 sm:$0xff]  }
 0x20b   : > { %2495 = vmatprep.subr.bf16.mxu1 %v4677_v45  ;;  %v1440_v45 = vrot.slane %v5441_v15, 2  ;;  %v1323_v43 = vmul.f32 %v5324_v60, %v1264_v44  ;;  %v1244_v13 = vrot.slane %v5465_v36, 1  ;;  %v5536_v59 = vld [vmem:[%s5101_s13 + $0xc0] sm:$0xff]  ;;  %v1294_v29 = vmul.f32 %v5324_v60, %v1197_v55 }
 0x20c   : > { %v1461_v61 = vsel %vm1450_vm5, %v1438_v58, %v1439_v35  ;;  %v1619_v58 = vpack.c.bf16 %v1503_v32, %v5449_v21  ;;  %v5533_v21 = vld [vmem:[#allocation3 + $0x78] sm:$0xff]  ;;  %v1377_v49 = vrot.slane %v5503_v4, 6  ;;  %v1634_v51 = vpack.c.bf16 %v5465_v36, %v5441_v15 }
 0x20d   : > { %2383 = vmatpush2.bf16.msra.mxu0 %v4679_v3  ;;  %v1460_v57 = vsel %vm1450_vm5, %v1439_v35, %v1440_v45  ;;  %v1520_v2 = vmul.f32 %v5331_v62, %v1461_v61  ;;  %v1181_v39 = vrot.slane %v5533_v21, 7 }
 0x20e   : > { %2496 = vmatpush2.bf16.msra.mxu1 %v4680_v40  ;;  %2578 = vmatprep.subr.bf16.mxu0 %v4683_v8  ;;  %v1521_v3 = vmul.f32 %v5331_v62, %v1460_v57  ;;  %v1375_v40 = vrot.slane %v5441_v15, 6  ;;  %v4693_v15 = vld [vmem:[%s5112_s24 + $0x230] ss:$8 sps:$4 sm:$0xff]  }
 0x20f   : > { %4490 = vmatprep.subr.bf16.mxu1 %v4683_v8  ;;  %v1621_v8 = vpack.c.bf16 %v1535_v34, %v1534_v33  ;;  %v1536_v18 = vadd.f32 %v1520_v2, %v1323_v43  ;;  %v1180_v33 = vrot.slane %v5503_v4, 7  ;;  %v4690_v34 = vld [vmem:[%s5112_s24 + $0x240] ss:$8 sps:$4 sm:$0xff]   ;;  %v1378_v43 = vrot.slane %v5533_v21, 6 }
 0x210   : > { %2385 = vmatmul.mubr.bf16.vlgmr.msra.gmra.mxu0 %v1612_v19  ;;  %v1395_v12 = vsel %vm1385_vm2, %v1374_v17, %v1375_v40  ;;  %v1537_v19 = vadd.f32 %v1521_v3, %v1324_v1  ;;  %v1293_v17 = vmul.f32 %v5324_v60, %v1198_v10  ;;  %v1393_v3 = vsel %vm1385_vm2, %v1376_v7, %v1377_v49 }
 0x211   : > { %2498 = vmatmul.mubr.bf16.vlgmr.msra.gmra.mxu1 %v1614_v20  ;;  %2579 = vmatpush1.bf16.msra.mxu0 %v4681_v23  ;;  %v1441_v20 = vrot.slane %v5465_v36, 2  ;;  %v1196_v1 = vsel %vm1188_vm1, %v1179_v63, %v1180_v33  ;;  %v1392_v2 = vsel %vm1385_vm2, %v1377_v49, %v1378_v43  ;;  %v4698_v36 = vld [vmem:[%s5112_s24 + $0x224] ss:$8 sps:$4 sm:$0xff]  }
 0x212   : > { %4506 = vmatpush1.bf16.msra.mxu1 %v4681_v23  ;;  %2580 = vmatprep.subr.bf16.mxu0 %v4686_v25  ;;  %v1262_v23 = vsel %vm1253_vm4, %v1243_v31, %v1244_v13  ;;  %v1628_v57 = vpack.c.bf16 %v1537_v19, %v1536_v18  ;;  %v1295_v55 = vmul.f32 %v5324_v60, %v1196_v1  ;;  %v1182_v18 = vrot.slane %v5571_v42, 7  ;;  %v5619_v19 = vld [vmem:[%s5101_s13 + $0x120] sm:$0xff] }
 0x213   : > { %4491 = vmatprep.subr.bf16.mxu1 %v4686_v25  ;;  %2394 = vmatprep.mubr.bf16.mxu0 %v1620_v48  ;;  %v1394_v48 = vsel %vm1385_vm2, %v1375_v40, %v1376_v7  ;;  %v1490_v25 = vmul.f32 %v5331_v62, %v1395_v12  ;;  %v1325_v31 = vmul.f32 %v5324_v60, %v1262_v23  ;;  %v1246_v40 = vrot.slane %v5533_v21, 1  ;;  %v5612_v12 = vld [vmem:[%s5101_s13 + $0x100] sm:$0xff] }
 0x214   : > { %2507 = vmatprep.mubr.bf16.mxu1 %v1622_v16  ;;  %v1245_v16 = vrot.slane %v5503_v4, 1  ;;  %v1491_v32 = vmul.f32 %v5331_v62, %v1394_v48  ;;  %v1458_v35 = vsel %vm1450_vm5, %v1441_v20, %v1442_v24  ;;  %v1459_v37 = vsel %vm1450_vm5, %v1440_v45, %v1441_v20  ;;  %v4696_v48 = vld [vmem:[%s5112_s24 + $0x220] ss:$8 sps:$4 sm:$0xff]  }
 0x215   : > { %2581 = vmatpush1.bf16.msra.mxu0 %v4684_v52  ;;  %v1522_v46 = vmul.f32 %v5331_v62, %v1459_v37  ;;  %v1523_v47 = vmul.f32 %v5331_v62, %v1458_v35  ;;  %v1626_v45 = vpack.c.bf16 %v1505_v9, %v5514_v11  ;;  %v5579_v61 = vadd.f32 %v1490_v25, %v1293_v17  ;;  %v5598_v11 = vld [vmem:[#allocation3 + $0x58] sm:$0xff] }
 0x216   : > { %4507 = vmatpush1.bf16.msra.mxu1 %v4684_v52  ;;  %2582 = vmatprep.subr.bf16.mxu0 %v4689_v0  ;;  %v1261_v22 = vsel %vm1253_vm4, %v1244_v13, %v1245_v16  ;;  %v1636_v52 = vpack.c.bf16 %v5549_v27, %v5536_v59  ;;  %v1260_v10 = vsel %vm1253_vm4, %v1245_v16, %v1246_v40  ;;  %v1183_v17 = vrot.slane %v5598_v11, 7 }
 0x217   : > { %4492 = vmatprep.subr.bf16.mxu1 %v4689_v0  ;;  %v1326_v44 = vmul.f32 %v5324_v60, %v1261_v22  ;;  %v1195_v0 = vsel %vm1188_vm1, %v1180_v33, %v1181_v39  ;;  %v1538_v63 = vadd.f32 %v1522_v46, %v1325_v31  ;;  %v1493_v9 = vmul.f32 %v5331_v62, %v1392_v2  ;;  %v4701_v22 = vld [vmem:[%s5112_s24 + $0x214] ss:$8 sps:$4 sm:$0xff]   ;;  %v5677_v2 = vld [vmem:[%s5101_s13 + $0x160] sm:$0xff] }
 0x218   : > { %2395 = vmatmul.mubr.bf16.gmra.mxu0 %v1619_v58  ;;  %v1247_v58 = vrot.slane %v5571_v42, 1  ;;  %v1296_v13 = vmul.f32 %v5324_v60, %v1195_v0  ;;  %v1327_v16 = vmul.f32 %v5324_v60, %v1260_v10  ;;  %v1379_v25 = vrot.slane %v5571_v42, 6 }
 0x219   : > { %2508 = vmatmul.mubr.bf16.gmra.mxu1 %v1621_v8  ;;  %2583 = vmatpush1.bf16.msra.mxu0 %v4687_v26  ;;  %v1443_v8 = vrot.slane %v5533_v21, 2  ;;  %v1641_v33 = vpack.c.bf16 %v5533_v21, %v5503_v4  ;;  %v1643_v35 = vpack.c.bf16 %v5619_v19, %v5612_v12  ;;  %v1193_v4 = vsel %vm1188_vm1, %v1182_v18, %v1183_v17  ;;  %v4704_v21 = vld [vmem:[%s5112_s24 + $0x204] ss:$8 sps:$4 sm:$0xff]  }
 0x21a   : > { %4508 = vmatpush1.bf16.msra.mxu1 %v4687_v26  ;;  %2584 = vmatprep.subr.bf16.mxu0 %v4692_v14  ;;  %v1259_v7 = vsel %vm1253_vm4, %v1246_v40, %v1247_v58  ;;  %v1444_v26 = vrot.slane %v5571_v42, 2  ;;  %v1391_v46 = vsel %vm1385_vm2, %v1378_v43, %v1379_v25 }
 0x21b   : > { %4493 = vmatprep.subr.bf16.mxu1 %v4692_v14  ;;  %2404 = vmatprep.mubr.bf16.mxu0 %v1627_v41  ;;  %v1507_v41 = vadd.f32 %v1491_v32, %v1294_v29  ;;  %v1492_v14 = vmul.f32 %v5331_v62, %v1393_v3  ;;  %v1457_v59 = vsel %vm1450_vm5, %v1442_v24, %v1443_v8  ;;  %v5636_v32 = vld [vmem:[#allocation3] sm:$0xff] }
 0x21c   : > { %2517 = vmatprep.mubr.bf16.mxu1 %v1629_v6  ;;  %v1539_v6 = vadd.f32 %v1523_v47, %v1326_v44  ;;  %v1456_v20 = vsel %vm1450_vm5, %v1443_v8, %v1444_v26  ;;  %v1328_v23 = vmul.f32 %v5324_v60, %v1259_v7  ;;  %v1524_v27 = vmul.f32 %v5331_v62, %v1457_v59  ;;  %v4699_v44 = vld [vmem:[%s5112_s24 + $0x210] ss:$8 sps:$4 sm:$0xff]  }
 0x21d   : > { %2585 = vmatpush1.bf16.msra.mxu0 %v4690_v34  ;;  %v1525_v29 = vmul.f32 %v5331_v62, %v1456_v20  ;;  %v1633_v24 = vpack.c.bf16 %v1507_v41, %v5579_v61  ;;  %v5644_v37 = vadd.f32 %v1492_v14, %v1295_v55  ;;  %v1248_v47 = vrot.slane %v5598_v11, 1  ;;  %v5664_v61 = vld [vmem:[%s5101_s13 + $0x140] sm:$0xff]  ;;  %v4707_v55 = vld [vmem:[%s5112_s24 + $0x2f4] ss:$8 sps:$4 sm:$0xff]  }
 0x21e   : > { %4509 = vmatpush1.bf16.msra.mxu1 %v4690_v34  ;;  %2586 = vmatprep.subr.bf16.mxu0 %v4695_v30  ;;  %v1380_v34 = vrot.slane %v5598_v11, 6  ;;  %v1635_v31 = vpack.c.bf16 %v1539_v6, %v1538_v63  ;;  %v1249_v49 = vrot.slane %v5636_v32, 1  ;;  %v1298_v3 = vmul.f32 %v5324_v60, %v1193_v4  ;;  %v4702_v41 = vld [vmem:[%s5112_s24 + $0x200] ss:$8 sps:$4 sm:$0xff]  }
 0x21f   : > { %4494 = vmatprep.subr.bf16.mxu1 %v4695_v30  ;;  %v1194_v30 = vsel %vm1188_vm1, %v1181_v39, %v1182_v18  ;;  %v1509_v39 = vadd.f32 %v1493_v9, %v1296_v13  ;;  %v1258_v1 = vsel %vm1253_vm4, %v1247_v58, %v1248_v47  ;;  %v1494_v40 = vmul.f32 %v5331_v62, %v1391_v46  ;;  %v5697_v13 = vld [vmem:[#allocation3 + $0x60] sm:$0xff] }
 0x220   : > { %2405 = vmatmul.mubr.bf16.gmra.mxu0 %v1626_v45  ;;  %v1540_v45 = vadd.f32 %v1524_v27, %v1327_v16  ;;  %v1297_v43 = vmul.f32 %v5324_v60, %v1194_v30  ;;  %v1390_v0 = vsel %vm1385_vm2, %v1379_v25, %v1380_v34  ;;  %v1184_v6 = vrot.slane %v5636_v32, 7  ;;  %v4710_v25 = vld [vmem:[%s5112_s24 + $0x2e4] ss:$8 sps:$4 sm:$0xff]   ;;  %v4708_v46 = vld [vmem:[%s5112_s24 + $0x2e0] ss:$8 sps:$4 sm:$0xff]  }
 0x221   : > { %2518 = vmatmul.mubr.bf16.gmra.mxu1 %v1628_v57  ;;  %2587 = vmatpush1.bf16.msra.mxu0 %v4693_v15  ;;  %v5661_v57 = vld [vmem:[#allocation3 + $0x8] sm:$0xff]  ;;  %v1495_v7 = vmul.f32 %v5331_v62, %v1390_v0  ;;  %v1329_v10 = vmul.f32 %v5324_v60, %v1258_v1  ;;  %v1381_v12 = vrot.slane %v5636_v32, 6  ;;  %v1648_v14 = vpack.c.bf16 %v5598_v11, %v5571_v42 }
 0x222   : > { %4510 = vmatpush1.bf16.msra.mxu1 %v4693_v15  ;;  %2588 = vmatprep.subr.bf16.mxu0 %v4698_v36  ;;  %v1446_v15 = vrot.slane %v5636_v32, 2  ;;  %v1185_v8 = vrot.slane %v5661_v57, 7  ;;  %v1650_v9 = vpack.c.bf16 %v5677_v2, %v5664_v61  ;;  %v1382_v18 = vrot.slane %v5661_v57, 6  ;;  %v4711_v2 = vld [vmem:[%s5112_s24 + $0x2d0] ss:$8 sps:$4 sm:$0xff]  }
 0x223   : > { %4495 = vmatprep.subr.bf16.mxu1 %v4698_v36  ;;  %2414 = vmatprep.mubr.bf16.mxu0 %v1634_v51  ;;  %v1541_v51 = vadd.f32 %v1525_v29, %v1328_v23  ;;  %v1257_v36 = vsel %vm1253_vm4, %v1248_v47, %v1249_v49  ;;  %v5705_v16 = vadd.f32 %v1494_v40, %v1297_v43  ;;  %v1250_v27 = vrot.slane %v5661_v57, 1 }
 0x224   : > { %2527 = vmatprep.mubr.bf16.mxu1 %v1636_v52  ;;  %v1445_v52 = vrot.slane %v5598_v11, 2  ;;  %v1330_v20 = vmul.f32 %v5324_v60, %v1257_v36  ;;  %v1191_v42 = vsel %vm1188_vm1, %v1184_v6, %v1185_v8  ;;  %v1192_v23 = vsel %vm1188_vm1, %v1183_v17, %v1184_v6 }
 0x225   : > { %2589 = vmatpush1.bf16.msra.mxu0 %v4696_v48  ;;  %v1642_v19 = vpack.c.bf16 %v1541_v51, %v1540_v45  ;;  %v1251_v29 = vrot.slane %v5697_v13, 1  ;;  %v1388_v17 = vsel %vm1385_vm2, %v1381_v12, %v1382_v18  ;;  %v1256_v30 = vsel %vm1253_vm4, %v1249_v49, %v1250_v27  ;;  %v4713_v45 = vld [vmem:[%s5112_s24 + $0x2d4] ss:$8 sps:$4 sm:$0xff]   ;;  %v1596_v51 = vld [vmem:[%s5101_s13 + $0x180] sm:$0xff] }
 0x226   : > { %4511 = vmatpush1.bf16.msra.mxu1 %v4696_v48  ;;  %2590 = vmatprep.subr.bf16.mxu0 %v4701_v22  ;;  %v1454_v58 = vsel %vm1450_vm5, %v1445_v52, %v1446_v15  ;;  %v1455_v63 = vsel %vm1450_vm5, %v1444_v26, %v1445_v52  ;;  %v1640_v26 = vpack.c.bf16 %v1509_v39, %v5644_v37  ;;  %v1448_v11 = vrot.slane %v5697_v13, 2  ;;  %v1600_v52 = vld [vmem:[%s5101_s13 + $0x1a0] sm:$0xff] }
 0x227   : > { %4496 = vmatprep.subr.bf16.mxu1 %v4701_v22  ;;  %v1526_v48 = vmul.f32 %v5331_v62, %v1455_v63  ;;  %v1527_v59 = vmul.f32 %v5331_v62, %v1454_v58  ;;  %v4705_v22 = vld [vmem:[%s5112_s24 + $0x2f0] ss:$8 sps:$4 sm:$0xff]   ;;  %v1255_v37 = vsel %vm1253_vm4, %v1250_v27, %v1251_v29  ;;  %v1300_v4 = vmul.f32 %v5324_v60, %v1191_v42  ;;  %v4716_v63 = vld [vmem:[%s5112_s24 + $0x2c4] ss:$8 sps:$4 sm:$0xff]  }
 0x228   : > { %2415 = vmatmul.mubr.bf16.gmra.mxu0 %v1633_v24  ;;  %v1511_v24 = vadd.f32 %v1495_v7, %v1298_v3  ;;  %v1141_v39 = vadd.s32 120, %v5275_v28  ;;  %v1497_v61 = vmul.f32 %v5331_v62, %v1388_v17  ;;  %v1331_v43 = vmul.f32 %v5324_v60, %v1256_v30  ;;  %v1604_v27 = vld [vmem:[%s5101_s13 + $0x1c0] sm:$0xff] }
 0x229   : > { %2528 = vmatmul.mubr.bf16.gmra.mxu1 %v1635_v31  ;;  %2591 = vmatpush1.bf16.msra.mxu0 %v4699_v44  ;;  %v1389_v31 = vsel %vm1385_vm2, %v1380_v34, %v1381_v12  ;;  %v1543_v34 = vadd.f32 %v1527_v59, %v1330_v20  ;;  %v1332_v0 = vmul.f32 %v5324_v60, %v1255_v37  ;;  %v1186_v1 = vrot.slane %v5697_v13, 7  ;;  %v4722_v17 = vld [vmem:[%s5112_s24 + $0x2a4] ss:$8 sps:$4 sm:$0xff]  }
 0x22a   : > { %4512 = vmatpush1.bf16.msra.mxu1 %v4699_v44  ;;  %2592 = vmatprep.subr.bf16.mxu0 %v4704_v21  ;;  %v1299_v44 = vmul.f32 %v5324_v60, %v1192_v23  ;;  %v1496_v47 = vmul.f32 %v5331_v62, %v1389_v31  ;;  %v1252_v40 = vrot.slane %v5305_v50, 1  ;;  %v1449_v36 = vrot.slane %v5305_v50, 2 }
 0x22b   : > { %4497 = vmatprep.subr.bf16.mxu1 %v4704_v21  ;;  %2424 = vmatprep.mubr.bf16.mxu0 %v1641_v33  ;;  %v1542_v33 = vadd.f32 %v1526_v48, %v1329_v10  ;;  %v1383_v6 = vrot.slane %v5697_v13, 6  ;;  %v1657_v7 = vpack.c.bf16 %v1600_v52, %v1596_v51  ;;  %vm1236_vm6 = vcmp.lt.s32.totalorder %v1141_v39, 127 }
 0x22c   : > { %2537 = vmatprep.mubr.bf16.mxu1 %v1643_v35  ;;  %v1447_v35 = vrot.slane %v5661_v57, 2  ;;  %v1512_v10 = vadd.f32 %v1496_v47, %v1299_v44  ;;  %v1513_v48 = vadd.f32 %v1497_v61, %v1300_v4  ;;  %v1189_v12 = vsel %vm1188_vm1, %v1186_v1, %v1187_v53  ;;  %v4720_v44 = vld [vmem:[%s5112_s24 + $0x2a0] ss:$8 sps:$4 sm:$0xff]   ;;  %v4725_v4 = vld [vmem:[%s5112_s24 + $0x294] ss:$8 sps:$4 sm:$0xff]  }
 0x22d   : > { %2593 = vmatpush1.bf16.msra.mxu0 %v4702_v41  ;;  %v1649_v58 = vpack.c.bf16 %v1543_v34, %v1542_v33  ;;  %vm1433_vm7 = vcmp.lt.s32.totalorder %v1141_v39, 126  ;;  %v1386_v53 = vsel %vm1385_vm2, %v1383_v6, %v1384_v54  ;;  %v1254_v38 = vsel %vm1253_vm4, %v1251_v29, %v1252_v40  ;;  %v1608_v29 = vld [vmem:[%s5101_s13 + $0x1e0] sm:$0xff]  ;;  %v1554_v47 = vld [vmem:[%s5101_s13 + $0x30] sm:$0xff] }
 0x22e   : > { %4513 = vmatpush1.bf16.msra.mxu1 %v4702_v41  ;;  %2594 = vmatprep.subr.bf16.mxu0 %v4707_v55  ;;  %v1452_v49 = vsel %vm1450_vm5, %v1447_v35, %v1448_v11  ;;  %v1453_v21 = vsel %vm1450_vm5, %v1446_v15, %v1447_v35  ;;  %v1647_v41 = vpack.c.bf16 %v1511_v24, %v5705_v16  ;;  %v4717_v35 = vld [vmem:[%s5112_s24 + $0x2b0] ss:$8 sps:$4 sm:$0xff]   ;;  %v4726_v61 = vld [vmem:[%s5112_s24 + $0x280] ss:$8 sps:$4 sm:$0xff]  }
 0x22f   : > { %4498 = vmatprep.subr.bf16.mxu1 %v4707_v55  ;;  %v1528_v15 = vmul.f32 %v5331_v62, %v1453_v21  ;;  %v1529_v3 = vmul.f32 %v5331_v62, %v1452_v49  ;;  %v1655_v55 = vpack.c.bf16 %v5661_v57, %v5636_v32  ;;  %v1451_v54 = vsel %vm1450_vm5, %v1448_v11, %v1449_v36  ;;  %v1582_v49 = vld [vmem:[%s5101_s13 + $0x110] sm:$0xff] }
 0x230   : > { %2425 = vmatmul.mubr.bf16.gmra.mxu0 %v1640_v26  ;;  %v1190_v26 = vsel %vm1188_vm1, %v1185_v8, %v1186_v1  ;;  %v1387_v8 = vsel %vm1385_vm2, %v1382_v18, %v1383_v6  ;;  %v1654_v57 = vpack.c.bf16 %v1513_v48, %v1512_v10  ;;  %v4719_v18 = vld [vmem:[%s5112_s24 + $0x2b4] ss:$8 sps:$4 sm:$0xff]   ;;  %v1302_v59 = vmul.f32 %v5324_v60, %v1189_v12  ;;  %v4723_v39 = vld [vmem:[%s5112_s24 + $0x290] ss:$8 sps:$4 sm:$0xff]   ;;  %v1581_v1 = vld [vmem:[%s5101_s13 + $0x108] sm:$0xff] }
 0x231   : > { %2538 = vmatmul.mubr.bf16.gmra.mxu1 %v1642_v19  ;;  %2595 = vmatpush2.bf16.msra.mxu0 %v4705_v22  ;;  %v1545_v32 = vadd.f32 %v1529_v3, %v1332_v0  ;;  %v1466_v19 = vsel %vm1450_vm5, %v1449_v36, %v1434_v5  ;;  %v1301_v20 = vmul.f32 %v5324_v60, %v1190_v26  ;;  %v1586_v21 = vld [vmem:[%s5101_s13 + $0x130] sm:$0xff]  ;;  %v1553_v0 = vld [vmem:[%s5101_s13 + $0x28] sm:$0xff] }
 0x232   : > { %4514 = vmatpush2.bf16.msra.mxu1 %v4705_v22  ;;  %2596 = vmatprep.subr.bf16.mxu0 %v4710_v25  ;;  %v1482_v16 = vsel %vm1433_vm7, %v1466_v19, 0.0  ;;  %v1498_v42 = vmul.f32 %v5331_v62, %v1387_v8  ;;  %v1499_v23 = vmul.f32 %v5331_v62, %v1386_v53  ;;  %v1530_v33 = vmul.f32 %v5331_v62, %v1451_v54  ;;  %v1558_v3 = vld [vmem:[%s5101_s13 + $0x50] sm:$0xff]  ;;  %v4732_v48 = vld [vmem:[%s5112_s24 + $0x360] ss:$8 sps:$4 sm:$0xff]  }
 0x233   : > { %4499 = vmatprep.subr.bf16.mxu1 %v4710_v25  ;;  %2434 = vmatprep.mubr.bf16.mxu0 %v1648_v14  ;;  %v1544_v14 = vadd.f32 %v1528_v15, %v1331_v43  ;;  %v1333_v25 = vmul.f32 %v5324_v60, %v1254_v38  ;;  %v1531_v31 = vmul.f32 %v5331_v62, %v1482_v16  ;;  %v1549_v43 = vld [vmem:[%s5101_s13 + $0x8] sm:$0xff]  ;;  %v4731_v15 = vld [vmem:[%s5112_s24 + $0x374] ss:$8 sps:$4 sm:$0xff]   ;;  %v4729_v6 = vld [vmem:[%s5112_s24 + $0x370] ss:$8 sps:$4 sm:$0xff]  }
 0x234   : > { %2547 = vmatprep.mubr.bf16.mxu1 %v1650_v9  ;;  %v1269_v9 = vsel %vm1253_vm4, %v1252_v40, %v1237_v56  ;;  %v4714_v56 = vld [vmem:[%s5112_s24 + $0x2c0] ss:$8 sps:$4 sm:$0xff]   ;;  %v1662_v37 = vpack.c.bf16 %v5305_v50, %v5697_v13  ;;  %v1664_v30 = vpack.c.bf16 %v1608_v29, %v1604_v27  ;;  %v1514_v11 = vadd.f32 %v1498_v42, %v1301_v20  ;;  %v1550_v50 = vld [vmem:[%s5101_s13 + $0x10] sm:$0xff] }
 0x235   : > { %2597 = vmatpush2.bf16.msra.mxu0 %v4708_v46  ;;  %v1285_v5 = vsel %vm1236_vm6, %v1269_v9, 0.0  ;;  %v1656_v22 = vpack.c.bf16 %v1545_v32, %v1544_v14  ;;  %v1546_v62 = vadd.f32 %v1530_v33, %v1333_v25  ;;  %v1617_v51 = vpack.c.bf16 %v1554_v47, %v1550_v50  ;;  %v1562_v40 = vld [vmem:[%s5101_s13 + $0x70] sm:$0xff]  ;;  %v1557_v12 = vld [vmem:[%s5101_s13 + $0x48] sm:$0xff] }
 0x236   : > { %4515 = vmatpush2.bf16.msra.mxu1 %v4708_v46  ;;  %2598 = vmatprep.subr.bf16.mxu0 %v4713_v45  ;;  %v1334_v24 = vmul.f32 %v5324_v60, %v1285_v5  ;;  %v1515_v60 = vadd.f32 %v1499_v23, %v1302_v59  ;;  %v1645_v52 = vpack.c.bf16 %v1586_v21, %v1582_v49  ;;  %v1590_v36 = vld [vmem:[%s5101_s13 + $0x150] sm:$0xff]  ;;  %v1561_v26 = vld [vmem:[%s5101_s13 + $0x68] sm:$0xff] }
 0x237   : > { %4500 = vmatprep.subr.bf16.mxu1 %v4713_v45  ;;  %v4728_v45 = vld [vmem:[%s5112_s24 + $0x284] ss:$8 sps:$4 sm:$0xff]   ;;  %v4737_v9 = vld [vmem:[%s5112_s24 + $0x354] ss:$8 sps:$4 sm:$0xff]   ;;  %v1623_v38 = vpack.c.bf16 %v1561_v26, %v1557_v12  ;;  %v4735_v54 = vld [vmem:[%s5112_s24 + $0x350] ss:$8 sps:$4 sm:$0xff]  }
 0x238   : > { %2435 = vmatmul.mubr.bf16.gmra.mxu0 %v1647_v41  ;;  %v1547_v34 = vadd.f32 %v1531_v31, %v1334_v24  ;;  %v1661_v13 = vpack.c.bf16 %v1515_v60, %v1514_v11  ;;  %v1594_v41 = vld [vmem:[%s5101_s13 + $0x170] sm:$0xff]  ;;  %v1589_v14 = vld [vmem:[%s5101_s13 + $0x148] sm:$0xff]  ;;  %v1607_v26 = vld [vmem:[%s5101_s13 + $0x1d8] sm:$0xff] }
 0x239   : > { %2548 = vmatmul.mubr.bf16.gmra.mxu1 %v1649_v58  ;;  %2599 = vmatpush2.bf16.msra.mxu0 %v4711_v2  ;;  %v1616_v58 = vpack.c.bf16 %v1553_v0, %v1549_v43  ;;  %v1652_v10 = vpack.c.bf16 %v1594_v41, %v1590_v36  ;;  %v1593_v32 = vld [vmem:[%s5101_s13 + $0x168] sm:$0xff]  ;;  %v1566_v19 = vld [vmem:[%s5101_s13 + $0x90] sm:$0xff]  ;;  %v1563_v43 = vld [vmem:[%s5101_s13 + $0x78] sm:$0xff] }
 0x23a   : > { %4516 = vmatpush2.bf16.msra.mxu1 %v4711_v2  ;;  %2600 = vmatprep.subr.bf16.mxu0 %v4716_v63  ;;  %v1663_v46 = vpack.c.bf16 %v1547_v34, %v1546_v62  ;;  %v1585_v2 = vld [vmem:[%s5101_s13 + $0x128] sm:$0xff]  ;;  %v1570_v53 = vld [vmem:[%s5101_s13 + $0xb0] sm:$0xff]  ;;  %v1651_v5 = vpack.c.bf16 %v1593_v32, %v1589_v14  ;;  %v1583_v41 = vld [vmem:[%s5101_s13 + $0x118] sm:$0xff] }
 0x23b   : > { %4501 = vmatprep.subr.bf16.mxu1 %v4716_v63  ;;  %2444 = vmatprep.mubr.bf16.mxu0 %v1655_v55  ;;  %v1644_v63 = vpack.c.bf16 %v1585_v2, %v1581_v1  ;;  %v1624_v55 = vpack.c.bf16 %v1562_v40, %v1558_v3  ;;  %v1598_v8 = vld [vmem:[%s5101_s13 + $0x190] sm:$0xff]  ;;  %v1631_v16 = vpack.c.bf16 %v1570_v53, %v1566_v19  ;;  %v4738_v20 = vld [vmem:[%s5112_s24 + $0x340] ss:$8 sps:$4 sm:$0xff]   ;;  %v4752_v49 = vld [vmem:[%s5112_s24 + $0x304] ss:$8 sps:$4 sm:$0xff]  }
 0x23c   : > { %2557 = vmatprep.mubr.bf16.mxu1 %v1657_v7  ;;  %v4734_v7 = vld [vmem:[%s5112_s24 + $0x364] ss:$8 sps:$4 sm:$0xff]   ;;  %v4743_v27 = vld [vmem:[%s5112_s24 + $0x334] ss:$8 sps:$4 sm:$0xff]   ;;  %v4744_v60 = vld [vmem:[%s5112_s24 + $0x320] ss:$8 sps:$4 sm:$0xff]  }
 0x23d   : > { %2601 = vmatpush2.bf16.msra.mxu0 %v4714_v56  ;;  %v1565_v59 = vld [vmem:[%s5101_s13 + $0x88] sm:$0xff]  ;;  %v1574_v29 = vld [vmem:[%s5101_s13 + $0xd0] sm:$0xff]  ;;  %v1567_v1 = vld [vmem:[%s5101_s13 + $0x98] sm:$0xff] }
 0x23e   : > { %4517 = vmatpush2.bf16.msra.mxu1 %v4714_v56  ;;  %2602 = vmatprep.subr.bf16.mxu0 %v4719_v18  ;;  %v1602_v56 = vld [vmem:[%s5101_s13 + $0x1b0] sm:$0xff]  ;;  %v1597_v42 = vld [vmem:[%s5101_s13 + $0x188] sm:$0xff]  ;;  %v1571_v2 = vld [vmem:[%s5101_s13 + $0xb8] sm:$0xff] }
 0x23f   : > { %4502 = vmatprep.subr.bf16.mxu1 %v4719_v18  ;;  %v1659_v18 = vpack.c.bf16 %v1602_v56, %v1598_v8  ;;  %v1601_v23 = vld [vmem:[%s5101_s13 + $0x1a8] sm:$0xff]  ;;  %v1578_v25 = vld [vmem:[%s5101_s13 + $0xf0] sm:$0xff]  ;;  %v1575_v3 = vld [vmem:[%s5101_s13 + $0xd8] sm:$0xff] }
 0x240   : > { %2445 = vmatmul.mubr.bf16.gmra.mxu0 %v1654_v57  ;;  %v4740_v57 = vld [vmem:[%s5112_s24 + $0x344] ss:$8 sps:$4 sm:$0xff]   ;;  %v1606_v24 = vld [vmem:[%s5101_s13 + $0x1d0] sm:$0xff]  ;;  %v4750_v21 = vld [vmem:[%s5112_s24 + $0x300] ss:$8 sps:$4 sm:$0xff]  }
 0x241   : > { %2558 = vmatmul.mubr.bf16.gmra.mxu1 %v1656_v22  ;;  %2603 = vmatpush2.bf16.msra.mxu0 %v4717_v35  ;;  %v1569_v22 = vld [vmem:[%s5101_s13 + $0xa8] sm:$0xff]  ;;  %v1610_v33 = vld [vmem:[%s5101_s13 + $0x1f0] sm:$0xff]  ;;  %v1579_v40 = vld [vmem:[%s5101_s13 + $0xf8] sm:$0xff] }
 0x242   : > { %4518 = vmatpush2.bf16.msra.mxu1 %v4717_v35  ;;  %2604 = vmatprep.subr.bf16.mxu0 %v4722_v17  ;;  %v1630_v31 = vpack.c.bf16 %v1569_v22, %v1565_v59  ;;  %v1658_v35 = vpack.c.bf16 %v1601_v23, %v1597_v42  ;;  %v1666_v11 = vpack.c.bf16 %v1610_v33, %v1606_v24  ;;  %v1573_v62 = vld [vmem:[%s5101_s13 + $0xc8] sm:$0xff]  ;;  %v4749_v50 = vld [vmem:[%s5112_s24 + $0x314] ss:$8 sps:$4 sm:$0xff]   ;;  %v4747_v47 = vld [vmem:[%s5112_s24 + $0x310] ss:$8 sps:$4 sm:$0xff]   ;;  %v1784_v22 = vsub.s32 0, %v5275_v28 }
 0x243   : > { %4503 = vmatprep.subr.bf16.mxu1 %v4722_v17  ;;  %2454 = vmatprep.mubr.bf16.mxu0 %v1662_v37  ;;  %v4741_v17 = vld [vmem:[%s5112_s24 + $0x330] ss:$8 sps:$4 sm:$0xff]   ;;  %v1638_v37 = vpack.c.bf16 %v1578_v25, %v1574_v29  ;;  %v1577_v34 = vld [vmem:[%s5101_s13 + $0xe8] sm:$0xff]  ;;  %v1639_v36 = vpack.c.bf16 %v1579_v40, %v1575_v3  ;;  %v4761_v56 = vld [vmem:[%s5117_s14 + $0x54] ss:$8 sps:$4 sm:$0xff]  }
 0x244   : > { %2567 = vmatprep.mubr.bf16.mxu1 %v1664_v30  ;;  %v4746_v30 = vld [vmem:[%s5112_s24 + $0x324] ss:$8 sps:$4 sm:$0xff]   ;;  %v1611_v14 = vld [vmem:[%s5101_s13 + $0x1f8] sm:$0xff]  ;;  %v4756_v8 = vld [vmem:[%s5117_s14 + $0x60] ss:$8 sps:$4 sm:$0xff]  }
 0x245   : > { %2605 = vmatpush2.bf16.msra.mxu0 %v4720_v44  ;;  %v1667_v32 = vpack.c.bf16 %v1611_v14, %v1607_v26  ;;  %v4753_v19 = vld [vmem:[%s5117_s14 + $0x70] ss:$8 sps:$4 sm:$0xff]   ;;  %v4758_v53 = vld [vmem:[%s5117_s14 + $0x64] ss:$8 sps:$4 sm:$0xff]   ;;  %v4773_v59 = vld [vmem:[%s5117_s14 + $0x14] ss:$8 sps:$4 sm:$0xff]  }
 0x246   : > { %4519 = vmatpush2.bf16.msra.mxu1 %v4720_v44  ;;  %2606 = vmatprep.subr.bf16.mxu0 %v4725_v4  ;;  %v1605_v44 = vld [vmem:[%s5101_s13 + $0x1c8] sm:$0xff]  ;;  %v4771_v42 = vld [vmem:[%s5117_s14 + $0x10] ss:$8 sps:$4 sm:$0xff]   ;;  %v1780_v23 = vld [vmem:[%s684_s28] sm:$0x3]  ;;  %s3229_s28 = sld [smem:[#allocation5 + %s6340_s25]] (!%p4297_p9) }
 0x247   : > { %4504 = vmatprep.subr.bf16.mxu1 %v4725_v4  ;;  %v1609_v4 = vld [vmem:[%s5101_s13 + $0x1e8] sm:$0xff]  ;;  %v5912_v25 = vrot.slane %v1780_v23, %v1784_v22 }
 0x248   : > { %2455 = vmatmul.mubr.bf16.gmra.mxu0 %v1661_v13  ;;  %v1637_v13 = vpack.c.bf16 %v1577_v34, %v1573_v62  ;;  %v4776_v29 = vld [vmem:[%s5117_s14 + $0x4] ss:$8 sps:$4 sm:$0xff]   ;;  %v4774_v24 = vld [vmem:[%s5117_s14] ss:$8 sps:$4 sm:$0xff]  }
 0x249   : > { %2568 = vmatmul.mubr.bf16.gmra.mxu1 %v1663_v46  ;;  %2607 = vmatpush2.bf16.msra.mxu0 %v4723_v39  ;;  %v1665_v46 = vpack.c.bf16 %v1609_v4, %v1605_v44 }
 0x24a   : > { %4520 = vmatpush2.bf16.msra.mxu1 %v4723_v39  ;;  %2608 = vmatprep.subr.bf16.mxu0 %v4728_v45  ;;  %v4936_v39 = vmov 0  }
 0x24b   : > { %4505 = vmatprep.subr.bf16.mxu1 %v4728_v45  ;;  %2610 = vmatprep.mubr.bf16.mxu0 %v1617_v51  ;;  %v1551_v45 = vld [vmem:[%s5101_s13 + $0x18] sm:$0xff] }
 0x24c   : > { %2650 = vmatprep.mubr.bf16.mxu1 %v1645_v52  ;;  %v1555_v51 = vld [vmem:[%s5101_s13 + $0x38] sm:$0xff] }
 0x24d   : > { %2609 = vmatpush2.bf16.msra.mxu0 %v4726_v61  ;;  %v1618_v52 = vpack.c.bf16 %v1555_v51, %v1551_v45 }
 0x24e   : > { %4521 = vmatpush2.bf16.msra.mxu1 %v4726_v61  ;;  %v1559_v61 = vld [vmem:[%s5101_s13 + $0x58] sm:$0xff] }
 0x24f   : > { %2691 = vmatprep.subr.bf16.mxu1 %v4731_v15  ;;  %v1625_v0 = vpack.c.bf16 %v1563_v43, %v1559_v61  ;;  %v1632_v15 = vpack.c.bf16 %v1571_v2, %v1567_v1 }
 0x250   : > { %2611 = vmatmul.mubr.bf16.vlgmr.msra.gmra.mxu0 %v1616_v58  ;;  %v1587_v58 = vld [vmem:[%s5101_s13 + $0x138] sm:$0xff] }
 0x251   : > { %2651 = vmatmul.mubr.bf16.vlgmr.msra.gmra.mxu1 %v1644_v63  ;;  %2620 = vmatprep.mubr.bf16.mxu0 %v1624_v55  ;;  %v1646_v63 = vpack.c.bf16 %v1587_v58, %v1583_v41  ;;  %v1595_v55 = vld [vmem:[%s5101_s13 + $0x178] sm:$0xff] }
 0x252   : > { %2692 = vmatpush1.bf16.msra.mxu1 %v4729_v6  ;;  %2660 = vmatprep.mubr.bf16.mxu1 %v1652_v10  ;;  %v1591_v6 = vld [vmem:[%s5101_s13 + $0x158] sm:$0xff] }
 0x253   : > { %2693 = vmatprep.subr.bf16.mxu1 %v4734_v7  ;;  %v1653_v7 = vpack.c.bf16 %v1595_v55, %v1591_v6  ;;  %v1599_v10 = vld [vmem:[%s5101_s13 + $0x198] sm:$0xff] }
 0x256   : > { %2694 = vmatpush1.bf16.msra.mxu1 %v4732_v48  ;;  %v1603_v48 = vld [vmem:[%s5101_s13 + $0x1b8] sm:$0xff]  ;;  %s4328_s13 = sshll.u32 (!%p4297_p9), %s3230_s18, 7 }
 0x257   : > { %2695 = vmatprep.subr.bf16.mxu1 %v4737_v9  ;;  %v1660_v12 = vpack.c.bf16 %v1603_v48, %v1599_v10  ;;  %v4755_v9 = vld [vmem:[%s5117_s14 + $0x74] ss:$8 sps:$4 sm:$0xff]   ;;  %s4329_s24 = sadd.s32 (!%p4297_p9), 256, %s4328_s13 }
 0x258   : > { %2621 = vmatmul.mubr.bf16.gmra.mxu0 %v1623_v38  ;;  %3016 = vmatprep.subr.bf16.mxu0 %v4755_v9  ;;  %v4759_v38 = vld [vmem:[%s5117_s14 + $0x50] ss:$8 sps:$4 sm:$0xff]   ;;  %s3236_s12 = sadd.s32 (!%p4297_p9), %s4329_s24, %s3235_s20 }
 0x259   : > { %2661 = vmatmul.mubr.bf16.gmra.mxu1 %v1651_v5  ;;  %2630 = vmatprep.mubr.bf16.mxu0 %v1631_v16  ;;  %v4764_v5 = vld [vmem:[%s5117_s14 + $0x44] ss:$8 sps:$4 sm:$0xff]   ;;  %v4767_v16 = vld [vmem:[%s5117_s14 + $0x34] ss:$8 sps:$4 sm:$0xff]  }
 0x25a   : > { %2696 = vmatpush1.bf16.msra.mxu1 %v4735_v54  ;;  %2670 = vmatprep.mubr.bf16.mxu1 %v1659_v18  ;;  %v4762_v54 = vld [vmem:[%s5117_s14 + $0x40] ss:$8 sps:$4 sm:$0xff]   ;;  %v4770_v18 = vld [vmem:[%s5117_s14 + $0x24] ss:$8 sps:$4 sm:$0xff]  }
 0x25b   : > { %2697 = vmatprep.subr.bf16.mxu1 %v4740_v57  ;;  %3017 = vmatpush1.bf16.msra.mxu0 %v4753_v19  ;;  %v4765_v57 = vld [vmem:[%s5117_s14 + $0x30] ss:$8 sps:$4 sm:$0xff]  }
 0x25c   : > { %3018 = vmatprep.subr.bf16.mxu0 %v4758_v53 }
 0x25e   : > { %2698 = vmatpush1.bf16.msra.mxu1 %v4738_v20  ;;  %v4768_v20 = vld [vmem:[%s5117_s14 + $0x20] ss:$8 sps:$4 sm:$0xff]   ;;  %s6336_s14 = sld [smem:[#allocation21_spill]] (!%p4297_p9) }
 0x25f   : > { %2699 = vmatprep.subr.bf16.mxu1 %v4743_v27  ;;  %3019 = vmatpush1.bf16.msra.mxu0 %v4756_v8  ;;  %v6308_v27 = vsub.s32 1, %v5275_v28 }
 0x260   : > { %2631 = vmatmul.mubr.bf16.gmra.mxu0 %v1630_v31  ;;  %3020 = vmatprep.subr.bf16.mxu0 %v4761_v56 }
 0x261   : > { %2671 = vmatmul.mubr.bf16.gmra.mxu1 %v1658_v35  ;;  %2640 = vmatprep.mubr.bf16.mxu0 %v1638_v37  ;;  %v5917_v33 = vrot.slane %v1780_v23, %v6308_v27 }
 0x262   : > { %2700 = vmatpush1.bf16.msra.mxu1 %v4741_v17  ;;  %2680 = vmatprep.mubr.bf16.mxu1 %v1666_v11 }
 0x263   : > { %2701 = vmatprep.subr.bf16.mxu1 %v4746_v30  ;;  %3021 = vmatpush1.bf16.msra.mxu0 %v4759_v38 }
 0x264   : > { %3022 = vmatprep.subr.bf16.mxu0 %v4764_v5 }
 0x266   : > { %2702 = vmatpush1.bf16.msra.mxu1 %v4744_v60 }
 0x267   : > { %2703 = vmatprep.subr.bf16.mxu1 %v4749_v50  ;;  %3023 = vmatpush1.bf16.msra.mxu0 %v4762_v54 }
 0x268   : > { %2641 = vmatmul.mubr.bf16.gmra.mxu0 %v1637_v13  ;;  %3024 = vmatprep.subr.bf16.mxu0 %v4767_v16 }
 0x269   : > { %2681 = vmatmul.mubr.bf16.gmra.mxu1 %v1665_v46  ;;  %3048 = vmatprep.mubr.bf16.mxu0 %v4936_v39 }
 0x26a   : > { %2704 = vmatpush1.bf16.msra.mxu1 %v4747_v47  ;;  %2723 = vmatprep.mubr.bf16.mxu1 %v4936_v39 }
 0x26b   : > { %2705 = vmatprep.subr.bf16.mxu1 %v4752_v49  ;;  %3025 = vmatpush1.bf16.msra.mxu0 %v4765_v57 }
 0x26c   : > { %3026 = vmatprep.subr.bf16.mxu0 %v4770_v18 }
 0x26e   : > { %2706 = vmatpush1.bf16.msra.mxu1 %v4750_v21 }
 0x26f   : > { %3027 = vmatpush1.bf16.msra.mxu0 %v4768_v20 }
 0x270   : > { %3028 = vmatprep.subr.bf16.mxu0 %v4773_v59 }
 0x271   : > { %2724 = vmatmul.mubr.bf16.vlgmr.msra.gmra.mxu1 %v1618_v52 }
 0x272   : > { %2733 = vmatprep.mubr.bf16.mxu1 %v4936_v39 }
 0x273   : > { %3029 = vmatpush1.bf16.msra.mxu0 %v4771_v42 }
 0x274   : > { %3030 = vmatprep.subr.bf16.mxu0 %v4776_v29 }
 0x277   : > { %3031 = vmatpush1.bf16.msra.mxu0 %v4774_v24 }
 0x279   : > { %2734 = vmatmul.mubr.bf16.gmra.mxu1 %v1625_v0 }
 0x27a   : > { %2743 = vmatprep.mubr.bf16.mxu1 %v4936_v39 }
 0x281   : > { %2744 = vmatmul.mubr.bf16.gmra.mxu1 %v1632_v15 }
 0x282   : > { %2753 = vmatprep.mubr.bf16.mxu1 %v4936_v39 }
 0x289   : > { %2754 = vmatmul.mubr.bf16.gmra.mxu1 %v1639_v36 }
 0x28a   : > { %2763 = vmatprep.mubr.bf16.mxu1 %v4936_v39 }
 0x291   : > { %2764 = vmatmul.mubr.bf16.gmra.mxu1 %v1646_v63 }
 0x292   : > { %2773 = vmatprep.mubr.bf16.mxu1 %v4936_v39 }
 0x299   : > { %2774 = vmatmul.mubr.bf16.gmra.mxu1 %v1653_v7 }
 0x29a   : > { %2783 = vmatprep.mubr.bf16.mxu1 %v4936_v39 }
 0x2a1   : > { %2784 = vmatmul.mubr.bf16.gmra.mxu1 %v1660_v12 }
 0x2a2   : > { %2793 = vmatprep.mubr.bf16.mxu1 %v4936_v39 }
 0x2a9   : > { %2794 = vmatmul.mubr.bf16.gmra.mxu1 %v1667_v32 }
 0x2d0   : > { %v2386_v31 = vpop.f32.mrf.mxu0 }
 0x2d1   : > { %v2499_v35 = vpop.f32.mrf.mxu1  ;;  %v2387_v17 = vadd.f32 %v2386_v31, %v5912_v25 }
 0x2d2   : > { %v2388_v37 = vpop.f32.mrf.mxu0 }
 0x2d3   : > { %v2501_v30 = vpop.f32.mrf.mxu1  ;;  %v5920_v11 = vadd.f32 %v2499_v35, %v2387_v17  ;;  %v2389_v60 = vadd.f32 %v2388_v37, %v5917_v33 }
 0x2d4   : > { %v2390_v62 = vpop.f32.mrf.mxu0 }
 0x2d5   : > { %v2503_v34 = vpop.f32.mrf.mxu1  ;;  %v5923_v44 = vadd.f32 %v2501_v30, %v2389_v60  ;;  %v2391_v4 = vadd.f32 %v2390_v62, %v5912_v25 }
 0x2d6   : > { %v2392_v50 = vpop.f32.mrf.mxu0 }
 0x2d7   : > { %v2505_v13 = vpop.f32.mrf.mxu1  ;;  %v5926_v46 = vadd.f32 %v2503_v34, %v2391_v4  ;;  %v2393_v47 = vadd.f32 %v2392_v50, %v5917_v33 }
 0x2d8   : > { %v2396_v49 = vpop.f32.mrf.mxu0 }
 0x2d9   : > { %v2509_v21 = vpop.f32.mrf.mxu1  ;;  %v5929_v45 = vadd.f32 %v2505_v13, %v2393_v47  ;;  %v2397_v51 = vadd.f32 %v2396_v49, %v5912_v25 }
 0x2da   : > { %v2398_v52 = vpop.f32.mrf.mxu0 }
 0x2db   : > { %v2511_v61 = vpop.f32.mrf.mxu1  ;;  %v5932_v43 = vadd.f32 %v2509_v21, %v2397_v51  ;;  %v2399_v0 = vadd.f32 %v2398_v52, %v5917_v33 }
 0x2dc   : > { %v2400_v1 = vpop.f32.mrf.mxu0 }
 0x2dd   : > { %v2513_v2 = vpop.f32.mrf.mxu1  ;;  %v5935_v15 = vadd.f32 %v2511_v61, %v2399_v0  ;;  %v2401_v3 = vadd.f32 %v2400_v1, %v5912_v25 }
 0x2de   : > { %v2402_v40 = vpop.f32.mrf.mxu0 }
 0x2df   : > { %v2515_v36 = vpop.f32.mrf.mxu1  ;;  %v5938_v41 = vadd.f32 %v2513_v2, %v2401_v3  ;;  %v2403_v58 = vadd.f32 %v2402_v40, %v5917_v33 }
 0x2e0   : > { %v2406_v63 = vpop.f32.mrf.mxu0 }
 0x2e1   : > { %v2519_v6 = vpop.f32.mrf.mxu1  ;;  %v5941_v55 = vadd.f32 %v2515_v36, %v2403_v58  ;;  %v2407_v7 = vadd.f32 %v2406_v63, %v5912_v25 }
 0x2e2   : > { %v2408_v10 = vpop.f32.mrf.mxu0 }
 0x2e3   : > { %v2521_v48 = vpop.f32.mrf.mxu1  ;;  %v5944_v12 = vadd.f32 %v2519_v6, %v2407_v7  ;;  %v2409_v26 = vadd.f32 %v2408_v10, %v5917_v33 }
 0x2e4   : > { %v2410_v14 = vpop.f32.mrf.mxu0 }
 0x2e5   : > { %v2523_v32 = vpop.f32.mrf.mxu1  ;;  %v5947_v9 = vadd.f32 %v2521_v48, %v2409_v26  ;;  %v2411_v19 = vadd.f32 %v2410_v14, %v5912_v25 }
 0x2e6   : > { %v2412_v53 = vpop.f32.mrf.mxu0 }
 0x2e7   : > { %v2525_v8 = vpop.f32.mrf.mxu1  ;;  %v5950_v56 = vadd.f32 %v2523_v32, %v2411_v19  ;;  %v2413_v38 = vadd.f32 %v2412_v53, %v5917_v33 }
 0x2e8   : > { %v2416_v5 = vpop.f32.mrf.mxu0 }
 0x2e9   : > { %v2529_v54 = vpop.f32.mrf.mxu1  ;;  %v5953_v16 = vadd.f32 %v2525_v8, %v2413_v38  ;;  %v2417_v57 = vadd.f32 %v2416_v5, %v5912_v25 }
 0x2ea   : > { %v2418_v18 = vpop.f32.mrf.mxu0 }
 0x2eb   : > { %v2531_v20 = vpop.f32.mrf.mxu1  ;;  %v5956_v59 = vadd.f32 %v2529_v54, %v2417_v57  ;;  %v2419_v42 = vadd.f32 %v2418_v18, %v5917_v33 }
 0x2ec   : > { %v2420_v23 = vpop.f32.mrf.mxu0 }
 0x2ed   : > { %v2533_v29 = vpop.f32.mrf.mxu1  ;;  %v5959_v24 = vadd.f32 %v2531_v20, %v2419_v42  ;;  %v2421_v31 = vadd.f32 %v2420_v23, %v5912_v25 }
 0x2ee   : > { %v2422_v35 = vpop.f32.mrf.mxu0 }
 0x2ef   : > { %v2535_v17 = vpop.f32.mrf.mxu1  ;;  %v5962_v37 = vadd.f32 %v2533_v29, %v2421_v31  ;;  %v2423_v30 = vadd.f32 %v2422_v35, %v5917_v33 }
 0x2f0   : > { %v2426_v60 = vpop.f32.mrf.mxu0 }
 0x2f1   : > { %v2539_v62 = vpop.f32.mrf.mxu1  ;;  %v5965_v34 = vadd.f32 %v2535_v17, %v2423_v30  ;;  %v2427_v4 = vadd.f32 %v2426_v60, %v5912_v25 }
 0x2f2   : > { %v2428_v50 = vpop.f32.mrf.mxu0 }
 0x2f3   : > { %v2541_v13 = vpop.f32.mrf.mxu1  ;;  %v2540_v47 = vadd.f32 %v2539_v62, %v2427_v4  ;;  %v2429_v49 = vadd.f32 %v2428_v50, %v5917_v33 }
 0x2f4   : > { %v2430_v21 = vpop.f32.mrf.mxu0 }
 0x2f5   : > { %v2543_v51 = vpop.f32.mrf.mxu1  ;;  %v2542_v52 = vadd.f32 %v2541_v13, %v2429_v49  ;;  %v2431_v61 = vadd.f32 %v2430_v21, %v5912_v25 }
 0x2f6   : > { %v2432_v0 = vpop.f32.mrf.mxu0 }
 0x2f7   : > { %v2545_v1 = vpop.f32.mrf.mxu1  ;;  %v2544_v2 = vadd.f32 %v2543_v51, %v2431_v61  ;;  %v2433_v3 = vadd.f32 %v2432_v0, %v5917_v33 }
 0x2f8   : > { %v2436_v40 = vpop.f32.mrf.mxu0 }
 0x2f9   : > { %v2549_v36 = vpop.f32.mrf.mxu1  ;;  %v5971_v58 = vadd.f32 %v2545_v1, %v2433_v3  ;;  %v2437_v63 = vadd.f32 %v2436_v40, %v5912_v25 }
 0x2fa   : > { %v2438_v6 = vpop.f32.mrf.mxu0 }
 0x2fb   : > { %v2551_v7 = vpop.f32.mrf.mxu1  ;;  %v2550_v10 = vadd.f32 %v2549_v36, %v2437_v63  ;;  %v2439_v48 = vadd.f32 %v2438_v6, %v5917_v33 }
 0x2fc   : > { %v2440_v26 = vpop.f32.mrf.mxu0 }
 0x2fd   : > { %v2553_v14 = vpop.f32.mrf.mxu1  ;;  %v2552_v32 = vadd.f32 %v2551_v7, %v2439_v48  ;;  %v2441_v19 = vadd.f32 %v2440_v26, %v5912_v25 }
 0x2fe   : > { %v2442_v53 = vpop.f32.mrf.mxu0 }
 0x2ff   : > { %v2555_v8 = vpop.f32.mrf.mxu1  ;;  %v2554_v38 = vadd.f32 %v2553_v14, %v2441_v19  ;;  %v2443_v5 = vadd.f32 %v2442_v53, %v5917_v33 }
 0x300   : > { %v2446_v54 = vpop.f32.mrf.mxu0 }
 0x301   : > { %v2559_v57 = vpop.f32.mrf.mxu1  ;;  %v5977_v18 = vadd.f32 %v2555_v8, %v2443_v5  ;;  %v2447_v20 = vadd.f32 %v2446_v54, %v5912_v25 }
 0x302   : > { %v2448_v42 = vpop.f32.mrf.mxu0 }
 0x303   : > { %v2561_v23 = vpop.f32.mrf.mxu1  ;;  %v2560_v29 = vadd.f32 %v2559_v57, %v2447_v20  ;;  %v2449_v31 = vadd.f32 %v2448_v42, %v5917_v33 }
 0x304   : > { %v2450_v35 = vpop.f32.mrf.mxu0 }
 0x305   : > { %v2563_v17 = vpop.f32.mrf.mxu1  ;;  %v2562_v30 = vadd.f32 %v2561_v23, %v2449_v31  ;;  %v2451_v60 = vadd.f32 %v2450_v35, %v5912_v25 }
 0x306   : > { %v2452_v62 = vpop.f32.mrf.mxu0 }
 0x307   : > { %v2565_v4 = vpop.f32.mrf.mxu1  ;;  %v2564_v50 = vadd.f32 %v2563_v17, %v2451_v60  ;;  %v2453_v13 = vadd.f32 %v2452_v62, %v5917_v33 }
 0x308   : > { %v2456_v49 = vpop.f32.mrf.mxu0 }
 0x309   : > { %v2569_v21 = vpop.f32.mrf.mxu1  ;;  %v5983_v51 = vadd.f32 %v2565_v4, %v2453_v13  ;;  %v2457_v61 = vadd.f32 %v2456_v49, %v5912_v25 }
 0x30a   : > { %v2458_v0 = vpop.f32.mrf.mxu0 }
 0x30b   : > { %v2571_v1 = vpop.f32.mrf.mxu1  ;;  %v2570_v3 = vadd.f32 %v2569_v21, %v2457_v61  ;;  %v2459_v40 = vadd.f32 %v2458_v0, %v5917_v33 }
 0x30c   : > { %v2460_v36 = vpop.f32.mrf.mxu0 }
 0x30d   : > { %v2573_v63 = vpop.f32.mrf.mxu1  ;;  %v2572_v6 = vadd.f32 %v2571_v1, %v2459_v40  ;;  %v2461_v7 = vadd.f32 %v2460_v36, %v5912_v25 }
 0x30e   : > { %v2462_v48 = vpop.f32.mrf.mxu0 }
 0x30f   : > { %v2575_v26 = vpop.f32.mrf.mxu1  ;;  %v2574_v14 = vadd.f32 %v2573_v63, %v2461_v7  ;;  %v2463_v19 = vadd.f32 %v2462_v48, %v5917_v33 }
 0x310   : > { %v2612_v53 = vpop.f32.mrf.mxu0 }
 0x311   : > { %v2652_v8 = vpop.f32.mrf.mxu1  ;;  %v5989_v5 = vadd.f32 %v2575_v26, %v2463_v19 }
 0x312   : > { %v5991_v54 = vadd.f32 %v2652_v8, %v2540_v47  ;;  %v2614_v57 = vpop.f32.mrf.mxu0 }
 0x313   : > { %v2654_v20 = vpop.f32.mrf.mxu1 }
 0x314   : > { %v5993_v42 = vadd.f32 %v2654_v20, %v2542_v52  ;;  %v2616_v35 = vpop.f32.mrf.mxu0 }
 0x315   : > { %v2656_v23 = vpop.f32.mrf.mxu1 }
 0x316   : > { %v5995_v31 = vadd.f32 %v2656_v23, %v2544_v2  ;;  %v2618_v33 = vpop.f32.mrf.mxu0 }
 0x317   : > { %v5997_v25 = vpop.f32.mrf.mxu1 }
 0x318   : > { %v2622_v49 = vpop.f32.mrf.mxu0 }
 0x319   : > { %v2662_v17 = vpop.f32.mrf.mxu1 }
 0x31a   : > { %v5999_v60 = vadd.f32 %v2662_v17, %v2550_v10  ;;  %v2624_v2 = vpop.f32.mrf.mxu0 }
 0x31b   : > { %v2664_v62 = vpop.f32.mrf.mxu1  ;;  %v2625_v27 = vadd.f32 %v2624_v2, %v5935_v15 }
 0x31c   : > { %v6001_v4 = vadd.f32 %v2664_v62, %v2552_v32  ;;  %v2626_v36 = vpop.f32.mrf.mxu0 }
 0x31d   : > { %v2666_v13 = vpop.f32.mrf.mxu1  ;;  %v2627_v15 = vadd.f32 %v2626_v36, %v5938_v41 }
 0x31e   : > { %v6003_v47 = vadd.f32 %v2666_v13, %v2554_v38  ;;  %v2628_v38 = vpop.f32.mrf.mxu0  ;;  %v2613_v13 = vadd.f32 %v2612_v53, %v5920_v11 }
 0x31f   : > { %v6005_v21 = vpop.f32.mrf.mxu1 }
 0x320   : > { %v2632_v8 = vpop.f32.mrf.mxu0 }
 0x321   : > { %v2672_v52 = vpop.f32.mrf.mxu1 }
 0x322   : > { %v6007_v61 = vadd.f32 %v2672_v52, %v2560_v29  ;;  %v2634_v23 = vpop.f32.mrf.mxu0  ;;  %v2619_v52 = vadd.f32 %v2618_v33, %v5929_v45  ;;  %v2623_v45 = vadd.f32 %v2622_v49, %v5932_v43  ;;  %v2629_v33 = vadd.f32 %v2628_v38, %v5941_v55 }
 0x323   : > { %v2674_v0 = vpop.f32.mrf.mxu1  ;;  %v2633_v38 = vadd.f32 %v2632_v8, %v5944_v12 }
 0x324   : > { %v6009_v1 = vadd.f32 %v2674_v0, %v2562_v30 }
 0x325   : > { %v2676_v40 = vpop.f32.mrf.mxu1 }
 0x326   : > { %v6011_v10 = vadd.f32 %v2676_v40, %v2564_v50  ;;  %v2615_v50 = vadd.f32 %v2614_v57, %v5923_v44 }
 0x327   : > { %v6013_v63 = vpop.f32.mrf.mxu1 }
 0x329   : > { %v2682_v32 = vpop.f32.mrf.mxu1 }
 0x32a   : > { %v6015_v7 = vadd.f32 %v2682_v32, %v2570_v3 }
 0x32b   : > { %v2684_v48 = vpop.f32.mrf.mxu1 }
 0x32c   : > { %v6017_v26 = vadd.f32 %v2684_v48, %v2572_v6  ;;  %v2636_v6 = vpop.f32.mrf.mxu0  ;;  %v2617_v48 = vadd.f32 %v2616_v35, %v5926_v46 }
 0x32d   : > { %v2686_v19 = vpop.f32.mrf.mxu1 }
 0x32e   : > { %v6019_v29 = vadd.f32 %v2686_v19, %v2574_v14  ;;  %v2638_v57 = vpop.f32.mrf.mxu0 }
 0x32f   : > { %v6021_v20 = vpop.f32.mrf.mxu1 }
 0x331   : > { %v2725_v30 = vpop.f32.mrf.mxu1 }
 0x332   : > { %v2726_v40 = vadd.f32 %v2725_v30, %v2613_v13 }
 0x333   : > { %v2727_v17 = vpop.f32.mrf.mxu1 }
 0x334   : > { %v2728_v62 = vadd.f32 %v2727_v17, %v2615_v50 }
 0x335   : > { %v2729_v3 = vpop.f32.mrf.mxu1 }
 0x336   : > { %v2820_v0 = vmul.f32 0.5, %v2728_v62  ;;  %v2730_v50 = vadd.f32 %v2729_v3, %v2617_v48  ;;  %v2642_v62 = vpop.f32.mrf.mxu0  ;;  %v2635_v3 = vadd.f32 %v2634_v23, %v5947_v9 }
 0x337   : > { %v2731_v32 = vpop.f32.mrf.mxu1 }
 0x338   : > { %4777 = vtanh.f32 %v2820_v0  ;;  %v2732_v14 = vadd.f32 %v2731_v32, %v2619_v52  ;;  %v2644_v0 = vpop.f32.mrf.mxu0  ;;  %v2639_v32 = vadd.f32 %v2638_v57, %v5953_v16 }
 0x339   : > { %v2735_v19 = vpop.f32.mrf.mxu1  ;;  %4779 = vtanh.f32 %v2726_v40 }
 0x33a   : > { %v2821_v44 = vmul.f32 0.5, %v2732_v14  ;;  %v2736_v13 = vadd.f32 %v2735_v19, %v2623_v45  ;;  %v2646_v19 = vpop.f32.mrf.mxu0  ;;  %v2645_v45 = vadd.f32 %v2644_v0, %v5959_v24 }
 0x33b   : > { %v2737_v17 = vpop.f32.mrf.mxu1 }
 0x33c   : > { %4781 = vtanh.f32 %v2821_v44  ;;  %v2738_v11 = vadd.f32 %v2737_v17, %v2625_v27  ;;  %v2637_v17 = vadd.f32 %v2636_v6, %v5950_v56  ;;  %v2648_v16 = vpop.f32.mrf.mxu0 }
 0x33d   : > { %v2739_v53 = vpop.f32.mrf.mxu1  ;;  %4783 = vtanh.f32 %v2730_v50  ;;  %v2649_v56 = vadd.f32 %v2648_v16, %v5965_v34 }
 0x33e   : > { %v2822_v30 = vmul.f32 0.5, %v2738_v11  ;;  %v2740_v27 = vadd.f32 %v2739_v53, %v2627_v15  ;;  %v2643_v15 = vadd.f32 %v2642_v62, %v5956_v59 }
 0x33f   : > { %v2741_v46 = vpop.f32.mrf.mxu1 }
 0x340   : > { %4785 = vtanh.f32 %v2822_v30  ;;  %v2742_v35 = vadd.f32 %v2741_v46, %v2629_v33 }
 0x341   : > { %v2745_v2 = vpop.f32.mrf.mxu1  ;;  %4787 = vtanh.f32 %v2736_v13 }
 0x342   : > { %v2823_v52 = vmul.f32 0.5, %v2742_v35  ;;  %v2746_v41 = vadd.f32 %v2745_v2, %v2633_v38 }
 0x343   : > { %v2747_v43 = vpop.f32.mrf.mxu1 }
 0x344   : > { %4789 = vtanh.f32 %v2823_v52  ;;  %v2748_v49 = vadd.f32 %v2747_v43, %v2635_v3 }
 0x345   : > { %v4778_v55 = vpop.eup %4777  ;;  %v2749_v40 = vpop.f32.mrf.mxu1  ;;  %4791 = vtanh.f32 %v2740_v27 }
 0x346   : > { %v2852_v14 = vadd.f32 1.0, %v4778_v55  ;;  %v2824_v48 = vmul.f32 0.5, %v2748_v49  ;;  %v4780_v9 = vpop.eup %4779  ;;  %v2750_v57 = vadd.f32 %v2749_v40, %v2637_v17  ;;  %v2647_v40 = vadd.f32 %v2646_v19, %v5962_v37 }
 0x347   : > { %v2751_v36 = vpop.f32.mrf.mxu1  ;;  %v2659_v37 = vadd.f32 %v5997_v25, %v5971_v58 }
 0x348   : > { %v2868_v23 = vmul.f32 0.5, %v2852_v14  ;;  %4793 = vtanh.f32 %v2824_v48  ;;  %v2752_v44 = vadd.f32 %v2751_v36, %v2639_v32 }
 0x349   : > { %v4782_v50 = vpop.eup %4781  ;;  %v2755_v11 = vpop.f32.mrf.mxu1  ;;  %4795 = vtanh.f32 %v2746_v41 }
 0x34a   : > { %v2884_v12 = vmul.f32 %v4780_v9, %v2868_v23  ;;  %v2853_v8 = vadd.f32 1.0, %v4782_v50  ;;  %v2825_v53 = vmul.f32 0.5, %v2752_v44  ;;  %v4784_v30 = vpop.eup %4783  ;;  %v2756_v52 = vadd.f32 %v2755_v11, %v2643_v15 }
 0x34b   : > { %v2757_v33 = vpop.f32.mrf.mxu1 }
 0x34c   : > { %v2869_v13 = vmul.f32 0.5, %v2853_v8  ;;  %4797 = vtanh.f32 %v2825_v53  ;;  %v2758_v46 = vadd.f32 %v2757_v33, %v2645_v45 }
 0x34d   : > { %v4786_v35 = vpop.eup %4785  ;;  %v2759_v2 = vpop.f32.mrf.mxu1  ;;  %4799 = vtanh.f32 %v2750_v57 }
 0x34e   : > { %v2885_v6 = vmul.f32 %v4784_v30, %v2869_v13  ;;  %v2854_v3 = vadd.f32 1.0, %v4786_v35  ;;  %v2826_v24 = vmul.f32 0.5, %v2758_v46  ;;  %v4788_v27 = vpop.eup %4787  ;;  %v2760_v34 = vadd.f32 %v2759_v2, %v2647_v40 }
 0x34f   : > { %v2761_v0 = vpop.f32.mrf.mxu1 }
 0x350   : > { %v2900_v43 = vpack.c.bf16 %v2885_v6, %v2884_v12  ;;  %v2870_v49 = vmul.f32 0.5, %v2854_v3  ;;  %4801 = vtanh.f32 %v2826_v24  ;;  %v2762_v55 = vadd.f32 %v2761_v0, %v2649_v56 }
 0x351   : > { %v4790_v38 = vpop.eup %4789  ;;  %v2765_v32 = vpop.f32.mrf.mxu1  ;;  %4803 = vtanh.f32 %v2756_v52  ;;  %v2669_v56 = vadd.f32 %v6005_v21, %v5977_v18 }
 0x352   : > { %v2855_v14 = vadd.f32 1.0, %v4790_v38  ;;  %v2827_v59 = vmul.f32 0.5, %v2762_v55  ;;  %3049 = vmatmul.mubr.bf16.vlgmr.msra.gmra.mxu0 %v2900_v43  ;;  %v2886_v62 = vmul.f32 %v4788_v27, %v2870_v49  ;;  %v4792_v41 = vpop.eup %4791  ;;  %v2766_v11 = vadd.f32 %v2765_v32, %v5991_v54 }
 0x353   : > { %v2767_v48 = vpop.f32.mrf.mxu1  ;;  %3058 = vmatprep.mubr.bf16.mxu0 %v4936_v39 }
 0x354   : > { %v2871_v36 = vmul.f32 0.5, %v2855_v14  ;;  %4805 = vtanh.f32 %v2827_v59  ;;  %v2768_v9 = vadd.f32 %v2767_v48, %v5993_v42  ;;  %v2679_v48 = vadd.f32 %v6013_v63, %v5983_v51 }
 0x355   : > { %v4794_v23 = vpop.eup %4793  ;;  %v2769_v44 = vpop.f32.mrf.mxu1  ;;  %4807 = vtanh.f32 %v2760_v34 }
 0x356   : > { %v2856_v19 = vadd.f32 1.0, %v4794_v23  ;;  %v2828_v50 = vmul.f32 0.5, %v2768_v9  ;;  %v2887_v17 = vmul.f32 %v4792_v41, %v2871_v36  ;;  %v4796_v12 = vpop.eup %4795  ;;  %v2770_v58 = vadd.f32 %v2769_v44, %v5995_v31 }
 0x357   : > { %v2771_v45 = vpop.f32.mrf.mxu1 }
 0x358   : > { %v2872_v8 = vmul.f32 0.5, %v2856_v19  ;;  %4809 = vtanh.f32 %v2828_v50  ;;  %v2772_v53 = vadd.f32 %v2771_v45, %v2659_v37  ;;  %v2901_v16 = vpack.c.bf16 %v2887_v17, %v2886_v62 }
 0x359   : > { %v4798_v57 = vpop.eup %4797  ;;  %v2775_v33 = vpop.f32.mrf.mxu1  ;;  %4811 = vtanh.f32 %v2766_v11 }
 0x35a   : > { %v2857_v42 = vadd.f32 1.0, %v4798_v57  ;;  %v2829_v30 = vmul.f32 0.5, %v2772_v53  ;;  %3059 = vmatmul.mubr.bf16.gmra.mxu0 %v2901_v16  ;;  %v2888_v13 = vmul.f32 %v4796_v12, %v2872_v8  ;;  %v4800_v46 = vpop.eup %4799  ;;  %v2776_v52 = vadd.f32 %v2775_v33, %v5999_v60 }
 0x35b   : > { %v2777_v25 = vpop.f32.mrf.mxu1  ;;  %3068 = vmatprep.mubr.bf16.mxu0 %v4936_v39  ;;  %v2689_v33 = vadd.f32 %v6021_v20, %v5989_v5 }
 0x35c   : > { %v2873_v54 = vmul.f32 0.5, %v2857_v42  ;;  %4813 = vtanh.f32 %v2829_v30  ;;  %v2778_v35 = vadd.f32 %v2777_v25, %v6001_v4 }
 0x35d   : > { %v4802_v15 = vpop.eup %4801  ;;  %v2779_v2 = vpop.f32.mrf.mxu1  ;;  %4815 = vtanh.f32 %v2770_v58 }
 0x35e   : > { %v2858_v6 = vadd.f32 1.0, %v4802_v15  ;;  %v2830_v3 = vmul.f32 0.5, %v2778_v35  ;;  %v2889_v24 = vmul.f32 %v4800_v46, %v2873_v54  ;;  %v4804_v0 = vpop.eup %4803  ;;  %v2780_v18 = vadd.f32 %v2779_v2, %v6003_v47 }
 0x35f   : > { %v2781_v31 = vpop.f32.mrf.mxu1 }
 0x360   : > { %v2874_v27 = vmul.f32 0.5, %v2858_v6  ;;  %4817 = vtanh.f32 %v2830_v3  ;;  %v2782_v43 = vadd.f32 %v2781_v31, %v2669_v56  ;;  %v2902_v49 = vpack.c.bf16 %v2889_v24, %v2888_v13 }
 0x361   : > { %v4806_v55 = vpop.eup %4805  ;;  %v2785_v38 = vpop.f32.mrf.mxu1  ;;  %4819 = vtanh.f32 %v2776_v52 }
 0x362   : > { %v2859_v4 = vadd.f32 1.0, %v4806_v55  ;;  %v2831_v40 = vmul.f32 0.5, %v2782_v43  ;;  %3069 = vmatmul.mubr.bf16.gmra.mxu0 %v2902_v49  ;;  %v2890_v32 = vmul.f32 %v4804_v0, %v2874_v27  ;;  %v4808_v14 = vpop.eup %4807  ;;  %v2786_v23 = vadd.f32 %v2785_v38, %v6007_v61 }
 0x363   : > { %v2787_v21 = vpop.f32.mrf.mxu1  ;;  %3078 = vmatprep.mubr.bf16.mxu0 %v4936_v39 }
 0x364   : > { %v2875_v60 = vmul.f32 0.5, %v2859_v4  ;;  %4821 = vtanh.f32 %v2831_v40  ;;  %v2788_v59 = vadd.f32 %v2787_v21, %v6009_v1 }
 0x365   : > { %v4810_v62 = vpop.eup %4809  ;;  %v2789_v34 = vpop.f32.mrf.mxu1  ;;  %4823 = vtanh.f32 %v2780_v18 }
 0x366   : > { %v2860_v41 = vadd.f32 1.0, %v4810_v62  ;;  %v2832_v36 = vmul.f32 0.5, %v2788_v59  ;;  %v2891_v9 = vmul.f32 %v4808_v14, %v2875_v60  ;;  %v4812_v44 = vpop.eup %4811  ;;  %v2790_v51 = vadd.f32 %v2789_v34, %v6011_v10 }
 0x367   : > { %v2791_v47 = vpop.f32.mrf.mxu1 }
 0x368   : > { %v2876_v37 = vmul.f32 0.5, %v2860_v41  ;;  %4825 = vtanh.f32 %v2832_v36  ;;  %v2792_v19 = vadd.f32 %v2791_v47, %v2679_v48  ;;  %v2903_v50 = vpack.c.bf16 %v2891_v9, %v2890_v32  ;;  %v2924_v36 = vld [vmem:[%s5122_s19] sm:$0x3] }
 0x369   : > { %v4814_v17 = vpop.eup %4813  ;;  %v2795_v11 = vpop.f32.mrf.mxu1  ;;  %4827 = vtanh.f32 %v2786_v23  ;;  %v6069_v9 = vrot.slane %v2924_v36, %v1784_v22  ;;  %v6335_v23 = vsub.s32 1, %v5275_v28  ;;  %v4842_v28 = vld [vmem:[#allocation3 + $0x68] sm:$0xff] }
 0x36a   : > { %v2861_v1 = vadd.f32 1.0, %v4814_v17  ;;  %v2833_v45 = vmul.f32 0.5, %v2792_v19  ;;  %3079 = vmatmul.mubr.bf16.gmra.mxu0 %v2903_v50  ;;  %v2892_v12 = vmul.f32 %v4812_v44, %v2876_v37  ;;  %v4816_v8 = vpop.eup %4815  ;;  %v2796_v58 = vadd.f32 %v2795_v11, %v6015_v7  ;;  %v3177_v50 = vld [vmem:[#allocation4 + $0x8] sm:$0xff] }
 0x36b   : > { %v2797_v63 = vpop.f32.mrf.mxu1  ;;  %3088 = vmatprep.mubr.bf16.mxu0 %v4936_v39  ;;  %v6073_v47 = vrot.slane %v2924_v36, %v6335_v23 }
 0x36c   : > { %v2877_v61 = vmul.f32 0.5, %v2861_v1  ;;  %4829 = vtanh.f32 %v2833_v45  ;;  %v2798_v53 = vadd.f32 %v2797_v63, %v6017_v26  ;;  %v3178_v63 = vld [vmem:[#allocation4] sm:$0xff] }
 0x36d   : > { %v4818_v16 = vpop.eup %4817  ;;  %v2799_v57 = vpop.f32.mrf.mxu1  ;;  %4831 = vtanh.f32 %v2790_v51 }
 0x36e   : > { %v2862_v42 = vadd.f32 1.0, %v4818_v16  ;;  %v2834_v30 = vmul.f32 0.5, %v2798_v53  ;;  %v2893_v13 = vmul.f32 %v4816_v8, %v2877_v61  ;;  %v4820_v25 = vpop.eup %4819  ;;  %v2800_v6 = vadd.f32 %v2799_v57, %v6019_v29 }
 0x36f   : > { %v2801_v10 = vpop.f32.mrf.mxu1 }
 0x370   : > { %v2878_v46 = vmul.f32 0.5, %v2862_v42  ;;  %4833 = vtanh.f32 %v2834_v30  ;;  %v2802_v54 = vadd.f32 %v2801_v10, %v2689_v33  ;;  %v2904_v35 = vpack.c.bf16 %v2893_v13, %v2892_v12  ;;  %v3179_v30 = vld [vmem:[#allocation4 + $0x48] sm:$0xff]  ;;  %v4843_v13 = vld [vmem:[#allocation3 + $0x10] sm:$0xff] }
 0x371   : > { %v4822_v15 = vpop.eup %4821  ;;  %4835 = vtanh.f32 %v2796_v58 }
 0x372   : > { %v2863_v2 = vadd.f32 1.0, %v4822_v15  ;;  %v2835_v26 = vmul.f32 0.5, %v2802_v54  ;;  %3089 = vmatmul.mubr.bf16.gmra.mxu0 %v2904_v35  ;;  %v2894_v56 = vmul.f32 %v4820_v25, %v2878_v46  ;;  %v4824_v5 = vpop.eup %4823 }
 0x373   : > { %3098 = vmatprep.mubr.bf16.mxu0 %v4936_v39 }
 0x374   : > { %v2879_v20 = vmul.f32 0.5, %v2863_v2  ;;  %4837 = vtanh.f32 %v2835_v26  ;;  %v3180_v2 = vld [vmem:[#allocation4 + $0x60] sm:$0xff] }
 0x375   : > { %v4826_v7 = vpop.eup %4825  ;;  %4839 = vtanh.f32 %v2800_v6  ;;  %v4844_v26 = vld [vmem:[#allocation3 + $0x40] sm:$0xff] }
 0x376   : > { %v2864_v3 = vadd.f32 1.0, %v4826_v7  ;;  %v2895_v24 = vmul.f32 %v4824_v5, %v2879_v20  ;;  %v4828_v52 = vpop.eup %4827 }
 0x378   : > { %v2880_v31 = vmul.f32 0.5, %v2864_v3  ;;  %v2905_v0 = vpack.c.bf16 %v2895_v24, %v2894_v56 }
 0x379   : > { %v4830_v27 = vpop.eup %4829 }
 0x37a   : > { %v2865_v43 = vadd.f32 1.0, %v4830_v27  ;;  %3099 = vmatmul.mubr.bf16.gmra.mxu0 %v2905_v0  ;;  %v2896_v49 = vmul.f32 %v4828_v52, %v2880_v31  ;;  %v4832_v55 = vpop.eup %4831  ;;  %v3181_v52 = vld [vmem:[#allocation4 + $0x68] sm:$0xff] }
 0x37b   : > { %3108 = vmatprep.mubr.bf16.mxu0 %v4936_v39  ;;  %v4845_v31 = vld [vmem:[#allocation3 + $0x48] sm:$0xff] }
 0x37c   : > { %v2881_v38 = vmul.f32 0.5, %v2865_v43 }
 0x37d   : > { %v4834_v4 = vpop.eup %4833 }
 0x37e   : > { %v2866_v40 = vadd.f32 1.0, %v4834_v4  ;;  %v2897_v29 = vmul.f32 %v4832_v55, %v2881_v38  ;;  %v4836_v32 = vpop.eup %4835 }
 0x380   : > { %v2882_v18 = vmul.f32 0.5, %v2866_v40  ;;  %v2906_v21 = vpack.c.bf16 %v2897_v29, %v2896_v49  ;;  %v3182_v40 = vld [vmem:[#allocation4 + $0x18] sm:$0xff]  ;;  %v4846_v29 = vld [vmem:[#allocation3 + $0x30] sm:$0xff] }
 0x381   : > { %v4838_v14 = vpop.eup %4837 }
 0x382   : > { %v2867_v60 = vadd.f32 1.0, %v4838_v14  ;;  %3109 = vmatmul.mubr.bf16.gmra.mxu0 %v2906_v21  ;;  %v2898_v59 = vmul.f32 %v4836_v32, %v2882_v18  ;;  %v4840_v34 = vpop.eup %4839 }
 0x383   : > { %3118 = vmatprep.mubr.bf16.mxu0 %v4936_v39  ;;  %v4841_v39 = vld [vmem:[#allocation3 + $0x28] sm:$0xff] }
 0x384   : > { %v2883_v62 = vmul.f32 0.5, %v2867_v60 }
 0x386   : > { %v2899_v48 = vmul.f32 %v4840_v34, %v2883_v62  ;;  %v3183_v34 = vld [vmem:[#allocation4 + $0x10] sm:$0xff] }
 0x388   : > { %v2907_v41 = vpack.c.bf16 %v2899_v48, %v2898_v59  ;;  %v4847_v48 = vld [vmem:[#allocation3 + $0x70] sm:$0xff] }
 0x38a   : > { %3119 = vmatmul.mubr.bf16.gmra.mxu0 %v2907_v41 }
 0x412   : > { %v3050_v44 = vpop.f32.mrf.mxu0 }
 0x413   : > { %v3051_v37 = vadd.f32 %v3050_v44, %v6069_v9 }
 0x414   : > { %v3052_v19 = vpop.f32.mrf.mxu0 }
 0x415   : > { %v3129_v17 = vadd.f32 %v4841_v39, %v3051_v37  ;;  %v3053_v11 = vadd.f32 %v3052_v19, %v6073_v47  ;;  %v3184_v39 = vld [vmem:[#allocation4 + $0x38] sm:$0xff] }
 0x416   : > { %v3054_v1 = vpop.f32.mrf.mxu0 }
 0x417   : > { %v3145_v45 = vmul.f32 0.70710677, %v3129_v17  ;;  %v3193_v12 = vadd.f32 %v3177_v50, %v3053_v11  ;;  %v3055_v51 = vadd.f32 %v3054_v1, %v6069_v9  ;;  %v4848_v17 = vld [vmem:[#allocation3 + $0x38] sm:$0xff] }
 0x418   : > { %v3056_v22 = vpop.f32.mrf.mxu0 }
 0x419   : > { %3161 = vst [vmem:[#allocation3 + $0x28] sm:$0xff] %v3145_v45  ;;  %3209 = vst [vmem:[#allocation4 + $0x8] sm:$0xff] %v3193_v12  ;;  %v3130_v8 = vadd.f32 %v4842_v28, %v3055_v51  ;;  %v3057_v61 = vadd.f32 %v3056_v22, %v6073_v47  ;;  %v3185_v28 = vld [vmem:[#allocation4 + $0x40] sm:$0xff] }
 0x41a   : > { %v3060_v53 = vpop.f32.mrf.mxu0 }
 0x41b   : > { %v3146_v16 = vmul.f32 0.70710677, %v3130_v8  ;;  %v3194_v57 = vadd.f32 %v3178_v63, %v3057_v61  ;;  %v3061_v33 = vadd.f32 %v3060_v53, %v6069_v9  ;;  %v4849_v8 = vld [vmem:[#allocation3 + $0x20] sm:$0xff] }
 0x41c   : > { %v3062_v42 = vpop.f32.mrf.mxu0 }
 0x41d   : > { %3162 = vst [vmem:[#allocation3 + $0x68] sm:$0xff] %v3146_v16  ;;  %3210 = vst [vmem:[#allocation4] sm:$0xff] %v3194_v57  ;;  %v3131_v58 = vadd.f32 %v4843_v13, %v3061_v33  ;;  %v3063_v10 = vadd.f32 %v3062_v42, %v6073_v47  ;;  %v3186_v13 = vld [vmem:[#allocation4 + $0x28] sm:$0xff] }
 0x41e   : > { %v3064_v25 = vpop.f32.mrf.mxu0 }
 0x41f   : > { %v3147_v46 = vmul.f32 0.70710677, %v3131_v58  ;;  %v3195_v54 = vadd.f32 %v3179_v30, %v3063_v10  ;;  %v3065_v35 = vadd.f32 %v3064_v25, %v6069_v9  ;;  %v4850_v58 = vld [vmem:[#allocation3 + $0x78] sm:$0xff] }
 0x420   : > { %v3066_v15 = vpop.f32.mrf.mxu0 }
 0x421   : > { %3163 = vst [vmem:[#allocation3 + $0x10] sm:$0xff] %v3147_v46  ;;  %3211 = vst [vmem:[#allocation4 + $0x48] sm:$0xff] %v3195_v54  ;;  %v3132_v56 = vadd.f32 %v4844_v26, %v3065_v35  ;;  %v3067_v5 = vadd.f32 %v3066_v15, %v6073_v47  ;;  %v3187_v26 = vld [vmem:[#allocation4 + $0x70] sm:$0xff] }
 0x422   : > { %v3070_v20 = vpop.f32.mrf.mxu0 }
 0x423   : > { %v3148_v6 = vmul.f32 0.70710677, %v3132_v56  ;;  %v3196_v7 = vadd.f32 %v3180_v2, %v3067_v5  ;;  %v3071_v3 = vadd.f32 %v3070_v20, %v6069_v9  ;;  %v4851_v56 = vld [vmem:[#allocation3 + $0x18] sm:$0xff] }
 0x424   : > { %v3072_v24 = vpop.f32.mrf.mxu0 }
 0x425   : > { %3164 = vst [vmem:[#allocation3 + $0x40] sm:$0xff] %v3148_v6  ;;  %3212 = vst [vmem:[#allocation4 + $0x60] sm:$0xff] %v3196_v7  ;;  %v3133_v0 = vadd.f32 %v4845_v31, %v3071_v3  ;;  %v3073_v27 = vadd.f32 %v3072_v24, %v6073_v47  ;;  %v3188_v31 = vld [vmem:[#allocation4 + $0x20] sm:$0xff] }
 0x426   : > { %v3074_v43 = vpop.f32.mrf.mxu0 }
 0x427   : > { %v3149_v49 = vmul.f32 0.70710677, %v3133_v0  ;;  %v3197_v55 = vadd.f32 %v3181_v52, %v3073_v27  ;;  %v3075_v38 = vadd.f32 %v3074_v43, %v6069_v9  ;;  %v4852_v0 = vld [vmem:[#allocation3 + $0x58] sm:$0xff] }
 0x428   : > { %v3076_v4 = vpop.f32.mrf.mxu0 }
 0x429   : > { %3165 = vst [vmem:[#allocation3 + $0x48] sm:$0xff] %v3149_v49  ;;  %3213 = vst [vmem:[#allocation4 + $0x68] sm:$0xff] %v3197_v55  ;;  %v3134_v32 = vadd.f32 %v4846_v29, %v3075_v38  ;;  %v3077_v18 = vadd.f32 %v3076_v4, %v6073_v47  ;;  %v3189_v29 = vld [vmem:[#allocation4 + $0x58] sm:$0xff] }
 0x42a   : > { %v3080_v21 = vpop.f32.mrf.mxu0 }
 0x42b   : > { %v3150_v14 = vmul.f32 0.70710677, %v3134_v32  ;;  %v3198_v60 = vadd.f32 %v3182_v40, %v3077_v18  ;;  %v3081_v59 = vadd.f32 %v3080_v21, %v6069_v9  ;;  %v4853_v32 = vld [vmem:[#allocation3] sm:$0xff] }
 0x42c   : > { %v3082_v62 = vpop.f32.mrf.mxu0 }
 0x42d   : > { %3166 = vst [vmem:[#allocation3 + $0x30] sm:$0xff] %v3150_v14  ;;  %3214 = vst [vmem:[#allocation4 + $0x18] sm:$0xff] %v3198_v60  ;;  %v3135_v41 = vadd.f32 %v4847_v48, %v3081_v59  ;;  %v3083_v36 = vadd.f32 %v3082_v62, %v6073_v47  ;;  %v3190_v48 = vld [vmem:[#allocation4 + $0x30] sm:$0xff] }
 0x42e   : > { %v3084_v23 = vpop.f32.mrf.mxu0 }
 0x42f   : > { %v3151_v44 = vmul.f32 0.70710677, %v3135_v41  ;;  %v3199_v37 = vadd.f32 %v3183_v34, %v3083_v36  ;;  %v3085_v19 = vadd.f32 %v3084_v23, %v6069_v9  ;;  %v4854_v41 = vld [vmem:[#allocation3 + $0x8] sm:$0xff] }
 0x430   : > { %v3086_v50 = vpop.f32.mrf.mxu0 }
 0x431   : > { %3167 = vst [vmem:[#allocation3 + $0x70] sm:$0xff] %v3151_v44  ;;  %3215 = vst [vmem:[#allocation4 + $0x10] sm:$0xff] %v3199_v37  ;;  %v3136_v11 = vadd.f32 %v4848_v17, %v3085_v19  ;;  %v3087_v1 = vadd.f32 %v3086_v50, %v6073_v47  ;;  %v3191_v17 = vld [vmem:[#allocation4 + $0x50] sm:$0xff] }
 0x432   : > { %v3090_v45 = vpop.f32.mrf.mxu0 }
 0x433   : > { %v3152_v12 = vmul.f32 0.70710677, %v3136_v11  ;;  %v3200_v51 = vadd.f32 %v3184_v39, %v3087_v1  ;;  %v3091_v22 = vadd.f32 %v3090_v45, %v6069_v9  ;;  %v4855_v11 = vld [vmem:[#allocation3 + $0x60] sm:$0xff] }
 0x434   : > { %v3092_v63 = vpop.f32.mrf.mxu0 }
 0x435   : > { %3168 = vst [vmem:[#allocation3 + $0x38] sm:$0xff] %v3152_v12  ;;  %3216 = vst [vmem:[#allocation4 + $0x38] sm:$0xff] %v3200_v51  ;;  %v3137_v61 = vadd.f32 %v4849_v8, %v3091_v22  ;;  %v3093_v53 = vadd.f32 %v3092_v63, %v6073_v47  ;;  %v3192_v8 = vld [vmem:[#allocation4 + $0x78] sm:$0xff] }
 0x436   : > { %v3094_v16 = vpop.f32.mrf.mxu0 }
 0x437   : > { %v3153_v57 = vmul.f32 0.70710677, %v3137_v61  ;;  %v3201_v33 = vadd.f32 %v3185_v28, %v3093_v53  ;;  %v3095_v42 = vadd.f32 %v3094_v16, %v6069_v9  ;;  %v4856_v61 = vld [vmem:[#allocation3 + $0x50] sm:$0xff] }
 0x438   : > { %v3096_v30 = vpop.f32.mrf.mxu0 }
 0x439   : > { %3169 = vst [vmem:[#allocation3 + $0x20] sm:$0xff] %v3153_v57  ;;  %3217 = vst [vmem:[#allocation4 + $0x40] sm:$0xff] %v3201_v33  ;;  %v3138_v10 = vadd.f32 %v4850_v58, %v3095_v42  ;;  %v3097_v25 = vadd.f32 %v3096_v30, %v6073_v47 }
 0x43a   : > { %v3100_v46 = vpop.f32.mrf.mxu0 }
 0x43b   : > { %v3154_v54 = vmul.f32 0.70710677, %v3138_v10  ;;  %v3202_v35 = vadd.f32 %v3186_v13, %v3097_v25  ;;  %v3101_v15 = vadd.f32 %v3100_v46, %v6069_v9 }
 0x43c   : > { %v3102_v2 = vpop.f32.mrf.mxu0 }
 0x43d   : > { %3170 = vst [vmem:[#allocation3 + $0x78] sm:$0xff] %v3154_v54  ;;  %3218 = vst [vmem:[#allocation4 + $0x28] sm:$0xff] %v3202_v35  ;;  %v3139_v5 = vadd.f32 %v4851_v56, %v3101_v15  ;;  %v3103_v20 = vadd.f32 %v3102_v2, %v6073_v47 }
 0x43e   : > { %v3104_v6 = vpop.f32.mrf.mxu0 }
 0x43f   : > { %v3155_v7 = vmul.f32 0.70710677, %v3139_v5  ;;  %v3203_v3 = vadd.f32 %v3187_v26, %v3103_v20  ;;  %v3105_v24 = vadd.f32 %v3104_v6, %v6069_v9 }
 0x440   : > { %v3106_v52 = vpop.f32.mrf.mxu0 }
 0x441   : > { %3171 = vst [vmem:[#allocation3 + $0x18] sm:$0xff] %v3155_v7  ;;  %3219 = vst [vmem:[#allocation4 + $0x70] sm:$0xff] %v3203_v3  ;;  %v3140_v27 = vadd.f32 %v4852_v0, %v3105_v24  ;;  %v3107_v43 = vadd.f32 %v3106_v52, %v6073_v47 }
 0x442   : > { %v3110_v49 = vpop.f32.mrf.mxu0 }
 0x443   : > { %v3156_v55 = vmul.f32 0.70710677, %v3140_v27  ;;  %v3204_v38 = vadd.f32 %v3188_v31, %v3107_v43  ;;  %v3111_v4 = vadd.f32 %v3110_v49, %v6069_v9 }
 0x444   : > { %v3112_v40 = vpop.f32.mrf.mxu0 }
 0x445   : > { %3172 = vst [vmem:[#allocation3 + $0x58] sm:$0xff] %v3156_v55  ;;  %3220 = vst [vmem:[#allocation4 + $0x20] sm:$0xff] %v3204_v38  ;;  %v3141_v18 = vadd.f32 %v4853_v32, %v3111_v4  ;;  %v3113_v21 = vadd.f32 %v3112_v40, %v6073_v47 }
 0x446   : > { %v3114_v14 = vpop.f32.mrf.mxu0 }
 0x447   : > { %v3157_v60 = vmul.f32 0.70710677, %v3141_v18  ;;  %v3205_v59 = vadd.f32 %v3189_v29, %v3113_v21  ;;  %v3115_v62 = vadd.f32 %v3114_v14, %v6069_v9 }
 0x448   : > { %v3116_v34 = vpop.f32.mrf.mxu0 }
 0x449   : > { %3173 = vst [vmem:[#allocation3] sm:$0xff] %v3157_v60  ;;  %3221 = vst [vmem:[#allocation4 + $0x58] sm:$0xff] %v3205_v59  ;;  %v3142_v36 = vadd.f32 %v4854_v41, %v3115_v62  ;;  %v3117_v23 = vadd.f32 %v3116_v34, %v6073_v47 }
 0x44a   : > { %v3120_v44 = vpop.f32.mrf.mxu0 }
 0x44b   : > { %v3158_v37 = vmul.f32 0.70710677, %v3142_v36  ;;  %v3206_v19 = vadd.f32 %v3190_v48, %v3117_v23  ;;  %v3121_v50 = vadd.f32 %v3120_v44, %v6069_v9 }
 0x44c   : > { %v3122_v39 = vpop.f32.mrf.mxu0 }
 0x44d   : > { %3174 = vst [vmem:[#allocation3 + $0x8] sm:$0xff] %v3158_v37  ;;  %3222 = vst [vmem:[#allocation4 + $0x30] sm:$0xff] %v3206_v19  ;;  %v3143_v1 = vadd.f32 %v4855_v11, %v3121_v50  ;;  %v3123_v45 = vadd.f32 %v3122_v39, %v6073_v47 }
 0x44e   : > { %v3124_v12 = vpop.f32.mrf.mxu0 }
 0x44f   : > { %v3159_v51 = vmul.f32 0.70710677, %v3143_v1  ;;  %v3207_v22 = vadd.f32 %v3191_v17, %v3123_v45  ;;  %v3125_v63 = vadd.f32 %v3124_v12, %v6069_v9 }
 0x450   : > { %v3126_v28 = vpop.f32.mrf.mxu0 }
 0x451   : > { %3175 = vst [vmem:[#allocation3 + $0x60] sm:$0xff] %v3159_v51  ;;  %3223 = vst [vmem:[#allocation4 + $0x50] sm:$0xff] %v3207_v22  ;;  %v3144_v53 = vadd.f32 %v4856_v61, %v3125_v63  ;;  %v3127_v16 = vadd.f32 %v3126_v28, %v6073_v47  ;;  %3228 = sbr.rel (%p4297_p9) target bundleno = 1740 (0x6cc), region = 92 }
 0x453   : > { %v3160_v57 = vmul.f32 0.70710677, %v3144_v53  ;;  %v3208_v33 = vadd.f32 %v3192_v8, %v3127_v16 }
 0x455   : > { %3176 = vst [vmem:[#allocation3 + $0x50] sm:$0xff] %v3160_v57  ;;  %3224 = vst [vmem:[#allocation4 + $0x78] sm:$0xff] %v3208_v33 }
 0x456   : > { %v4859_v42 = vld [vmem:[%s6336_s14 + $0x38] sm:$0xff]   ;;  %v4860_v9 = vld [vmem:[%s6336_s14 + $0x30] sm:$0xff]   ;;  %v4861_v47 = vld [vmem:[%s6336_s14 + $0x28] sm:$0xff]  }
 0x457   : > { %4410 = vmatprep.subr.bf16.mxu0 %v4859_v42  ;;  %v4862_v30 = vld [vmem:[%s6336_s14 + $0x20] sm:$0xff]   ;;  %v3238_v13 = vld [vmem:[#allocation4 + $0x8] sm:$0xff]  ;;  %v4863_v35 = vld [vmem:[%s6336_s14 + $0x18] sm:$0xff]  }
 0x458   : > { %4411 = vmatpush3.bf16.msra.mxu0 %v4859_v42  ;;  %v3239_v58 = vld [vmem:[#allocation4] sm:$0xff]  ;;  %v3254_v10 = vmul.f32 0.5, %v3238_v13  ;;  %v4867_v2 = vld [vmem:[%s6337_s27 + $0x38] sm:$0xff]   ;;  %v4868_v26 = vld [vmem:[%s6337_s27 + $0x30] sm:$0xff]  }
 0x459   : > { %4412 = vmatprep.subr.bf16.mxu0 %v4860_v9  ;;  %v3255_v25 = vmul.f32 0.5, %v3239_v58  ;;  %v4864_v56 = vld [vmem:[%s6336_s14 + $0x10] sm:$0xff]   ;;  %v3240_v5 = vld [vmem:[#allocation4 + $0x48] sm:$0xff]  ;;  %v3241_v20 = vld [vmem:[#allocation4 + $0x60] sm:$0xff]  ;;  %4442 = vmatprep.subr.bf16.mxu1 %v4867_v2 }
 0x45a   : > { %v3270_v46 = vmax.f32 %v3254_v10, 0.0  ;;  %v4865_v6 = vld [vmem:[%s6336_s14 + $0x8] sm:$0xff]   ;;  %v3243_v3 = vld [vmem:[#allocation4 + $0x18] sm:$0xff]  ;;  %4443 = vmatpush3.bf16.msra.mxu1 %v4867_v2  ;;  %v3256_v52 = vmul.f32 0.5, %v3240_v5  ;;  %v3257_v31 = vmul.f32 0.5, %v3241_v20  ;;  %v4870_v43 = vld [vmem:[%s6337_s27 + $0x20] sm:$0xff]  }
 0x45b   : > { %v3271_v54 = vmax.f32 %v3255_v25, 0.0  ;;  %v3242_v7 = vld [vmem:[#allocation4 + $0x68] sm:$0xff]  ;;  %4444 = vmatprep.subr.bf16.mxu1 %v4868_v26  ;;  %v3259_v27 = vmul.f32 0.5, %v3243_v3  ;;  %v4866_v49 = vld [vmem:[%s6336_s14] sm:$0xff]   ;;  %v3244_v29 = vld [vmem:[#allocation4 + $0x10] sm:$0xff] }
 0x45c   : > { %4413 = vmatpush3.bf16.msra.mxu0 %v4860_v9  ;;  %v4869_v24 = vld [vmem:[%s6337_s27 + $0x28] sm:$0xff]   ;;  %v3258_v0 = vmul.f32 0.5, %v3242_v7  ;;  %v3272_v55 = vmax.f32 %v3256_v52, 0.0  ;;  %v3273_v38 = vmax.f32 %v3257_v31, 0.0  ;;  %v3245_v32 = vld [vmem:[#allocation4 + $0x38] sm:$0xff]  ;;  %v3246_v21 = vld [vmem:[#allocation4 + $0x40] sm:$0xff] }
 0x45d   : > { %4414 = vmatprep.subr.bf16.mxu0 %v4861_v47  ;;  %v3286_v15 = vpack.c.bf16 %v3271_v54, %v3270_v46  ;;  %v3275_v40 = vmax.f32 %v3259_v27, 0.0  ;;  %v4871_v18 = vld [vmem:[%s6337_s27 + $0x18] sm:$0xff]   ;;  %v3247_v14 = vld [vmem:[#allocation4 + $0x28] sm:$0xff]  ;;  %v3260_v59 = vmul.f32 0.5, %v3244_v29  ;;  %v3261_v62 = vmul.f32 0.5, %v3245_v32  ;;  %v3248_v19 = vld [vmem:[#allocation4 + $0x70] sm:$0xff] }
 0x45e   : > { %4445 = vmatpush3.bf16.msra.mxu1 %v4868_v26  ;;  %v3274_v4 = vmax.f32 %v3258_v0, 0.0  ;;  %v3287_v60 = vpack.c.bf16 %v3273_v38, %v3272_v55  ;;  %v3262_v48 = vmul.f32 0.5, %v3246_v21  ;;  %v3263_v41 = vmul.f32 0.5, %v3247_v14  ;;  %v3249_v50 = vld [vmem:[#allocation4 + $0x20] sm:$0xff]  ;;  %v3250_v39 = vld [vmem:[#allocation4 + $0x58] sm:$0xff]  ;;  %v3251_v17 = vld [vmem:[#allocation4 + $0x30] sm:$0xff] }
 0x45f   : > { %4426 = vmatprep.mubr.bf16.mxu0 %v3286_v15  ;;  %4446 = vmatprep.subr.bf16.mxu1 %v4869_v24  ;;  %v3276_v36 = vmax.f32 %v3260_v59, 0.0  ;;  %v3277_v23 = vmax.f32 %v3261_v62, 0.0  ;;  %v3264_v1 = vmul.f32 0.5, %v3248_v19  ;;  %v3265_v45 = vmul.f32 0.5, %v3249_v50  ;;  %v3252_v53 = vld [vmem:[#allocation4 + $0x50] sm:$0xff]  ;;  %v3253_v16 = vld [vmem:[#allocation4 + $0x78] sm:$0xff] }
 0x460   : > { %4415 = vmatpush3.bf16.msra.mxu0 %v4861_v47  ;;  %v3288_v34 = vpack.c.bf16 %v3275_v40, %v3274_v4  ;;  %v3278_v44 = vmax.f32 %v3262_v48, 0.0  ;;  %v3279_v37 = vmax.f32 %v3263_v41, 0.0  ;;  %v3266_v51 = vmul.f32 0.5, %v3250_v39  ;;  %v4872_v58 = vld [vmem:[%s6337_s27 + $0x10] sm:$0xff]   ;;  %v4873_v10 = vld [vmem:[%s6337_s27 + $0x8] sm:$0xff]   ;;  %v4874_v25 = vld [vmem:[%s6337_s27] sm:$0xff]  }
 0x461   : > { %4416 = vmatprep.subr.bf16.mxu0 %v4862_v30  ;;  %v3289_v11 = vpack.c.bf16 %v3277_v23, %v3276_v36  ;;  %v3267_v22 = vmul.f32 0.5, %v3251_v17  ;;  %v3280_v63 = vmax.f32 %v3264_v1, 0.0  ;;  %v3281_v28 = vmax.f32 %v3265_v45, 0.0  ;;  %v3654_v46 = vld [vmem:[%s6338_s0] sm:$0xff]  ;;  %v3656_v54 = vld [vmem:[%s6338_s0 + $0x10] sm:$0xff]  ;;  %v3655_v15 = vld [vmem:[%s6338_s0 + $0x8] sm:$0xff] }
 0x462   : > { %4447 = vmatpush3.bf16.msra.mxu1 %v4869_v24  ;;  %v3290_v12 = vpack.c.bf16 %v3279_v37, %v3278_v44  ;;  %v3282_v8 = vmax.f32 %v3266_v51, 0.0  ;;  %v3268_v33 = vmul.f32 0.5, %v3252_v53  ;;  %v3269_v42 = vmul.f32 0.5, %v3253_v16  ;;  %v3657_v2 = vld [vmem:[%s6338_s0 + $0x18] sm:$0xff]  ;;  %v3658_v26 = vld [vmem:[%s6338_s0 + $0x20] sm:$0xff]  ;;  %v3660_v5 = vld [vmem:[%s6338_s0 + $0x30] sm:$0xff] }
 0x463   : > { %4448 = vmatprep.subr.bf16.mxu1 %v4870_v43  ;;  %v3283_v61 = vmax.f32 %v3267_v22, 0.0  ;;  %v3291_v57 = vpack.c.bf16 %v3281_v28, %v3280_v63  ;;  %v3661_v20 = vld [vmem:[%s6338_s0 + $0x38] sm:$0xff]  ;;  %v3663_v7 = vld [vmem:[%s6338_s0 + $0x48] sm:$0xff]  ;;  %v3664_v3 = vld [vmem:[%s6338_s0 + $0x50] sm:$0xff] }
 0x464   : > { %4417 = vmatpush3.bf16.msra.mxu0 %v4862_v30  ;;  %v3284_v47 = vmax.f32 %v3268_v33, 0.0  ;;  %v3285_v30 = vmax.f32 %v3269_v42, 0.0  ;;  %v3665_v24 = vld [vmem:[%s6338_s0 + $0x58] sm:$0xff]  ;;  %v3666_v52 = vld [vmem:[%s6338_s0 + $0x60] sm:$0xff]  ;;  %v3667_v31 = vld [vmem:[%s6338_s0 + $0x68] sm:$0xff] }
 0x465   : > { %4418 = vmatprep.subr.bf16.mxu0 %v4863_v35  ;;  %v3292_v9 = vpack.c.bf16 %v3283_v61, %v3282_v8  ;;  %v3668_v0 = vld [vmem:[%s6338_s0 + $0x70] sm:$0xff]  ;;  %v3669_v27 = vld [vmem:[%s6338_s0 + $0x78] sm:$0xff]  ;;  %v4299_v55 = vld [vmem:[%s6339_s11] ss:$0 sm:$0xff] }
 0x466   : > { %4449 = vmatpush3.bf16.msra.mxu1 %v4870_v43  ;;  %v3293_v13 = vpack.c.bf16 %v3285_v30, %v3284_v47 }
 0x467   : > { %4450 = vmatprep.subr.bf16.mxu1 %v4871_v18 }
 0x468   : > { %4419 = vmatpush3.bf16.msra.mxu0 %v4863_v35  ;;  %v4937_v35 = vmov 0  }
 0x469   : > { %4420 = vmatprep.subr.bf16.mxu0 %v4864_v56  ;;  %4857 = vset.pattern.permute.xlu0 %v4937_v35 }
 0x46a   : > { %4451 = vmatpush3.bf16.msra.mxu1 %v4871_v18  ;;  %4858 = vset.pattern.permute.xlu1 %v4937_v35 }
 0x46b   : > { %4452 = vmatprep.subr.bf16.mxu1 %v4872_v58  ;;  %3672 = vperm.xlu0 %4857, %v3654_v46  }
 0x46c   : > { %4421 = vmatpush3.bf16.msra.mxu0 %v4864_v56  ;;  %3682 = vperm.xlu1 %4858, %v3656_v54   ;;  %v3659_v56 = vld [vmem:[%s6338_s0 + $0x28] sm:$0xff] }
 0x46d   : > { %4422 = vmatprep.subr.bf16.mxu0 %v4865_v6 }
 0x46e   : > { %4453 = vmatpush3.bf16.msra.mxu1 %v4872_v58 }
 0x46f   : > { %4454 = vmatprep.subr.bf16.mxu1 %v4873_v10  ;;  %3677 = vperm.xlu0 %4857, %v3655_v15  }
 0x470   : > { %4423 = vmatpush3.bf16.msra.mxu0 %v4865_v6  ;;  %3687 = vperm.xlu1 %4858, %v3657_v2   ;;  %v3662_v6 = vld [vmem:[%s6338_s0 + $0x40] sm:$0xff]  ;;  %s3237_s0 = sld [smem:[#allocation5 + %s3236_s12]] }
 0x471   : > { %4424 = vmatprep.subr.bf16.mxu0 %v4866_v49 }
 0x472   : > { %4455 = vmatpush3.bf16.msra.mxu1 %v4873_v10 }
 0x473   : > { %4456 = vmatprep.subr.bf16.mxu1 %v4874_v25  ;;  %3692 = vperm.xlu0 %4857, %v3658_v26  }
 0x474   : > { %4425 = vmatpush3.bf16.msra.mxu0 %v4866_v49  ;;  %3697 = vperm.xlu1 %4858, %v3659_v56  }
 0x476   : > { %4457 = vmatpush3.bf16.msra.mxu1 %v4874_v25 }
 0x477   : > { %4427 = vmatmul.mubr.bf16.vlgmr.msra.gmra.mxu0 %v3287_v60  ;;  %3702 = vperm.xlu0 %4857, %v3660_v5  }
 0x478   : > { %4430 = vmatprep.mubr.bf16.mxu0 %v3288_v34  ;;  %3707 = vperm.xlu1 %4858, %v3661_v20  }
 0x47b   : > { %3712 = vperm.xlu0 %4857, %v3662_v6  }
 0x47c   : > { %3717 = vperm.xlu1 %4858, %v3663_v7  }
 0x47f   : > { %4431 = vmatmul.mubr.bf16.gmra.mxu0 %v3289_v11  ;;  %3722 = vperm.xlu0 %4857, %v3664_v3   ;;  %v6181_v3 = vld [vmem:[%s6341_s23] ss:$0 sm:$0xff] }
 0x480   : > { %4434 = vmatprep.mubr.bf16.mxu0 %v3290_v12  ;;  %3727 = vperm.xlu1 %4858, %v3665_v24  }
 0x483   : > { %3732 = vperm.xlu0 %4857, %v3666_v52  }
 0x484   : > { %3737 = vperm.xlu1 %4858, %v3667_v31  }
 0x487   : > { %4435 = vmatmul.mubr.bf16.gmra.mxu0 %v3291_v57  ;;  %3742 = vperm.xlu0 %4857, %v3668_v0  }
 0x488   : > { %4438 = vmatprep.mubr.bf16.mxu0 %v3292_v9  ;;  %3747 = vperm.xlu1 %4858, %v3669_v27  }
 0x48f   : > { %4439 = vmatmul.mubr.bf16.gmra.mxu0 %v3293_v13 }
 0x4e6   : > { %v3673_v24 = vpop.permute.xlu0 %3672 }
 0x537   : > { %v4428_v43 = vpop.f32.mrf.mxu0 }
 0x538   : > { %v3408_v29 = vadd.f32 %v4428_v43, %v4299_v55  ;;  %v3683_v43 = vpop.permute.xlu1 %3682 }
 0x539   : > { %v3399_v49 = vpop.f32.mrf.mxu0 }
 0x53a   : > { %v3400_v4 = vadd.f32 %v4299_v55, %v3399_v49  ;;  %v3464_v62 = vmax.f32 %v3408_v29, 0.0 }
 0x53b   : > { %v4429_v38 = vpop.f32.mrf.mxu0 }
 0x53c   : > { %v3411_v40 = vadd.f32 %v4429_v38, %v4299_v55  ;;  %v3462_v60 = vmax.f32 %v3400_v4, 0.0  ;;  %v3766_v4 = vld [vmem:[#allocation2 + $0x30] sm:$0xff] }
 0x53d   : > { %v3402_v32 = vpop.f32.mrf.mxu0 }
 0x53e   : > { %v3403_v18 = vadd.f32 %v4299_v55, %v3402_v32  ;;  %v3465_v21 = vmax.f32 %v3411_v40, 0.0 }
 0x53f   : > { %v4432_v14 = vpop.f32.mrf.mxu0 }
 0x540   : > { %v3463_v59 = vmax.f32 %v3403_v18, 0.0  ;;  %v3424_v34 = vadd.f32 %v4432_v14, %v4299_v55  ;;  %v3479_v23 = vpack.c.bf16 %v3465_v21, %v3464_v62  ;;  %v3678_v18 = vpop.permute.xlu0 %3677  ;;  %v3767_v62 = vld [vmem:[#allocation2] sm:$0xff] }
 0x541   : > { %v3415_v48 = vpop.f32.mrf.mxu0 }
 0x542   : > { %v3416_v41 = vadd.f32 %v4299_v55, %v3415_v48  ;;  %v3478_v36 = vpack.c.bf16 %v3463_v59, %v3462_v60  ;;  %v3468_v19 = vmax.f32 %v3424_v34, 0.0  ;;  %v3688_v48 = vpop.permute.xlu1 %3687 }
 0x543   : > { %v4433_v44 = vpop.f32.mrf.mxu0 }
 0x544   : > { %v3427_v37 = vadd.f32 %v4433_v44, %v4299_v55  ;;  %4458 = vmatprep.mubr.bf16.mxu1 %v3478_v36  ;;  %v3466_v39 = vmax.f32 %v3416_v41, 0.0  ;;  %v3768_v44 = vld [vmem:[#allocation2 + $0x58] sm:$0xff] }
 0x545   : > { %v3418_v50 = vpop.f32.mrf.mxu0  ;;  %4459 = vmatmul.mubr.bf16.vlgmr.msra.gmra.mxu1 %v3479_v23  ;;  %v6192_v23 = vstv %s3237_s0 }
 0x546   : > { %v3469_v17 = vmax.f32 %v3427_v37, 0.0  ;;  %v3419_v11 = vadd.f32 %v4299_v55, %v3418_v50 }
 0x547   : > { %v4436_v1 = vpop.f32.mrf.mxu0 }
 0x548   : > { %v3467_v45 = vmax.f32 %v3419_v11, 0.0  ;;  %v3481_v12 = vpack.c.bf16 %v3469_v17, %v3468_v19  ;;  %v3440_v51 = vadd.f32 %v4436_v1, %v4299_v55  ;;  %v3693_v1 = vpop.permute.xlu0 %3692 }
 0x549   : > { %v3431_v22 = vpop.f32.mrf.mxu0 }
 0x54a   : > { %v3480_v63 = vpack.c.bf16 %v3467_v45, %v3466_v39  ;;  %v3432_v28 = vadd.f32 %v4299_v55, %v3431_v22  ;;  %v3472_v53 = vmax.f32 %v3440_v51, 0.0 }
 0x54b   : > { %v4437_v8 = vpop.f32.mrf.mxu0 }
 0x54c   : > { %v3443_v61 = vadd.f32 %v4437_v8, %v4299_v55  ;;  %4462 = vmatprep.mubr.bf16.mxu1 %v3480_v63  ;;  %v3470_v57 = vmax.f32 %v3432_v28, 0.0  ;;  %v3769_v28 = vld [vmem:[#allocation2 + $0x18] sm:$0xff] }
 0x54d   : > { %v3434_v16 = vpop.f32.mrf.mxu0  ;;  %4463 = vmatmul.mubr.bf16.gmra.mxu1 %v3481_v12 }
 0x54e   : > { %v3473_v33 = vmax.f32 %v3443_v61, 0.0  ;;  %v3435_v42 = vadd.f32 %v4299_v55, %v3434_v16  ;;  %v3698_v61 = vpop.permute.xlu1 %3697 }
 0x54f   : > { %v4440_v9 = vpop.f32.mrf.mxu0 }
 0x550   : > { %v3471_v47 = vmax.f32 %v3435_v42, 0.0  ;;  %v3483_v30 = vpack.c.bf16 %v3473_v33, %v3472_v53  ;;  %v3456_v13 = vadd.f32 %v4440_v9, %v4299_v55  ;;  %v3770_v9 = vld [vmem:[#allocation2 + $0x50] sm:$0xff] }
 0x551   : > { %v3447_v58 = vpop.f32.mrf.mxu0 }
 0x552   : > { %v3482_v10 = vpack.c.bf16 %v3471_v47, %v3470_v57  ;;  %v3448_v25 = vadd.f32 %v4299_v55, %v3447_v58  ;;  %v3476_v35 = vmax.f32 %v3456_v13, 0.0 }
 0x553   : > { %v4441_v46 = vpop.f32.mrf.mxu0 }
 0x554   : > { %v3459_v54 = vadd.f32 %v4441_v46, %v4299_v55  ;;  %4466 = vmatprep.mubr.bf16.mxu1 %v3482_v10  ;;  %v3474_v2 = vmax.f32 %v3448_v25, 0.0 }
 0x555   : > { %v3450_v15 = vpop.f32.mrf.mxu0  ;;  %4467 = vmatmul.mubr.bf16.gmra.mxu1 %v3483_v30  ;;  %v3703_v30 = vpop.permute.xlu0 %3702 }
 0x556   : > { %v3477_v26 = vmax.f32 %v3459_v54, 0.0  ;;  %v3451_v56 = vadd.f32 %v4299_v55, %v3450_v15  ;;  %v6185_v55 = vstv %s3229_s28  ;;  %v3771_v54 = vld [vmem:[#allocation2 + $0x68] sm:$0xff]  ;;  %v3708_v15 = vpop.permute.xlu1 %3707 }
 0x558   : > { %v3475_v5 = vmax.f32 %v3451_v56, 0.0  ;;  %v3485_v20 = vpack.c.bf16 %v3477_v26, %v3476_v35  ;;  %v3772_v26 = vld [vmem:[#allocation2 + $0x8] sm:$0xff] }
 0x55a   : > { %v3484_v6 = vpack.c.bf16 %v3475_v5, %v3474_v2 }
 0x55c   : > { %4470 = vmatprep.mubr.bf16.mxu1 %v3484_v6 }
 0x55d   : > { %4471 = vmatmul.mubr.bf16.gmra.mxu1 %v3485_v20 }
 0x605   : > { %v4460_v7 = vpop.f32.mrf.mxu1 }
 0x606   : > { %v3600_v31 = vadd.f32 %v4460_v7, %v6181_v3 }
 0x607   : > { %v3591_v52 = vpop.f32.mrf.mxu1 }
 0x608   : > { %v3592_v0 = vadd.f32 %v6181_v3, %v3591_v52  ;;  %v3752_v40 = vmul.f32 %v3683_v43, %v3600_v31 }
 0x609   : > { %v4461_v27 = vpop.f32.mrf.mxu1 }
 0x60a   : > { %v3750_v49 = vmul.f32 %v3673_v24, %v3592_v0  ;;  %v3603_v21 = vadd.f32 %v4461_v27, %v6181_v3  ;;  %v3785_v41 = vmul.f32 %v6185_v55, %v3752_v40  ;;  %v3713_v24 = vpop.permute.xlu0 %3712 }
 0x60b   : > { %v3594_v38 = vpop.f32.mrf.mxu1 }
 0x60c   : > { %v3783_v29 = vmul.f32 %v6185_v55, %v3750_v49  ;;  %v3595_v32 = vadd.f32 %v6181_v3, %v3594_v38  ;;  %3832 = vxpose.xlu0.b32.start [1/16] %v3750_v49, 128  ;;  %v3753_v37 = vmul.f32 %v3688_v48, %v3603_v21  ;;  %v3801_v45 = vsub.f32 %v3768_v44, %v3785_v41  ;;  %v3773_v49 = vld [vmem:[#allocation2 + $0x48] sm:$0xff]  ;;  %v3775_v44 = vld [vmem:[#allocation2 + $0x20] sm:$0xff] }
 0x60d   : > { %v4464_v14 = vpop.f32.mrf.mxu1 }
 0x60e   : > { %v3751_v60 = vmul.f32 %v3678_v18, %v3595_v32  ;;  %v3799_v59 = vsub.f32 %v3766_v4, %v3783_v29  ;;  %v3786_v12 = vmul.f32 %v6185_v55, %v3753_v37  ;;  %v3616_v53 = vadd.f32 %v4464_v14, %v6181_v3  ;;  %v3718_v4 = vpop.permute.xlu1 %3717  ;;  %v3774_v14 = vld [vmem:[#allocation2 + $0x40] sm:$0xff] }
 0x60f   : > { %v3607_v34 = vpop.f32.mrf.mxu1  ;;  %v3818_v42 = vmul.f32 %v6192_v23, %v3801_v45 }
 0x610   : > { %v3784_v36 = vmul.f32 %v6185_v55, %v3751_v60  ;;  %3833 = vxpose.xlu0.b32.cont [2/16] %v3751_v60, 128  ;;  %v3608_v19 = vadd.f32 %v6181_v3, %v3607_v34  ;;  %v3816_v39 = vmul.f32 %v6192_v23, %v3799_v59  ;;  %v3802_v16 = vsub.f32 %v3769_v28, %v3786_v12  ;;  %v3723_v59 = vpop.permute.xlu0 %3722 }
 0x611   : > { %v4465_v50 = vpop.f32.mrf.mxu1  ;;  %v3756_v13 = vmul.f32 %v3703_v30, %v3616_v53  ;;  %v3777_v53 = vld [vmem:[#allocation2 + $0x38] sm:$0xff]  ;;  %v3778_v30 = vld [vmem:[#allocation2 + $0x60] sm:$0xff] }
 0x612   : > { %v3800_v17 = vsub.f32 %v3767_v62, %v3784_v36  ;;  %3880 = vxpose.xlu1.b32.start [1/16] %v3816_v39, 128  ;;  %v3754_v51 = vmul.f32 %v3693_v1, %v3608_v19  ;;  %v3619_v10 = vadd.f32 %v4465_v50, %v6181_v3  ;;  %v3819_v46 = vmul.f32 %v6192_v23, %v3802_v16  ;;  %v3728_v19 = vpop.permute.xlu1 %3727  ;;  %v3776_v39 = vld [vmem:[#allocation2 + $0x10] sm:$0xff] }
 0x613   : > { %v3610_v11 = vpop.f32.mrf.mxu1  ;;  %v3789_v2 = vmul.f32 %v6185_v55, %v3756_v13 }
 0x614   : > { %3834 = vxpose.xlu0.b32.cont [3/16] %v3752_v40, 128  ;;  %v3611_v22 = vadd.f32 %v6181_v3, %v3610_v11  ;;  %v3817_v63 = vmul.f32 %v6192_v23, %v3800_v17  ;;  %v3787_v57 = vmul.f32 %v6185_v55, %v3754_v51  ;;  %v3757_v56 = vmul.f32 %v3708_v15, %v3619_v10 }
 0x615   : > { %v4468_v8 = vpop.f32.mrf.mxu1  ;;  %v3805_v52 = vsub.f32 %v3772_v26, %v3789_v2 }
 0x616   : > { %3881 = vxpose.xlu1.b32.cont [2/16] %v3817_v63, 128  ;;  %v3755_v33 = vmul.f32 %v3698_v61, %v3611_v22  ;;  %v3803_v58 = vsub.f32 %v3770_v9, %v3787_v57  ;;  %v3790_v31 = vmul.f32 %v6185_v55, %v3757_v56  ;;  %v3632_v40 = vadd.f32 %v4468_v8, %v6181_v3  ;;  %v3738_v16 = vpop.permute.xlu1 %3737 }
 0x617   : > { %v3623_v47 = vpop.f32.mrf.mxu1  ;;  %v3822_v21 = vmul.f32 %v6192_v23, %v3805_v52 }
 0x618   : > { %3835 = vxpose.xlu0.b32.cont [4/16] %v3753_v37, 128  ;;  %v3788_v25 = vmul.f32 %v6185_v55, %v3755_v33  ;;  %v3624_v20 = vadd.f32 %v6181_v3, %v3623_v47  ;;  %v3820_v6 = vmul.f32 %v6192_v23, %v3803_v58  ;;  %v3806_v29 = vsub.f32 %v3773_v49, %v3790_v31 }
 0x619   : > { %v4469_v35 = vpop.f32.mrf.mxu1  ;;  %v3760_v62 = vmul.f32 %v3723_v59, %v3632_v40 }
 0x61a   : > { %3882 = vxpose.xlu1.b32.cont [3/16] %v3818_v42, 128  ;;  %v3804_v5 = vsub.f32 %v3771_v54, %v3788_v25  ;;  %v3758_v0 = vmul.f32 %v3713_v24, %v3624_v20  ;;  %v3635_v48 = vadd.f32 %v4469_v35, %v6181_v3  ;;  %v3823_v36 = vmul.f32 %v6192_v23, %v3806_v29  ;;  %v3779_v35 = vld [vmem:[#allocation2 + $0x70] sm:$0xff]  ;;  %v3748_v15 = vpop.permute.xlu1 %3747  ;;  %v3780_v20 = vld [vmem:[#allocation2 + $0x78] sm:$0xff]  ;;  %v3781_v24 = vld [vmem:[#allocation2 + $0x28] sm:$0xff] }
 0x61b   : > { %v3626_v7 = vpop.f32.mrf.mxu1  ;;  %v3793_v50 = vmul.f32 %v6185_v55, %v3760_v62 }
 0x61c   : > { %3836 = vxpose.xlu0.b32.cont [5/16] %v3754_v51, 128  ;;  %v3627_v27 = vadd.f32 %v6181_v3, %v3626_v7  ;;  %v3821_v43 = vmul.f32 %v6192_v23, %v3804_v5  ;;  %v3791_v32 = vmul.f32 %v6185_v55, %v3758_v0  ;;  %v3761_v17 = vmul.f32 %v3728_v19, %v3635_v48  ;;  %v3733_v51 = vpop.permute.xlu0 %3732 }
 0x61d   : > { %v4472_v38 = vpop.f32.mrf.mxu1  ;;  %v3809_v22 = vsub.f32 %v3776_v39, %v3793_v50 }
 0x61e   : > { %3883 = vxpose.xlu1.b32.cont [4/16] %v3819_v46, 128  ;;  %v3759_v18 = vmul.f32 %v3718_v4, %v3627_v27  ;;  %v3807_v34 = vsub.f32 %v3774_v14, %v3791_v32  ;;  %v3794_v63 = vmul.f32 %v6185_v55, %v3761_v17  ;;  %v3648_v57 = vadd.f32 %v4472_v38, %v6181_v3 }
 0x61f   : > { %v3639_v60 = vpop.f32.mrf.mxu1  ;;  %v3826_v47 = vmul.f32 %v6192_v23, %v3809_v22 }
 0x620   : > { %3837 = vxpose.xlu0.b32.cont [6/16] %v3755_v33, 128  ;;  %v3792_v41 = vmul.f32 %v6185_v55, %v3759_v18  ;;  %v3640_v1 = vadd.f32 %v6181_v3, %v3639_v60  ;;  %v3824_v45 = vmul.f32 %v6192_v23, %v3807_v34  ;;  %v3810_v33 = vsub.f32 %v3777_v53, %v3794_v63 }
 0x621   : > { %v4473_v37 = vpop.f32.mrf.mxu1 }
 0x622   : > { %3884 = vxpose.xlu1.b32.cont [5/16] %v3820_v6, 128  ;;  %v3808_v11 = vsub.f32 %v3775_v44, %v3792_v41  ;;  %v3762_v28 = vmul.f32 %v3733_v51, %v3640_v1  ;;  %v3651_v25 = vadd.f32 %v4473_v37, %v6181_v3  ;;  %v3827_v54 = vmul.f32 %v6192_v23, %v3810_v33 }
 0x623   : > { %v3642_v12 = vpop.f32.mrf.mxu1 }
 0x624   : > { %3838 = vxpose.xlu0.b32.cont [7/16] %v3756_v13, 128  ;;  %v3643_v8 = vadd.f32 %v6181_v3, %v3642_v12  ;;  %v3825_v61 = vmul.f32 %v6192_v23, %v3808_v11  ;;  %v3795_v42 = vmul.f32 %v6185_v55, %v3762_v28  ;;  %v3743_v13 = vpop.permute.xlu0 %3742  ;;  %v3765_v26 = vmul.f32 %v3748_v15, %v3651_v25 }
 0x625   : > { %v3764_v58 = vmul.f32 %v3743_v13, %v3648_v57 }
 0x626   : > { %3885 = vxpose.xlu1.b32.cont [6/16] %v3821_v43, 128  ;;  %v3763_v9 = vmul.f32 %v3738_v16, %v3643_v8  ;;  %v3811_v10 = vsub.f32 %v3778_v30, %v3795_v42  ;;  %v3798_v6 = vmul.f32 %v6185_v55, %v3765_v26 }
 0x627   : > { %v3797_v2 = vmul.f32 %v6185_v55, %v3764_v58 }
 0x628   : > { %3839 = vxpose.xlu0.b32.cont [8/16] %v3757_v56, 128  ;;  %v3796_v46 = vmul.f32 %v6185_v55, %v3763_v9  ;;  %v3828_v5 = vmul.f32 %v6192_v23, %v3811_v10  ;;  %v3814_v52 = vsub.f32 %v3781_v24, %v3798_v6 }
 0x629   : > { %v3813_v3 = vsub.f32 %v3780_v20, %v3797_v2 }
 0x62a   : > { %3886 = vxpose.xlu1.b32.cont [7/16] %v3822_v21, 128  ;;  %v3812_v56 = vsub.f32 %v3779_v35, %v3796_v46 }
 0x62b   : > { %v3830_v31 = vmul.f32 %v6192_v23, %v3813_v3 }
 0x62c   : > { %3840 = vxpose.xlu0.b32.cont [9/16] %v3758_v0, 128  ;;  %v3829_v7 = vmul.f32 %v6192_v23, %v3812_v56  ;;  %v3831_v0 = vmul.f32 %v6192_v23, %v3814_v52 }
 0x62e   : > { %3887 = vxpose.xlu1.b32.cont [8/16] %v3823_v36, 128 }
 0x630   : > { %3841 = vxpose.xlu0.b32.cont [10/16] %v3759_v18, 128 }
 0x632   : > { %3888 = vxpose.xlu1.b32.cont [9/16] %v3824_v45, 128 }
 0x634   : > { %3842 = vxpose.xlu0.b32.cont [11/16] %v3760_v62, 128 }
 0x636   : > { %3889 = vxpose.xlu1.b32.cont [10/16] %v3825_v61, 128 }
 0x638   : > { %3843 = vxpose.xlu0.b32.cont [12/16] %v3761_v17, 128 }
 0x63a   : > { %3890 = vxpose.xlu1.b32.cont [11/16] %v3826_v47, 128 }
 0x63c   : > { %3844 = vxpose.xlu0.b32.cont [13/16] %v3762_v28, 128 }
 0x63e   : > { %3891 = vxpose.xlu1.b32.cont [12/16] %v3827_v54, 128 }
 0x640   : > { %3845 = vxpose.xlu0.b32.cont [14/16] %v3763_v9, 128 }
 0x642   : > { %3892 = vxpose.xlu1.b32.cont [13/16] %v3828_v5, 128 }
 0x644   : > { %3846 = vxpose.xlu0.b32.cont [15/16] %v3764_v58, 128 }
 0x646   : > { %3893 = vxpose.xlu1.b32.cont [14/16] %v3829_v7, 128 }
 0x648   : > { %3847 = vxpose.xlu0.b32.end [16/16] %v3765_v26, 128 }
 0x64a   : > { %3894 = vxpose.xlu1.b32.cont [15/16] %v3830_v31, 128 }
 0x64e   : > { %3895 = vxpose.xlu1.b32.end [16/16] %v3831_v0, 128 }
 0x688   : > { %v3848_v27 = vpop.trf.xlu0 }
 0x689   : > { %3864 = vst [vmem:[%s5127_s1] sm:$0xff] %v3848_v27 }
 0x68c   : > { %v3849_v55 = vpop.trf.xlu0 }
 0x68d   : > { %3865 = vst [vmem:[%s5127_s1 + $0x8] sm:$0xff] %v3849_v55 }
 0x68e   : > { %v3896_v43 = vpop.trf.xlu1 }
 0x68f   : > { %3912 = vst [vmem:[%s5132_s22] sm:$0xff] %v3896_v43 }
 0x690   : > { %v3850_v49 = vpop.trf.xlu0 }
 0x691   : > { %3866 = vst [vmem:[%s5127_s1 + $0x10] sm:$0xff] %v3850_v49 }
 0x692   : > { %v3897_v38 = vpop.trf.xlu1 }
 0x693   : > { %3913 = vst [vmem:[%s5132_s22 + $0x8] sm:$0xff] %v3897_v38 }
 0x694   : > { %v3851_v4 = vpop.trf.xlu0 }
 0x695   : > { %3867 = vst [vmem:[%s5127_s1 + $0x18] sm:$0xff] %v3851_v4 }
 0x696   : > { %v3898_v23 = vpop.trf.xlu1 }
 0x697   : > { %3914 = vst [vmem:[%s5132_s22 + $0x10] sm:$0xff] %v3898_v23 }
 0x698   : > { %v3852_v40 = vpop.trf.xlu0 }
 0x699   : > { %3868 = vst [vmem:[%s5127_s1 + $0x20] sm:$0xff] %v3852_v40 }
 0x69a   : > { %v3899_v29 = vpop.trf.xlu1 }
 0x69b   : > { %3915 = vst [vmem:[%s5132_s22 + $0x18] sm:$0xff] %v3899_v29 }
 0x69c   : > { %v3853_v32 = vpop.trf.xlu0 }
 0x69d   : > { %3869 = vst [vmem:[%s5127_s1 + $0x28] sm:$0xff] %v3853_v32 }
 0x69e   : > { %v3900_v18 = vpop.trf.xlu1 }
 0x69f   : > { %3916 = vst [vmem:[%s5132_s22 + $0x20] sm:$0xff] %v3900_v18 }
 0x6a0   : > { %v3854_v21 = vpop.trf.xlu0 }
 0x6a1   : > { %3870 = vst [vmem:[%s5127_s1 + $0x30] sm:$0xff] %v3854_v21 }
 0x6a2   : > { %v3901_v14 = vpop.trf.xlu1 }
 0x6a3   : > { %3917 = vst [vmem:[%s5132_s22 + $0x28] sm:$0xff] %v3901_v14 }
 0x6a4   : > { %v3855_v60 = vpop.trf.xlu0 }
 0x6a5   : > { %3871 = vst [vmem:[%s5127_s1 + $0x38] sm:$0xff] %v3855_v60 }
 0x6a6   : > { %v3902_v59 = vpop.trf.xlu1 }
 0x6a7   : > { %3918 = vst [vmem:[%s5132_s22 + $0x30] sm:$0xff] %v3902_v59 }
 0x6a8   : > { %v3856_v62 = vpop.trf.xlu0 }
 0x6a9   : > { %3872 = vst [vmem:[%s5127_s1 + $0x40] sm:$0xff] %v3856_v62 }
 0x6aa   : > { %v3903_v34 = vpop.trf.xlu1 }
 0x6ab   : > { %3919 = vst [vmem:[%s5132_s22 + $0x38] sm:$0xff] %v3903_v34 }
 0x6ac   : > { %v3857_v48 = vpop.trf.xlu0 }
 0x6ad   : > { %3873 = vst [vmem:[%s5127_s1 + $0x48] sm:$0xff] %v3857_v48 }
 0x6ae   : > { %v3904_v41 = vpop.trf.xlu1 }
 0x6af   : > { %3920 = vst [vmem:[%s5132_s22 + $0x40] sm:$0xff] %v3904_v41 }
 0x6b0   : > { %v3858_v36 = vpop.trf.xlu0 }
 0x6b1   : > { %3874 = vst [vmem:[%s5127_s1 + $0x50] sm:$0xff] %v3858_v36 }
 0x6b2   : > { %v3905_v44 = vpop.trf.xlu1 }
 0x6b3   : > { %3921 = vst [vmem:[%s5132_s22 + $0x48] sm:$0xff] %v3905_v44 }
 0x6b4   : > { %v3859_v37 = vpop.trf.xlu0 }
 0x6b5   : > { %3875 = vst [vmem:[%s5127_s1 + $0x58] sm:$0xff] %v3859_v37 }
 0x6b6   : > { %v3906_v19 = vpop.trf.xlu1 }
 0x6b7   : > { %3922 = vst [vmem:[%s5132_s22 + $0x50] sm:$0xff] %v3906_v19 }
 0x6b8   : > { %v3860_v50 = vpop.trf.xlu0 }
 0x6b9   : > { %3876 = vst [vmem:[%s5127_s1 + $0x60] sm:$0xff] %v3860_v50 }
 0x6ba   : > { %v3907_v39 = vpop.trf.xlu1 }
 0x6bb   : > { %3923 = vst [vmem:[%s5132_s22 + $0x58] sm:$0xff] %v3907_v39 }
 0x6bc   : > { %v3861_v17 = vpop.trf.xlu0 }
 0x6bd   : > { %3877 = vst [vmem:[%s5127_s1 + $0x68] sm:$0xff] %v3861_v17 }
 0x6be   : > { %v3908_v11 = vpop.trf.xlu1 }
 0x6bf   : > { %3924 = vst [vmem:[%s5132_s22 + $0x60] sm:$0xff] %v3908_v11 }
 0x6c0   : > { %v3862_v1 = vpop.trf.xlu0 }
 0x6c1   : > { %3878 = vst [vmem:[%s5127_s1 + $0x70] sm:$0xff] %v3862_v1 }
 0x6c2   : > { %v3909_v45 = vpop.trf.xlu1 }
 0x6c3   : > { %3925 = vst [vmem:[%s5132_s22 + $0x68] sm:$0xff] %v3909_v45 }
 0x6c4   : > { %v3863_v12 = vpop.trf.xlu0 }
 0x6c5   : > { %3879 = vst [vmem:[%s5127_s1 + $0x78] sm:$0xff] %v3863_v12 }
 0x6c6   : > { %v3910_v51 = vpop.trf.xlu1 }
 0x6c7   : > { %3926 = vst [vmem:[%s5132_s22 + $0x70] sm:$0xff] %v3910_v51 }
 0x6ca   : > { %v3911_v22 = vpop.trf.xlu1 }
 0x6cb   : > { %3927 = vst [vmem:[%s5132_s22 + $0x78] sm:$0xff] %v3911_v22 }
 0x6cc PF: > { %s6342_s21 = sld [smem:[#allocation11_spill]] }
 0x6cd   : > { %s6344_s22 = sld [smem:[#allocation10_spill]] }
 0x6ce   : > { %s6345_s23 = sld [smem:[#allocation12_spill]] }
 0x6cf   : > { %s6346_s24 = sld [smem:[#allocation13_spill]] }
 0x6d2   : > { %s28_s25 = sadd.s32 1, %s6342_s21   ;;  %s6343_s21 = sld [smem:[#allocation9_spill]] }
 0x6d3   : > { %p25_p10 = scmp.ge.s32.totalorder %s28_s25, 10  }
 0x6d5   :  { %27 = sbr.rel (!%p25_p10) target bundleno = 14 (0xe), region = 156 }
 0x6da   :  { %3965 = vsyncpa [#allocation6], 1 }
 0x6db   :  { %3967 = vsyncpa [#allocation6 + $0x1], 1 }

</bundles_post_ra>
